<compile_context>
chip_gen: v6e
topology: v6e:2x2x1
jax: 0.10.0
libtpu: 0.0.40
codegen_flags: <defaults>
</compile_context>

<pallas_src>
import math

import jax
import jax.numpy as jnp
from jax.experimental import pallas as pl
from jax.experimental.pallas import tpu as pltpu

# ---------------- problem configuration (small, deterministic) ---------------
D_MODEL = 32
NUM_HEADS = 4
NUM_LAYERS = 2
NUM_QUERIES = 8
HIDDEN_DIM = 64
D_OUTPUT = 12
B = 2
T = 16

# row indices of the per-layer vectors packed into the `vec` buffer (L, 16, VW)
_I_N1W, _I_N1B, _I_N2W, _I_N2B, _I_N3W, _I_N3B = 0, 1, 2, 3, 4, 5
_I_SA_BQ, _I_SA_BK, _I_SA_BV, _I_SA_BO = 6, 7, 8, 9
_I_CA_BQ, _I_CA_BK, _I_CA_BV, _I_CA_BO = 10, 11, 12, 13
_I_FF2_B, _I_FF1_B = 14, 15
_N_VEC = 16


# ---------------- host-side helpers ------------------------------------------
def sinusoidal_pos_encoding(t, d):
    pos = jnp.arange(t, dtype=jnp.float32)[:, None]
    div = jnp.exp(jnp.arange(0, d, 2, dtype=jnp.float32) * (-math.log(10000.0) / d))
    pe = jnp.zeros((t, d), jnp.float32)
    pe = pe.at[:, 0::2].set(jnp.sin(pos * div))
    pe = pe.at[:, 1::2].set(jnp.cos(pos * div))
    return pe


def _pack_weights(params):
    """Pre-transpose + pack all weights into 4 buffers (host-side layout plumbing)."""
    L, _, D = params['sa_in_w'].shape
    HID = params['ffn1_w'].shape[1]
    O = params['op_w'].shape[0]
    assert O <= D, "output width packed into D-wide fin_op buffer"
    f32 = jnp.float32

    def qkv_t(w):  # (L, 3D, D) -> three (L, D, D), transposed for x @ w
        return (jnp.swapaxes(w[:, 0:D, :], 1, 2),
                jnp.swapaxes(w[:, D:2 * D, :], 1, 2),
                jnp.swapaxes(w[:, 2 * D:3 * D, :], 1, 2))

    sa_q, sa_k, sa_v = qkv_t(params['sa_in_w'])
    ca_q, ca_k, ca_v = qkv_t(params['ca_in_w'])
    sa_o = jnp.swapaxes(params['sa_out_w'], 1, 2)
    ca_o = jnp.swapaxes(params['ca_out_w'], 1, 2)
    # (L, 8, D, D) -> flatten leading dims so the kernel uses single-int indexing
    w_dd = jnp.stack([sa_q, sa_k, sa_v, sa_o, ca_q, ca_k, ca_v, ca_o],
                     axis=1).reshape(L * 8, D, D)

    vw = max(D, HID)

    # FFN weights: rows 0:D hold W1^T (D x HID), rows D:D+HID hold W2^T (HID x D),
    # both lane-padded to vw -> one buffer per layer instead of two.
    f1 = jnp.swapaxes(params['ffn1_w'], 1, 2)                     # (L, D, HID)
    f2 = jnp.swapaxes(params['ffn2_w'], 1, 2)                     # (L, HID, D)
    w_ff = jnp.concatenate(
        [jnp.pad(f1, ((0, 0), (0, 0), (0, vw - HID))),
         jnp.pad(f2, ((0, 0), (0, 0), (0, vw - D)))], axis=1)     # (L, D+HID, vw)

    def pad_row(v):  # (L, n) -> (L, vw)
        return jnp.pad(v, ((0, 0), (0, vw - v.shape[-1])))

    sab, cab = params['sa_in_b'], params['ca_in_b']
    rows = [params['n1_w'], params['n1_b'], params['n2_w'], params['n2_b'],
            params['n3_w'], params['n3_b'],
            sab[:, 0:D], sab[:, D:2 * D], sab[:, 2 * D:3 * D], params['sa_out_b'],
            cab[:, 0:D], cab[:, D:2 * D], cab[:, 2 * D:3 * D], params['ca_out_b'],
            params['ffn2_b'], params['ffn1_b']]
    vec = jnp.stack([pad_row(r) for r in rows], axis=1)              # (L, 16, vw)

    # final-norm weight/bias, output bias, output weight packed into one (3+D, D) slab
    fin_op = jnp.concatenate(
        [params['fn_w'][None, :],
         params['fn_b'][None, :],
         jnp.pad(params['op_b'], (0, D - O))[None, :],
         jnp.pad(params['op_w'].T, ((0, 0), (0, D - O)))], axis=0)   # (3 + D, D)

    return dict(w_dd=w_dd.astype(f32),
                w_ff=w_ff.astype(f32),
                vec=vec.astype(f32),
                fin_op=fin_op.astype(f32))


def _default_fuse_batch():
    """Fuse batch into one grid step on single-TC chips (v5e/v6e); keep batch as a
    core-parallel grid axis on v7x (2 TensorCores per chip)."""
    try:
        kind = jax.devices()[0].device_kind.lower()
    except Exception:
        return True
    return not ("v7" in kind or "7x" in kind)


# ---------------- Pallas kernel factory ---------------------------------------
def _make_decoder_kernel(num_layers, num_heads, d_model, d_hidden, d_output,
                         use_self_bias, use_cross_bias):
    dh = d_model // num_heads
    scale = 1.0 / math.sqrt(dh)

    def kernel(*refs):
        qpos_ref, mem_ref = refs[0], refs[1]
        idx = 2
        sb_ref = cb_ref = None
        if use_self_bias:
            sb_ref = refs[idx]
            idx += 1
        if use_cross_bias:
            cb_ref = refs[idx]
            idx += 1
        w_dd_ref, w_ff_ref, vec_ref, fin_op_ref, out_ref = refs[idx:]

        qpos = qpos_ref[...]              # (Rq, D) query positional embeddings
        mem_all = mem_ref[0]              # (2, Rm, D)
        mem_k = mem_all[0]                # memory + pos  (cross-attn keys)
        mem_v = mem_all[1]                # memory        (cross-attn values)
        self_bias = sb_ref[0] if use_self_bias else None
        cross_bias = cb_ref[0] if use_cross_bias else None

        # per-head lane masks (static constants; hoisted out of all loops)
        lane = jax.lax.broadcasted_iota(jnp.int32, (1, d_model), 1)
        head_masks = [((lane >= h * dh) & (lane < (h + 1) * dh)).astype(jnp.float32)
                      for h in range(num_heads)]

        def dot(a, b):
            return jnp.dot(a, b, preferred_element_type=jnp.float32)

        def dot_nt(a, b):  # a (M, K), b (N, K) -> (M, N); no explicit transpose op
            return jax.lax.dot_general(a, b, (((1,), (1,)), ((), ())),
                                       preferred_element_type=jnp.float32)

        def layer_norm(x, w, b):
            mu = jnp.mean(x, axis=-1, keepdims=True)
            xc = x - mu
            var = jnp.mean(xc * xc, axis=-1, keepdims=True)
            return xc * jax.lax.rsqrt(var + 1e-5) * w + b

        def mha(q_in, k_in, v_in, wq, wk, wv, wo, bq, bk, bv, bo, bias):
            qp = (dot(q_in, wq) + bq) * scale          # (Rq, D)
            kp = dot(k_in, wk) + bk                    # (Rk, D)
            vp = dot(v_in, wv) + bv                    # (Rk, D)
            acc = jnp.zeros_like(qp)
            for hm in head_masks:
                qh = qp * hm                           # zero non-head lanes (VPU)
                s = dot_nt(qh, kp)                     # per-head scores (Rq, Rk)
                if bias is not None:
                    s = s + bias
                s = s - jnp.max(s, axis=-1, keepdims=True)
                p = jnp.exp(s)
                p = p * pl.reciprocal(jnp.sum(p, axis=-1, keepdims=True), approx=True)
                acc = acc + dot(p, vp * hm)            # lands in this head's lanes
            return dot(acc, wo) + bo                   # single output projection

        tgt = jnp.zeros_like(qpos)
        for l in range(num_layers):
            vl = vec_ref[l]                            # (16, VW)
            wff = w_ff_ref[l]                          # (D+HID, VW)

            def vrow(i, n=d_model, _vl=vl):
                return _vl[i:i + 1, :n]                # (1, n) lane-prefix slice

            def wmat(j, _l=l):
                return w_dd_ref[8 * _l + j]            # (D, D), pre-transposed

            # --- self-attention (pre-norm) ---
            t2 = layer_norm(tgt, vrow(_I_N1W), vrow(_I_N1B))
            qk = t2 + qpos
            tgt = tgt + mha(qk, qk, t2,
                            wmat(0), wmat(1), wmat(2), wmat(3),
                            vrow(_I_SA_BQ), vrow(_I_SA_BK),
                            vrow(_I_SA_BV), vrow(_I_SA_BO),
                            self_bias)
            # --- cross-attention over video features ---
            t2 = layer_norm(tgt, vrow(_I_N2W), vrow(_I_N2B))
            tgt = tgt + mha(t2 + qpos, mem_k, mem_v,
                            wmat(4), wmat(5), wmat(6), wmat(7),
                            vrow(_I_CA_BQ), vrow(_I_CA_BK),
                            vrow(_I_CA_BV), vrow(_I_CA_BO),
                            cross_bias)
            # --- feed-forward (relu) ---
            t2 = layer_norm(tgt, vrow(_I_N3W), vrow(_I_N3B))
            h = jnp.maximum(dot(t2, wff[0:d_model, :d_hidden])
                            + vrow(_I_FF1_B, d_hidden), 0.0)
            tgt = tgt + dot(h, wff[d_model:d_model + d_hidden, :d_model]) \
                      + vrow(_I_FF2_B)

        fin = fin_op_ref[...]                          # (3 + D, D)
        tgt = layer_norm(tgt, fin[0:1, :], fin[1:2, :])
        out_ref[0] = dot(tgt, fin[3:3 + d_model, :d_output]) + fin[2:3, :d_output]

    return kernel


# ---------------- wrapper ------------------------------------------------------
def video_transformer_query_decoder(features, params, features_mask=None,
                                    num_heads=NUM_HEADS, fuse_batch=None):
    b, t, d = features.shape
    q = params['query_embed'].shape[0]
    o = params['op_w'].shape[0]
    hid = params['ffn1_w'].shape[1]
    num_layers = params['sa_in_w'].shape[0]
    if fuse_batch is None:
        fuse_batch = _default_fuse_batch()

    # host-side layout plumbing
    pos = sinusoidal_pos_encoding(t, d)
    mem_k = (features + pos[None]).astype(jnp.float32)   # keys carry the pos encoding
    mem_v = features.astype(jnp.float32)
    packed = _pack_weights(params)
    qe = params['query_embed'].astype(jnp.float32)

    neg = jnp.float32(-1e9)
    # NOTE: if a batch element is fully masked, softmax becomes uniform over masked
    # keys instead of NaN (PyTorch) — degenerate case only.
    self_bias = cross_bias = None
    if fuse_batch:
        gb, rq, rm = 1, b * q, b * t
        qpos = jnp.tile(qe, (b, 1))                                      # (B*Q, D)
        mem_stack = jnp.stack([mem_k.reshape(rm, d), mem_v.reshape(rm, d)], 0)[None]
        use_self_bias = b > 1
        use_cross_bias = (b > 1) or (features_mask is not None)
        bid_q = jnp.repeat(jnp.arange(b), q)
        bid_t = jnp.repeat(jnp.arange(b), t)
        if use_self_bias:
            self_bias = jnp.where(bid_q[:, None] == bid_q[None, :],
                                  0.0, neg).astype(jnp.float32)[None]    # (1,B*Q,B*Q)
        if use_cross_bias:
            cb = jnp.where(bid_q[:, None] == bid_t[None, :], 0.0, neg)
            if features_mask is not None:
                cb = cb + jnp.where(features_mask.reshape(rm), neg, 0.0)[None, :]
            cross_bias = cb.astype(jnp.float32)[None]                    # (1,B*Q,B*T)
    else:
        gb, rq, rm = b, q, t
        qpos = qe
        mem_stack = jnp.stack([mem_k, mem_v], axis=1)                    # (B, 2, T, D)
        use_self_bias = False
        use_cross_bias = features_mask is not None
        if use_cross_bias:
            cross_bias = jnp.broadcast_to(
                jnp.where(features_mask, neg, 0.0).astype(jnp.float32)[:, None, :],
                (b, q, t))

    def full_spec(arr):
        n = arr.ndim
        return pl.BlockSpec(arr.shape, lambda i, _n=n: (0,) * _n)

    inputs = [qpos, mem_stack]
    in_specs = [full_spec(qpos),
                pl.BlockSpec((1, 2, rm, d), lambda i: (i, 0, 0, 0))]
    if use_self_bias:
        inputs.append(self_bias)
        in_specs.append(pl.BlockSpec((1, rq, rq), lambda i: (i, 0, 0)))
    if use_cross_bias:
        inputs.append(cross_bias)
        in_specs.append(pl.BlockSpec((1, rq, rm), lambda i: (i, 0, 0)))
    for name in ('w_dd', 'w_ff', 'vec', 'fin_op'):
        inputs.append(packed[name])
        in_specs.append(full_spec(packed[name]))

    kernel = _make_decoder_kernel(num_layers, num_heads, d, hid, o,
                                  use_self_bias, use_cross_bias)
    out = pl.pallas_call(
        kernel,
        out_shape=jax.ShapeDtypeStruct((gb, rq, o), jnp.float32),
        grid_spec=pltpu.PrefetchScalarGridSpec(
            num_scalar_prefetch=0,
            grid=(gb,),
            in_specs=in_specs,
            out_specs=pl.BlockSpec((1, rq, o), lambda i: (i, 0, 0)),
        ),
        compiler_params=pltpu.CompilerParams(dimension_semantics=("parallel",)),
    )(*inputs)
    return out.reshape(b, q, o)


# ---------------- deterministic parameter initialization ----------------------
def init_params(key):
    L, D, H, Q, O = NUM_LAYERS, D_MODEL, HIDDEN_DIM, NUM_QUERIES, D_OUTPUT
    keys = iter(jax.random.split(key, 32))

    def normal(shape, std=0.02):
        return (std * jax.random.normal(next(keys), shape)).astype(jnp.float32)

    p = {
        'query_embed': normal((Q, D)),
        'sa_in_w': normal((L, 3 * D, D)), 'sa_in_b': normal((L, 3 * D)),
        'sa_out_w': normal((L, D, D)),    'sa_out_b': normal((L, D)),
        'ca_in_w': normal((L, 3 * D, D)), 'ca_in_b': normal((L, 3 * D)),
        'ca_out_w': normal((L, D, D)),    'ca_out_b': normal((L, D)),
        'ffn1_w': normal((L, H, D)),      'ffn1_b': normal((L, H)),
        'ffn2_w': normal((L, D, H)),      'ffn2_b': normal((L, D)),
        'op_w': normal((O, D)),           'op_b': normal((O,)),
        'fn_w': 1.0 + normal((D,), 0.05), 'fn_b': normal((D,), 0.05),
    }
    for n in ('n1', 'n2', 'n3'):
        p[f'{n}_w'] = 1.0 + normal((L, D), 0.05)
        p[f'{n}_b'] = normal((L, D), 0.05)
    return p


# ---------------- pure-JAX reference (same math, for validation) --------------
def _ref_layer_norm(x, w, b, eps=1e-5):
    mu = jnp.mean(x, axis=-1, keepdims=True)
    xc = x - mu
    var = jnp.mean(xc * xc, axis=-1, keepdims=True)
    return xc * jax.lax.rsqrt(var + eps) * w + b


def _ref_mha(q_in, k_in, v_in, in_w, in_b, out_w, out_b, num_heads, bias=None):
    d = q_in.shape[-1]
    dh = d // num_heads
    wq, wk, wv = in_w[:d], in_w[d:2 * d], in_w[2 * d:]
    bq, bk, bv = in_b[:d], in_b[d:2 * d], in_b[2 * d:]
    qp = q_in @ wq.T + bq
    kp = k_in @ wk.T + bk
    vp = v_in @ wv.T + bv
    scale = 1.0 / math.sqrt(dh)
    outs = []
    for h in range(num_heads):
        sl = slice(h * dh, (h + 1) * dh)
        s = (qp[:, sl] * scale) @ kp[:, sl].T
        if bias is not None:
            s = s + bias
        p = jax.nn.softmax(s, axis=-1)
        outs.append(p @ vp[:, sl])
    return jnp.concatenate(outs, -1) @ out_w.T + out_b


def reference_forward(features, params, features_mask=None, num_heads=NUM_HEADS):
    b, t, d = features.shape
    pos = sinusoidal_pos_encoding(t, d)
    qe = params['query_embed']
    num_layers = params['sa_in_w'].shape[0]
    outs = []
    for bi in range(b):
        mem = features[bi]
        mem_k = mem + pos
        bias = None
        if features_mask is not None:
            bias = jnp.where(features_mask[bi][None, :], -1e9, 0.0)
        tgt = jnp.zeros_like(qe)
        for l in range(num_layers):
            t2 = _ref_layer_norm(tgt, params['n1_w'][l], params['n1_b'][l])
            qk = t2 + qe
            tgt = tgt + _ref_mha(qk, qk, t2,
                                 params['sa_in_w'][l], params['sa_in_b'][l],
                                 params['sa_out_w'][l], params['sa_out_b'][l],
                                 num_heads)
            t2 = _ref_layer_norm(tgt, params['n2_w'][l], params['n2_b'][l])
            tgt = tgt + _ref_mha(t2 + qe, mem_k, mem,
                                 params['ca_in_w'][l], params['ca_in_b'][l],
                                 params['ca_out_w'][l], params['ca_out_b'][l],
                                 num_heads, bias=bias)
            t2 = _ref_layer_norm(tgt, params['n3_w'][l], params['n3_b'][l])
            h = jnp.maximum(t2 @ params['ffn1_w'][l].T + params['ffn1_b'][l], 0.0)
            tgt = tgt + h @ params['ffn2_w'][l].T + params['ffn2_b'][l]
        tgt = _ref_layer_norm(tgt, params['fn_w'], params['fn_b'])
        outs.append(tgt @ params['op_w'].T + params['op_b'])
    return jnp.stack(outs, 0)


# TODO(synk): inference() (argmax + EOS-based padding) is host-side post-processing
#             and is not implemented as a kernel.

if __name__ == "__main__":
    key = jax.random.PRNGKey(0)
    k_feat, k_params = jax.random.split(key)
    features = jax.random.normal(k_feat, (B, T, D_MODEL), dtype=jnp.float32)
    params = init_params(k_params)
    # key-padding mask: last 4 timesteps of batch element 1 are padding
    mask = jnp.zeros((B, T), dtype=bool).at[1, T - 4:].set(True)

    with jax.default_matmul_precision("highest"):
        ref_plain = jax.block_until_ready(reference_forward(features, params, None))
        ref_masked = jax.block_until_ready(reference_forward(features, params, mask))

    cases = [
        ("fused/no-mask", None, True, ref_plain),
        ("fused/masked", mask, True, ref_masked),
        ("grid/no-mask", None, False, ref_plain),
        ("grid/masked", mask, False, ref_masked),
        ("auto/masked", mask, None, ref_masked),
    ]
    for name, m, fb, ref in cases:
        out = jax.block_until_ready(
            video_transformer_query_decoder(features, params, features_mask=m,
                                            fuse_batch=fb))
        assert out.shape == (B, NUM_QUERIES, D_OUTPUT)
        err = float(jnp.max(jnp.abs(out - ref)))
        if err > 5e-3:
            raise AssertionError(f"{name}: kernel/reference mismatch, max |err| = {err}")
    print("KERNEL_OK")
</pallas_src>

<mosaic_0001>
module attributes {stable_mosaic.version = 11 : i64} {
  func.func @kernel(%arg0: i32, %arg1: memref<16x32xf32, #tpu.memory_space<vmem>>, %arg2: memref<1x2x32x32xf32, #tpu.memory_space<vmem>>, %arg3: memref<1x16x16xf32, #tpu.memory_space<vmem>>, %arg4: memref<1x16x32xf32, #tpu.memory_space<vmem>>, %arg5: memref<16x32x32xf32, #tpu.memory_space<vmem>>, %arg6: memref<2x96x64xf32, #tpu.memory_space<vmem>>, %arg7: memref<2x16x64xf32, #tpu.memory_space<vmem>>, %arg8: memref<35x32xf32, #tpu.memory_space<vmem>>, %arg9: memref<1x16x12xf32, #tpu.memory_space<vmem>>) attributes {dimension_semantics = [#tpu.dimension_semantics<parallel>], iteration_bounds = array<i64: 1>, scalar_prefetch = 0 : i64, scratch_operands = 0 : i64, tpu.core_type = #tpu.core_type<tc>, window_params = [{pipeline_mode = #tpu.pipeline_mode<synchronous>, transform_indices = @transform_0, window_bounds = array<i64: 16, 32>}, {transform_indices = @transform_1, window_bounds = array<i64: 1, 2, 32, 32>}, {transform_indices = @transform_2, window_bounds = array<i64: 1, 16, 16>}, {transform_indices = @transform_3, window_bounds = array<i64: 1, 16, 32>}, {pipeline_mode = #tpu.pipeline_mode<synchronous>, transform_indices = @transform_4, window_bounds = array<i64: 16, 32, 32>}, {pipeline_mode = #tpu.pipeline_mode<synchronous>, transform_indices = @transform_5, window_bounds = array<i64: 2, 96, 64>}, {pipeline_mode = #tpu.pipeline_mode<synchronous>, transform_indices = @transform_6, window_bounds = array<i64: 2, 16, 64>}, {pipeline_mode = #tpu.pipeline_mode<synchronous>, transform_indices = @transform_7, window_bounds = array<i64: 35, 32>}, {transform_indices = @transform_8, window_bounds = array<i64: 1, 16, 12>}]} {
    %c0 = arith.constant 0 : index
    %c0_0 = arith.constant 0 : index
    %0 = vector.load %arg1[%c0, %c0_0] : memref<16x32xf32, #tpu.memory_space<vmem>>, vector<16x32xf32>
    %c0_1 = arith.constant 0 : index
    %c0_2 = arith.constant 0 : index
    %c0_3 = arith.constant 0 : index
    %c0_4 = arith.constant 0 : index
    %1 = vector.load %arg2[%c0_1, %c0_2, %c0_3, %c0_4] : memref<1x2x32x32xf32, #tpu.memory_space<vmem>>, vector<1x2x32x32xf32>
    %2 = vector.shape_cast %1 : vector<1x2x32x32xf32> to vector<2x32x32xf32>
    %3 = vector.extract_strided_slice %2 {offsets = [0, 0, 0], sizes = [1, 32, 32], strides = [1, 1, 1]} : vector<2x32x32xf32> to vector<1x32x32xf32>
    %4 = vector.shape_cast %3 : vector<1x32x32xf32> to vector<32x32xf32>
    %5 = vector.extract_strided_slice %2 {offsets = [1, 0, 0], sizes = [1, 32, 32], strides = [1, 1, 1]} : vector<2x32x32xf32> to vector<1x32x32xf32>
    %6 = vector.shape_cast %5 : vector<1x32x32xf32> to vector<32x32xf32>
    %c0_5 = arith.constant 0 : index
    %c0_6 = arith.constant 0 : index
    %c0_7 = arith.constant 0 : index
    %7 = vector.load %arg3[%c0_5, %c0_6, %c0_7] : memref<1x16x16xf32, #tpu.memory_space<vmem>>, vector<1x16x16xf32>
    %8 = vector.shape_cast %7 : vector<1x16x16xf32> to vector<16x16xf32>
    %c0_8 = arith.constant 0 : index
    %c0_9 = arith.constant 0 : index
    %c0_10 = arith.constant 0 : index
    %9 = vector.load %arg4[%c0_8, %c0_9, %c0_10] : memref<1x16x32xf32, #tpu.memory_space<vmem>>, vector<1x16x32xf32>
    %10 = vector.shape_cast %9 : vector<1x16x32xf32> to vector<16x32xf32>
    %11 = tpu.iota {dimensions = array<i32: 1>} : vector<1x32xi32>
    %c0_i32 = arith.constant 0 : i32
    %12 = vector.broadcast %c0_i32 : i32 to vector<1x32xi32>
    %13 = arith.cmpi sge, %11, %12 : vector<1x32xi32>
    %c8_i32 = arith.constant 8 : i32
    %14 = vector.broadcast %c8_i32 : i32 to vector<1x32xi32>
    %15 = arith.cmpi slt, %11, %14 : vector<1x32xi32>
    %16 = arith.andi %13, %15 : vector<1x32xi1>
    %17 = arith.extui %16 : vector<1x32xi1> to vector<1x32xi32>
    %18 = arith.sitofp %17 : vector<1x32xi32> to vector<1x32xf32>
    %c8_i32_11 = arith.constant 8 : i32
    %19 = vector.broadcast %c8_i32_11 : i32 to vector<1x32xi32>
    %20 = arith.cmpi sge, %11, %19 : vector<1x32xi32>
    %c16_i32 = arith.constant 16 : i32
    %21 = vector.broadcast %c16_i32 : i32 to vector<1x32xi32>
    %22 = arith.cmpi slt, %11, %21 : vector<1x32xi32>
    %23 = arith.andi %20, %22 : vector<1x32xi1>
    %24 = arith.extui %23 : vector<1x32xi1> to vector<1x32xi32>
    %25 = arith.sitofp %24 : vector<1x32xi32> to vector<1x32xf32>
    %c16_i32_12 = arith.constant 16 : i32
    %26 = vector.broadcast %c16_i32_12 : i32 to vector<1x32xi32>
    %27 = arith.cmpi sge, %11, %26 : vector<1x32xi32>
    %c24_i32 = arith.constant 24 : i32
    %28 = vector.broadcast %c24_i32 : i32 to vector<1x32xi32>
    %29 = arith.cmpi slt, %11, %28 : vector<1x32xi32>
    %30 = arith.andi %27, %29 : vector<1x32xi1>
    %31 = arith.extui %30 : vector<1x32xi1> to vector<1x32xi32>
    %32 = arith.sitofp %31 : vector<1x32xi32> to vector<1x32xf32>
    %c24_i32_13 = arith.constant 24 : i32
    %33 = vector.broadcast %c24_i32_13 : i32 to vector<1x32xi32>
    %34 = arith.cmpi sge, %11, %33 : vector<1x32xi32>
    %c32_i32 = arith.constant 32 : i32
    %35 = vector.broadcast %c32_i32 : i32 to vector<1x32xi32>
    %36 = arith.cmpi slt, %11, %35 : vector<1x32xi32>
    %37 = arith.andi %34, %36 : vector<1x32xi1>
    %38 = arith.extui %37 : vector<1x32xi1> to vector<1x32xi32>
    %39 = arith.sitofp %38 : vector<1x32xi32> to vector<1x32xf32>
    %cst = arith.constant 0.000000e+00 : f32
    %40 = vector.broadcast %cst : f32 to vector<16x32xf32>
    %c0_14 = arith.constant 0 : index
    %c0_15 = arith.constant 0 : index
    %c0_16 = arith.constant 0 : index
    %41 = vector.load %arg7[%c0_14, %c0_15, %c0_16] : memref<2x16x64xf32, #tpu.memory_space<vmem>>, vector<1x16x64xf32>
    %42 = vector.shape_cast %41 : vector<1x16x64xf32> to vector<16x64xf32>
    %c0_17 = arith.constant 0 : index
    %c0_18 = arith.constant 0 : index
    %c0_19 = arith.constant 0 : index
    %43 = vector.load %arg6[%c0_17, %c0_18, %c0_19] : memref<2x96x64xf32, #tpu.memory_space<vmem>>, vector<1x96x64xf32>
    %44 = vector.shape_cast %43 : vector<1x96x64xf32> to vector<96x64xf32>
    %45 = vector.extract_strided_slice %42 {offsets = [0, 0], sizes = [1, 32], strides = [1, 1]} : vector<16x64xf32> to vector<1x32xf32>
    %46 = vector.extract_strided_slice %42 {offsets = [1, 0], sizes = [1, 32], strides = [1, 1]} : vector<16x64xf32> to vector<1x32xf32>
    %cst_20 = arith.constant dense<0.000000e+00> : vector<16xf32>
    %47 = vector.multi_reduction <add>, %40, %cst_20 [1] : vector<16x32xf32> to vector<16xf32>
    %48 = vector.shape_cast %47 : vector<16xf32> to vector<16x1xf32>
    %cst_21 = arith.constant 3.200000e+01 : f32
    %49 = vector.broadcast %cst_21 : f32 to vector<16x1xf32>
    %50 = arith.divf %48, %49 : vector<16x1xf32>
    %51 = vector.broadcast %50 : vector<16x1xf32> to vector<16x32xf32>
    %52 = arith.subf %40, %51 : vector<16x32xf32>
    %53 = arith.mulf %52, %52 : vector<16x32xf32>
    %cst_22 = arith.constant dense<0.000000e+00> : vector<16xf32>
    %54 = vector.multi_reduction <add>, %53, %cst_22 [1] : vector<16x32xf32> to vector<16xf32>
    %55 = vector.shape_cast %54 : vector<16xf32> to vector<16x1xf32>
    %cst_23 = arith.constant 3.200000e+01 : f32
    %56 = vector.broadcast %cst_23 : f32 to vector<16x1xf32>
    %57 = arith.divf %55, %56 : vector<16x1xf32>
    %cst_24 = arith.constant 9.99999974E-6 : f32
    %58 = vector.broadcast %cst_24 : f32 to vector<16x1xf32>
    %59 = arith.addf %57, %58 : vector<16x1xf32>
    %60 = math.rsqrt %59 : vector<16x1xf32>
    %61 = vector.broadcast %60 : vector<16x1xf32> to vector<16x32xf32>
    %62 = arith.mulf %52, %61 : vector<16x32xf32>
    %63 = vector.broadcast %45 : vector<1x32xf32> to vector<16x32xf32>
    %64 = arith.mulf %62, %63 : vector<16x32xf32>
    %65 = vector.broadcast %46 : vector<1x32xf32> to vector<16x32xf32>
    %66 = arith.addf %64, %65 : vector<16x32xf32>
    %67 = arith.addf %66, %0 : vector<16x32xf32>
    %c0_25 = arith.constant 0 : index
    %c0_26 = arith.constant 0 : index
    %c0_27 = arith.constant 0 : index
    %68 = vector.load %arg5[%c0_25, %c0_26, %c0_27] : memref<16x32x32xf32, #tpu.memory_space<vmem>>, vector<1x32x32xf32>
    %69 = vector.shape_cast %68 : vector<1x32x32xf32> to vector<32x32xf32>
    %c1 = arith.constant 1 : index
    %c0_28 = arith.constant 0 : index
    %c0_29 = arith.constant 0 : index
    %70 = vector.load %arg5[%c1, %c0_28, %c0_29] : memref<16x32x32xf32, #tpu.memory_space<vmem>>, vector<1x32x32xf32>
    %71 = vector.shape_cast %70 : vector<1x32x32xf32> to vector<32x32xf32>
    %c2 = arith.constant 2 : index
    %c0_30 = arith.constant 0 : index
    %c0_31 = arith.constant 0 : index
    %72 = vector.load %arg5[%c2, %c0_30, %c0_31] : memref<16x32x32xf32, #tpu.memory_space<vmem>>, vector<1x32x32xf32>
    %73 = vector.shape_cast %72 : vector<1x32x32xf32> to vector<32x32xf32>
    %c3 = arith.constant 3 : index
    %c0_32 = arith.constant 0 : index
    %c0_33 = arith.constant 0 : index
    %74 = vector.load %arg5[%c3, %c0_32, %c0_33] : memref<16x32x32xf32, #tpu.memory_space<vmem>>, vector<1x32x32xf32>
    %75 = vector.shape_cast %74 : vector<1x32x32xf32> to vector<32x32xf32>
    %76 = vector.extract_strided_slice %42 {offsets = [6, 0], sizes = [1, 32], strides = [1, 1]} : vector<16x64xf32> to vector<1x32xf32>
    %77 = vector.extract_strided_slice %42 {offsets = [7, 0], sizes = [1, 32], strides = [1, 1]} : vector<16x64xf32> to vector<1x32xf32>
    %78 = vector.extract_strided_slice %42 {offsets = [8, 0], sizes = [1, 32], strides = [1, 1]} : vector<16x64xf32> to vector<1x32xf32>
    %79 = vector.extract_strided_slice %42 {offsets = [9, 0], sizes = [1, 32], strides = [1, 1]} : vector<16x64xf32> to vector<1x32xf32>
    %cst_34 = arith.constant dense<0.000000e+00> : vector<16x32xf32>
    %80 = tpu.matmul %67, %69, %cst_34 {dimension_numbers = #tpu.dot_dimension_numbers<[1], [0], [0], [1], [0, 0, 1, 1], [], []>} : vector<16x32xf32>, vector<32x32xf32>, vector<16x32xf32> -> vector<16x32xf32>
    %81 = vector.broadcast %76 : vector<1x32xf32> to vector<16x32xf32>
    %82 = arith.addf %80, %81 : vector<16x32xf32>
    %cst_35 = arith.constant 0.353553385 : f32
    %83 = vector.broadcast %cst_35 : f32 to vector<16x32xf32>
    %84 = arith.mulf %82, %83 : vector<16x32xf32>
    %cst_36 = arith.constant dense<0.000000e+00> : vector<16x32xf32>
    %85 = tpu.matmul %67, %71, %cst_36 {dimension_numbers = #tpu.dot_dimension_numbers<[1], [0], [0], [1], [0, 0, 1, 1], [], []>} : vector<16x32xf32>, vector<32x32xf32>, vector<16x32xf32> -> vector<16x32xf32>
    %86 = vector.broadcast %77 : vector<1x32xf32> to vector<16x32xf32>
    %87 = arith.addf %85, %86 : vector<16x32xf32>
    %cst_37 = arith.constant dense<0.000000e+00> : vector<16x32xf32>
    %88 = tpu.matmul %66, %73, %cst_37 {dimension_numbers = #tpu.dot_dimension_numbers<[1], [0], [0], [1], [0, 0, 1, 1], [], []>} : vector<16x32xf32>, vector<32x32xf32>, vector<16x32xf32> -> vector<16x32xf32>
    %89 = vector.broadcast %78 : vector<1x32xf32> to vector<16x32xf32>
    %90 = arith.addf %88, %89 : vector<16x32xf32>
    %cst_38 = arith.constant 0.000000e+00 : f32
    %91 = vector.broadcast %cst_38 : f32 to vector<16x32xf32>
    %92 = vector.broadcast %18 : vector<1x32xf32> to vector<16x32xf32>
    %93 = arith.mulf %84, %92 : vector<16x32xf32>
    %cst_39 = arith.constant dense<0.000000e+00> : vector<16x16xf32>
    %94 = tpu.matmul %93, %87, %cst_39 {dimension_numbers = #tpu.dot_dimension_numbers<[1], [1], [0], [0], [0, 0, 1, 0], [], []>} : vector<16x32xf32>, vector<16x32xf32>, vector<16x16xf32> -> vector<16x16xf32>
    %95 = arith.addf %94, %8 : vector<16x16xf32>
    %cst_40 = arith.constant dense<0xFF800000> : vector<16xf32>
    %96 = vector.multi_reduction <maximumf>, %95, %cst_40 [1] : vector<16x16xf32> to vector<16xf32>
    %97 = vector.shape_cast %96 : vector<16xf32> to vector<16x1xf32>
    %98 = vector.broadcast %97 : vector<16x1xf32> to vector<16x16xf32>
    %99 = arith.subf %95, %98 : vector<16x16xf32>
    %100 = math.exp %99 : vector<16x16xf32>
    %cst_41 = arith.constant dense<0.000000e+00> : vector<16xf32>
    %101 = vector.multi_reduction <add>, %100, %cst_41 [1] : vector<16x16xf32> to vector<16xf32>
    %102 = vector.shape_cast %101 : vector<16xf32> to vector<16x1xf32>
    %103 = tpu.reciprocal %102 {approx = true} : vector<16x1xf32> -> vector<16x1xf32>
    %104 = vector.broadcast %103 : vector<16x1xf32> to vector<16x16xf32>
    %105 = arith.mulf %100, %104 : vector<16x16xf32>
    %106 = vector.broadcast %18 : vector<1x32xf32> to vector<16x32xf32>
    %107 = arith.mulf %90, %106 : vector<16x32xf32>
    %cst_42 = arith.constant dense<0.000000e+00> : vector<16x32xf32>
    %108 = tpu.matmul %105, %107, %cst_42 {dimension_numbers = #tpu.dot_dimension_numbers<[1], [0], [0], [1], [0, 0, 1, 1], [], []>} : vector<16x16xf32>, vector<16x32xf32>, vector<16x32xf32> -> vector<16x32xf32>
    %109 = arith.addf %91, %108 : vector<16x32xf32>
    %110 = vector.broadcast %25 : vector<1x32xf32> to vector<16x32xf32>
    %111 = arith.mulf %84, %110 : vector<16x32xf32>
    %cst_43 = arith.constant dense<0.000000e+00> : vector<16x16xf32>
    %112 = tpu.matmul %111, %87, %cst_43 {dimension_numbers = #tpu.dot_dimension_numbers<[1], [1], [0], [0], [0, 0, 1, 0], [], []>} : vector<16x32xf32>, vector<16x32xf32>, vector<16x16xf32> -> vector<16x16xf32>
    %113 = arith.addf %112, %8 : vector<16x16xf32>
    %cst_44 = arith.constant dense<0xFF800000> : vector<16xf32>
    %114 = vector.multi_reduction <maximumf>, %113, %cst_44 [1] : vector<16x16xf32> to vector<16xf32>
    %115 = vector.shape_cast %114 : vector<16xf32> to vector<16x1xf32>
    %116 = vector.broadcast %115 : vector<16x1xf32> to vector<16x16xf32>
    %117 = arith.subf %113, %116 : vector<16x16xf32>
    %118 = math.exp %117 : vector<16x16xf32>
    %cst_45 = arith.constant dense<0.000000e+00> : vector<16xf32>
    %119 = vector.multi_reduction <add>, %118, %cst_45 [1] : vector<16x16xf32> to vector<16xf32>
    %120 = vector.shape_cast %119 : vector<16xf32> to vector<16x1xf32>
    %121 = tpu.reciprocal %120 {approx = true} : vector<16x1xf32> -> vector<16x1xf32>
    %122 = vector.broadcast %121 : vector<16x1xf32> to vector<16x16xf32>
    %123 = arith.mulf %118, %122 : vector<16x16xf32>
    %124 = vector.broadcast %25 : vector<1x32xf32> to vector<16x32xf32>
    %125 = arith.mulf %90, %124 : vector<16x32xf32>
    %cst_46 = arith.constant dense<0.000000e+00> : vector<16x32xf32>
    %126 = tpu.matmul %123, %125, %cst_46 {dimension_numbers = #tpu.dot_dimension_numbers<[1], [0], [0], [1], [0, 0, 1, 1], [], []>} : vector<16x16xf32>, vector<16x32xf32>, vector<16x32xf32> -> vector<16x32xf32>
    %127 = arith.addf %109, %126 : vector<16x32xf32>
    %128 = vector.broadcast %32 : vector<1x32xf32> to vector<16x32xf32>
    %129 = arith.mulf %84, %128 : vector<16x32xf32>
    %cst_47 = arith.constant dense<0.000000e+00> : vector<16x16xf32>
    %130 = tpu.matmul %129, %87, %cst_47 {dimension_numbers = #tpu.dot_dimension_numbers<[1], [1], [0], [0], [0, 0, 1, 0], [], []>} : vector<16x32xf32>, vector<16x32xf32>, vector<16x16xf32> -> vector<16x16xf32>
    %131 = arith.addf %130, %8 : vector<16x16xf32>
    %cst_48 = arith.constant dense<0xFF800000> : vector<16xf32>
    %132 = vector.multi_reduction <maximumf>, %131, %cst_48 [1] : vector<16x16xf32> to vector<16xf32>
    %133 = vector.shape_cast %132 : vector<16xf32> to vector<16x1xf32>
    %134 = vector.broadcast %133 : vector<16x1xf32> to vector<16x16xf32>
    %135 = arith.subf %131, %134 : vector<16x16xf32>
    %136 = math.exp %135 : vector<16x16xf32>
    %cst_49 = arith.constant dense<0.000000e+00> : vector<16xf32>
    %137 = vector.multi_reduction <add>, %136, %cst_49 [1] : vector<16x16xf32> to vector<16xf32>
    %138 = vector.shape_cast %137 : vector<16xf32> to vector<16x1xf32>
    %139 = tpu.reciprocal %138 {approx = true} : vector<16x1xf32> -> vector<16x1xf32>
    %140 = vector.broadcast %139 : vector<16x1xf32> to vector<16x16xf32>
    %141 = arith.mulf %136, %140 : vector<16x16xf32>
    %142 = vector.broadcast %32 : vector<1x32xf32> to vector<16x32xf32>
    %143 = arith.mulf %90, %142 : vector<16x32xf32>
    %cst_50 = arith.constant dense<0.000000e+00> : vector<16x32xf32>
    %144 = tpu.matmul %141, %143, %cst_50 {dimension_numbers = #tpu.dot_dimension_numbers<[1], [0], [0], [1], [0, 0, 1, 1], [], []>} : vector<16x16xf32>, vector<16x32xf32>, vector<16x32xf32> -> vector<16x32xf32>
    %145 = arith.addf %127, %144 : vector<16x32xf32>
    %146 = vector.broadcast %39 : vector<1x32xf32> to vector<16x32xf32>
    %147 = arith.mulf %84, %146 : vector<16x32xf32>
    %cst_51 = arith.constant dense<0.000000e+00> : vector<16x16xf32>
    %148 = tpu.matmul %147, %87, %cst_51 {dimension_numbers = #tpu.dot_dimension_numbers<[1], [1], [0], [0], [0, 0, 1, 0], [], []>} : vector<16x32xf32>, vector<16x32xf32>, vector<16x16xf32> -> vector<16x16xf32>
    %149 = arith.addf %148, %8 : vector<16x16xf32>
    %cst_52 = arith.constant dense<0xFF800000> : vector<16xf32>
    %150 = vector.multi_reduction <maximumf>, %149, %cst_52 [1] : vector<16x16xf32> to vector<16xf32>
    %151 = vector.shape_cast %150 : vector<16xf32> to vector<16x1xf32>
    %152 = vector.broadcast %151 : vector<16x1xf32> to vector<16x16xf32>
    %153 = arith.subf %149, %152 : vector<16x16xf32>
    %154 = math.exp %153 : vector<16x16xf32>
    %cst_53 = arith.constant dense<0.000000e+00> : vector<16xf32>
    %155 = vector.multi_reduction <add>, %154, %cst_53 [1] : vector<16x16xf32> to vector<16xf32>
    %156 = vector.shape_cast %155 : vector<16xf32> to vector<16x1xf32>
    %157 = tpu.reciprocal %156 {approx = true} : vector<16x1xf32> -> vector<16x1xf32>
    %158 = vector.broadcast %157 : vector<16x1xf32> to vector<16x16xf32>
    %159 = arith.mulf %154, %158 : vector<16x16xf32>
    %160 = vector.broadcast %39 : vector<1x32xf32> to vector<16x32xf32>
    %161 = arith.mulf %90, %160 : vector<16x32xf32>
    %cst_54 = arith.constant dense<0.000000e+00> : vector<16x32xf32>
    %162 = tpu.matmul %159, %161, %cst_54 {dimension_numbers = #tpu.dot_dimension_numbers<[1], [0], [0], [1], [0, 0, 1, 1], [], []>} : vector<16x16xf32>, vector<16x32xf32>, vector<16x32xf32> -> vector<16x32xf32>
    %163 = arith.addf %145, %162 : vector<16x32xf32>
    %cst_55 = arith.constant dense<0.000000e+00> : vector<16x32xf32>
    %164 = tpu.matmul %163, %75, %cst_55 {dimension_numbers = #tpu.dot_dimension_numbers<[1], [0], [0], [1], [0, 0, 1, 1], [], []>} : vector<16x32xf32>, vector<32x32xf32>, vector<16x32xf32> -> vector<16x32xf32>
    %165 = vector.broadcast %79 : vector<1x32xf32> to vector<16x32xf32>
    %166 = arith.addf %164, %165 : vector<16x32xf32>
    %167 = arith.addf %40, %166 : vector<16x32xf32>
    %168 = vector.extract_strided_slice %42 {offsets = [2, 0], sizes = [1, 32], strides = [1, 1]} : vector<16x64xf32> to vector<1x32xf32>
    %169 = vector.extract_strided_slice %42 {offsets = [3, 0], sizes = [1, 32], strides = [1, 1]} : vector<16x64xf32> to vector<1x32xf32>
    %cst_56 = arith.constant dense<0.000000e+00> : vector<16xf32>
    %170 = vector.multi_reduction <add>, %167, %cst_56 [1] : vector<16x32xf32> to vector<16xf32>
    %171 = vector.shape_cast %170 : vector<16xf32> to vector<16x1xf32>
    %cst_57 = arith.constant 3.200000e+01 : f32
    %172 = vector.broadcast %cst_57 : f32 to vector<16x1xf32>
    %173 = arith.divf %171, %172 : vector<16x1xf32>
    %174 = vector.broadcast %173 : vector<16x1xf32> to vector<16x32xf32>
    %175 = arith.subf %167, %174 : vector<16x32xf32>
    %176 = arith.mulf %175, %175 : vector<16x32xf32>
    %cst_58 = arith.constant dense<0.000000e+00> : vector<16xf32>
    %177 = vector.multi_reduction <add>, %176, %cst_58 [1] : vector<16x32xf32> to vector<16xf32>
    %178 = vector.shape_cast %177 : vector<16xf32> to vector<16x1xf32>
    %cst_59 = arith.constant 3.200000e+01 : f32
    %179 = vector.broadcast %cst_59 : f32 to vector<16x1xf32>
    %180 = arith.divf %178, %179 : vector<16x1xf32>
    %cst_60 = arith.constant 9.99999974E-6 : f32
    %181 = vector.broadcast %cst_60 : f32 to vector<16x1xf32>
    %182 = arith.addf %180, %181 : vector<16x1xf32>
    %183 = math.rsqrt %182 : vector<16x1xf32>
    %184 = vector.broadcast %183 : vector<16x1xf32> to vector<16x32xf32>
    %185 = arith.mulf %175, %184 : vector<16x32xf32>
    %186 = vector.broadcast %168 : vector<1x32xf32> to vector<16x32xf32>
    %187 = arith.mulf %185, %186 : vector<16x32xf32>
    %188 = vector.broadcast %169 : vector<1x32xf32> to vector<16x32xf32>
    %189 = arith.addf %187, %188 : vector<16x32xf32>
    %190 = arith.addf %189, %0 : vector<16x32xf32>
    %c4 = arith.constant 4 : index
    %c0_61 = arith.constant 0 : index
    %c0_62 = arith.constant 0 : index
    %191 = vector.load %arg5[%c4, %c0_61, %c0_62] : memref<16x32x32xf32, #tpu.memory_space<vmem>>, vector<1x32x32xf32>
    %192 = vector.shape_cast %191 : vector<1x32x32xf32> to vector<32x32xf32>
    %c5 = arith.constant 5 : index
    %c0_63 = arith.constant 0 : index
    %c0_64 = arith.constant 0 : index
    %193 = vector.load %arg5[%c5, %c0_63, %c0_64] : memref<16x32x32xf32, #tpu.memory_space<vmem>>, vector<1x32x32xf32>
    %194 = vector.shape_cast %193 : vector<1x32x32xf32> to vector<32x32xf32>
    %c6 = arith.constant 6 : index
    %c0_65 = arith.constant 0 : index
    %c0_66 = arith.constant 0 : index
    %195 = vector.load %arg5[%c6, %c0_65, %c0_66] : memref<16x32x32xf32, #tpu.memory_space<vmem>>, vector<1x32x32xf32>
    %196 = vector.shape_cast %195 : vector<1x32x32xf32> to vector<32x32xf32>
    %c7 = arith.constant 7 : index
    %c0_67 = arith.constant 0 : index
    %c0_68 = arith.constant 0 : index
    %197 = vector.load %arg5[%c7, %c0_67, %c0_68] : memref<16x32x32xf32, #tpu.memory_space<vmem>>, vector<1x32x32xf32>
    %198 = vector.shape_cast %197 : vector<1x32x32xf32> to vector<32x32xf32>
    %199 = vector.extract_strided_slice %42 {offsets = [10, 0], sizes = [1, 32], strides = [1, 1]} : vector<16x64xf32> to vector<1x32xf32>
    %200 = vector.extract_strided_slice %42 {offsets = [11, 0], sizes = [1, 32], strides = [1, 1]} : vector<16x64xf32> to vector<1x32xf32>
    %201 = vector.extract_strided_slice %42 {offsets = [12, 0], sizes = [1, 32], strides = [1, 1]} : vector<16x64xf32> to vector<1x32xf32>
    %202 = vector.extract_strided_slice %42 {offsets = [13, 0], sizes = [1, 32], strides = [1, 1]} : vector<16x64xf32> to vector<1x32xf32>
    %cst_69 = arith.constant dense<0.000000e+00> : vector<16x32xf32>
    %203 = tpu.matmul %190, %192, %cst_69 {dimension_numbers = #tpu.dot_dimension_numbers<[1], [0], [0], [1], [0, 0, 1, 1], [], []>} : vector<16x32xf32>, vector<32x32xf32>, vector<16x32xf32> -> vector<16x32xf32>
    %204 = vector.broadcast %199 : vector<1x32xf32> to vector<16x32xf32>
    %205 = arith.addf %203, %204 : vector<16x32xf32>
    %cst_70 = arith.constant 0.353553385 : f32
    %206 = vector.broadcast %cst_70 : f32 to vector<16x32xf32>
    %207 = arith.mulf %205, %206 : vector<16x32xf32>
    %cst_71 = arith.constant dense<0.000000e+00> : vector<32x32xf32>
    %208 = tpu.matmul %4, %194, %cst_71 {dimension_numbers = #tpu.dot_dimension_numbers<[1], [0], [0], [1], [0, 0, 1, 1], [], []>} : vector<32x32xf32>, vector<32x32xf32>, vector<32x32xf32> -> vector<32x32xf32>
    %209 = vector.broadcast %200 : vector<1x32xf32> to vector<32x32xf32>
    %210 = arith.addf %208, %209 : vector<32x32xf32>
    %cst_72 = arith.constant dense<0.000000e+00> : vector<32x32xf32>
    %211 = tpu.matmul %6, %196, %cst_72 {dimension_numbers = #tpu.dot_dimension_numbers<[1], [0], [0], [1], [0, 0, 1, 1], [], []>} : vector<32x32xf32>, vector<32x32xf32>, vector<32x32xf32> -> vector<32x32xf32>
    %212 = vector.broadcast %201 : vector<1x32xf32> to vector<32x32xf32>
    %213 = arith.addf %211, %212 : vector<32x32xf32>
    %cst_73 = arith.constant 0.000000e+00 : f32
    %214 = vector.broadcast %cst_73 : f32 to vector<16x32xf32>
    %215 = vector.broadcast %18 : vector<1x32xf32> to vector<16x32xf32>
    %216 = arith.mulf %207, %215 : vector<16x32xf32>
    %cst_74 = arith.constant dense<0.000000e+00> : vector<16x32xf32>
    %217 = tpu.matmul %216, %210, %cst_74 {dimension_numbers = #tpu.dot_dimension_numbers<[1], [1], [0], [0], [0, 0, 1, 0], [], []>} : vector<16x32xf32>, vector<32x32xf32>, vector<16x32xf32> -> vector<16x32xf32>
    %218 = arith.addf %217, %10 : vector<16x32xf32>
    %cst_75 = arith.constant dense<0xFF800000> : vector<16xf32>
    %219 = vector.multi_reduction <maximumf>, %218, %cst_75 [1] : vector<16x32xf32> to vector<16xf32>
    %220 = vector.shape_cast %219 : vector<16xf32> to vector<16x1xf32>
    %221 = vector.broadcast %220 : vector<16x1xf32> to vector<16x32xf32>
    %222 = arith.subf %218, %221 : vector<16x32xf32>
    %223 = math.exp %222 : vector<16x32xf32>
    %cst_76 = arith.constant dense<0.000000e+00> : vector<16xf32>
    %224 = vector.multi_reduction <add>, %223, %cst_76 [1] : vector<16x32xf32> to vector<16xf32>
    %225 = vector.shape_cast %224 : vector<16xf32> to vector<16x1xf32>
    %226 = tpu.reciprocal %225 {approx = true} : vector<16x1xf32> -> vector<16x1xf32>
    %227 = vector.broadcast %226 : vector<16x1xf32> to vector<16x32xf32>
    %228 = arith.mulf %223, %227 : vector<16x32xf32>
    %229 = vector.broadcast %18 : vector<1x32xf32> to vector<32x32xf32>
    %230 = arith.mulf %213, %229 : vector<32x32xf32>
    %cst_77 = arith.constant dense<0.000000e+00> : vector<16x32xf32>
    %231 = tpu.matmul %228, %230, %cst_77 {dimension_numbers = #tpu.dot_dimension_numbers<[1], [0], [0], [1], [0, 0, 1, 1], [], []>} : vector<16x32xf32>, vector<32x32xf32>, vector<16x32xf32> -> vector<16x32xf32>
    %232 = arith.addf %214, %231 : vector<16x32xf32>
    %233 = vector.broadcast %25 : vector<1x32xf32> to vector<16x32xf32>
    %234 = arith.mulf %207, %233 : vector<16x32xf32>
    %cst_78 = arith.constant dense<0.000000e+00> : vector<16x32xf32>
    %235 = tpu.matmul %234, %210, %cst_78 {dimension_numbers = #tpu.dot_dimension_numbers<[1], [1], [0], [0], [0, 0, 1, 0], [], []>} : vector<16x32xf32>, vector<32x32xf32>, vector<16x32xf32> -> vector<16x32xf32>
    %236 = arith.addf %235, %10 : vector<16x32xf32>
    %cst_79 = arith.constant dense<0xFF800000> : vector<16xf32>
    %237 = vector.multi_reduction <maximumf>, %236, %cst_79 [1] : vector<16x32xf32> to vector<16xf32>
    %238 = vector.shape_cast %237 : vector<16xf32> to vector<16x1xf32>
    %239 = vector.broadcast %238 : vector<16x1xf32> to vector<16x32xf32>
    %240 = arith.subf %236, %239 : vector<16x32xf32>
    %241 = math.exp %240 : vector<16x32xf32>
    %cst_80 = arith.constant dense<0.000000e+00> : vector<16xf32>
    %242 = vector.multi_reduction <add>, %241, %cst_80 [1] : vector<16x32xf32> to vector<16xf32>
    %243 = vector.shape_cast %242 : vector<16xf32> to vector<16x1xf32>
    %244 = tpu.reciprocal %243 {approx = true} : vector<16x1xf32> -> vector<16x1xf32>
    %245 = vector.broadcast %244 : vector<16x1xf32> to vector<16x32xf32>
    %246 = arith.mulf %241, %245 : vector<16x32xf32>
    %247 = vector.broadcast %25 : vector<1x32xf32> to vector<32x32xf32>
    %248 = arith.mulf %213, %247 : vector<32x32xf32>
    %cst_81 = arith.constant dense<0.000000e+00> : vector<16x32xf32>
    %249 = tpu.matmul %246, %248, %cst_81 {dimension_numbers = #tpu.dot_dimension_numbers<[1], [0], [0], [1], [0, 0, 1, 1], [], []>} : vector<16x32xf32>, vector<32x32xf32>, vector<16x32xf32> -> vector<16x32xf32>
    %250 = arith.addf %232, %249 : vector<16x32xf32>
    %251 = vector.broadcast %32 : vector<1x32xf32> to vector<16x32xf32>
    %252 = arith.mulf %207, %251 : vector<16x32xf32>
    %cst_82 = arith.constant dense<0.000000e+00> : vector<16x32xf32>
    %253 = tpu.matmul %252, %210, %cst_82 {dimension_numbers = #tpu.dot_dimension_numbers<[1], [1], [0], [0], [0, 0, 1, 0], [], []>} : vector<16x32xf32>, vector<32x32xf32>, vector<16x32xf32> -> vector<16x32xf32>
    %254 = arith.addf %253, %10 : vector<16x32xf32>
    %cst_83 = arith.constant dense<0xFF800000> : vector<16xf32>
    %255 = vector.multi_reduction <maximumf>, %254, %cst_83 [1] : vector<16x32xf32> to vector<16xf32>
    %256 = vector.shape_cast %255 : vector<16xf32> to vector<16x1xf32>
    %257 = vector.broadcast %256 : vector<16x1xf32> to vector<16x32xf32>
    %258 = arith.subf %254, %257 : vector<16x32xf32>
    %259 = math.exp %258 : vector<16x32xf32>
    %cst_84 = arith.constant dense<0.000000e+00> : vector<16xf32>
    %260 = vector.multi_reduction <add>, %259, %cst_84 [1] : vector<16x32xf32> to vector<16xf32>
    %261 = vector.shape_cast %260 : vector<16xf32> to vector<16x1xf32>
    %262 = tpu.reciprocal %261 {approx = true} : vector<16x1xf32> -> vector<16x1xf32>
    %263 = vector.broadcast %262 : vector<16x1xf32> to vector<16x32xf32>
    %264 = arith.mulf %259, %263 : vector<16x32xf32>
    %265 = vector.broadcast %32 : vector<1x32xf32> to vector<32x32xf32>
    %266 = arith.mulf %213, %265 : vector<32x32xf32>
    %cst_85 = arith.constant dense<0.000000e+00> : vector<16x32xf32>
    %267 = tpu.matmul %264, %266, %cst_85 {dimension_numbers = #tpu.dot_dimension_numbers<[1], [0], [0], [1], [0, 0, 1, 1], [], []>} : vector<16x32xf32>, vector<32x32xf32>, vector<16x32xf32> -> vector<16x32xf32>
    %268 = arith.addf %250, %267 : vector<16x32xf32>
    %269 = vector.broadcast %39 : vector<1x32xf32> to vector<16x32xf32>
    %270 = arith.mulf %207, %269 : vector<16x32xf32>
    %cst_86 = arith.constant dense<0.000000e+00> : vector<16x32xf32>
    %271 = tpu.matmul %270, %210, %cst_86 {dimension_numbers = #tpu.dot_dimension_numbers<[1], [1], [0], [0], [0, 0, 1, 0], [], []>} : vector<16x32xf32>, vector<32x32xf32>, vector<16x32xf32> -> vector<16x32xf32>
    %272 = arith.addf %271, %10 : vector<16x32xf32>
    %cst_87 = arith.constant dense<0xFF800000> : vector<16xf32>
    %273 = vector.multi_reduction <maximumf>, %272, %cst_87 [1] : vector<16x32xf32> to vector<16xf32>
    %274 = vector.shape_cast %273 : vector<16xf32> to vector<16x1xf32>
    %275 = vector.broadcast %274 : vector<16x1xf32> to vector<16x32xf32>
    %276 = arith.subf %272, %275 : vector<16x32xf32>
    %277 = math.exp %276 : vector<16x32xf32>
    %cst_88 = arith.constant dense<0.000000e+00> : vector<16xf32>
    %278 = vector.multi_reduction <add>, %277, %cst_88 [1] : vector<16x32xf32> to vector<16xf32>
    %279 = vector.shape_cast %278 : vector<16xf32> to vector<16x1xf32>
    %280 = tpu.reciprocal %279 {approx = true} : vector<16x1xf32> -> vector<16x1xf32>
    %281 = vector.broadcast %280 : vector<16x1xf32> to vector<16x32xf32>
    %282 = arith.mulf %277, %281 : vector<16x32xf32>
    %283 = vector.broadcast %39 : vector<1x32xf32> to vector<32x32xf32>
    %284 = arith.mulf %213, %283 : vector<32x32xf32>
    %cst_89 = arith.constant dense<0.000000e+00> : vector<16x32xf32>
    %285 = tpu.matmul %282, %284, %cst_89 {dimension_numbers = #tpu.dot_dimension_numbers<[1], [0], [0], [1], [0, 0, 1, 1], [], []>} : vector<16x32xf32>, vector<32x32xf32>, vector<16x32xf32> -> vector<16x32xf32>
    %286 = arith.addf %268, %285 : vector<16x32xf32>
    %cst_90 = arith.constant dense<0.000000e+00> : vector<16x32xf32>
    %287 = tpu.matmul %286, %198, %cst_90 {dimension_numbers = #tpu.dot_dimension_numbers<[1], [0], [0], [1], [0, 0, 1, 1], [], []>} : vector<16x32xf32>, vector<32x32xf32>, vector<16x32xf32> -> vector<16x32xf32>
    %288 = vector.broadcast %202 : vector<1x32xf32> to vector<16x32xf32>
    %289 = arith.addf %287, %288 : vector<16x32xf32>
    %290 = arith.addf %167, %289 : vector<16x32xf32>
    %291 = vector.extract_strided_slice %42 {offsets = [4, 0], sizes = [1, 32], strides = [1, 1]} : vector<16x64xf32> to vector<1x32xf32>
    %292 = vector.extract_strided_slice %42 {offsets = [5, 0], sizes = [1, 32], strides = [1, 1]} : vector<16x64xf32> to vector<1x32xf32>
    %cst_91 = arith.constant dense<0.000000e+00> : vector<16xf32>
    %293 = vector.multi_reduction <add>, %290, %cst_91 [1] : vector<16x32xf32> to vector<16xf32>
    %294 = vector.shape_cast %293 : vector<16xf32> to vector<16x1xf32>
    %cst_92 = arith.constant 3.200000e+01 : f32
    %295 = vector.broadcast %cst_92 : f32 to vector<16x1xf32>
    %296 = arith.divf %294, %295 : vector<16x1xf32>
    %297 = vector.broadcast %296 : vector<16x1xf32> to vector<16x32xf32>
    %298 = arith.subf %290, %297 : vector<16x32xf32>
    %299 = arith.mulf %298, %298 : vector<16x32xf32>
    %cst_93 = arith.constant dense<0.000000e+00> : vector<16xf32>
    %300 = vector.multi_reduction <add>, %299, %cst_93 [1] : vector<16x32xf32> to vector<16xf32>
    %301 = vector.shape_cast %300 : vector<16xf32> to vector<16x1xf32>
    %cst_94 = arith.constant 3.200000e+01 : f32
    %302 = vector.broadcast %cst_94 : f32 to vector<16x1xf32>
    %303 = arith.divf %301, %302 : vector<16x1xf32>
    %cst_95 = arith.constant 9.99999974E-6 : f32
    %304 = vector.broadcast %cst_95 : f32 to vector<16x1xf32>
    %305 = arith.addf %303, %304 : vector<16x1xf32>
    %306 = math.rsqrt %305 : vector<16x1xf32>
    %307 = vector.broadcast %306 : vector<16x1xf32> to vector<16x32xf32>
    %308 = arith.mulf %298, %307 : vector<16x32xf32>
    %309 = vector.broadcast %291 : vector<1x32xf32> to vector<16x32xf32>
    %310 = arith.mulf %308, %309 : vector<16x32xf32>
    %311 = vector.broadcast %292 : vector<1x32xf32> to vector<16x32xf32>
    %312 = arith.addf %310, %311 : vector<16x32xf32>
    %313 = vector.extract_strided_slice %44 {offsets = [0, 0], sizes = [32, 64], strides = [1, 1]} : vector<96x64xf32> to vector<32x64xf32>
    %cst_96 = arith.constant dense<0.000000e+00> : vector<16x64xf32>
    %314 = tpu.matmul %312, %313, %cst_96 {dimension_numbers = #tpu.dot_dimension_numbers<[1], [0], [0], [1], [0, 0, 1, 1], [], []>} : vector<16x32xf32>, vector<32x64xf32>, vector<16x64xf32> -> vector<16x64xf32>
    %315 = vector.extract_strided_slice %42 {offsets = [15, 0], sizes = [1, 64], strides = [1, 1]} : vector<16x64xf32> to vector<1x64xf32>
    %316 = vector.broadcast %315 : vector<1x64xf32> to vector<16x64xf32>
    %317 = arith.addf %314, %316 : vector<16x64xf32>
    %cst_97 = arith.constant 0.000000e+00 : f32
    %318 = vector.broadcast %cst_97 : f32 to vector<16x64xf32>
    %319 = arith.maximumf %317, %318 : vector<16x64xf32>
    %320 = vector.extract_strided_slice %44 {offsets = [32, 0], sizes = [64, 32], strides = [1, 1]} : vector<96x64xf32> to vector<64x32xf32>
    %cst_98 = arith.constant dense<0.000000e+00> : vector<16x32xf32>
    %321 = tpu.matmul %319, %320, %cst_98 {dimension_numbers = #tpu.dot_dimension_numbers<[1], [0], [0], [1], [0, 0, 1, 1], [], []>} : vector<16x64xf32>, vector<64x32xf32>, vector<16x32xf32> -> vector<16x32xf32>
    %322 = arith.addf %290, %321 : vector<16x32xf32>
    %323 = vector.extract_strided_slice %42 {offsets = [14, 0], sizes = [1, 32], strides = [1, 1]} : vector<16x64xf32> to vector<1x32xf32>
    %324 = vector.broadcast %323 : vector<1x32xf32> to vector<16x32xf32>
    %325 = arith.addf %322, %324 : vector<16x32xf32>
    %c1_99 = arith.constant 1 : index
    %c0_100 = arith.constant 0 : index
    %c0_101 = arith.constant 0 : index
    %326 = vector.load %arg7[%c1_99, %c0_100, %c0_101] : memref<2x16x64xf32, #tpu.memory_space<vmem>>, vector<1x16x64xf32>
    %327 = vector.shape_cast %326 : vector<1x16x64xf32> to vector<16x64xf32>
    %c1_102 = arith.constant 1 : index
    %c0_103 = arith.constant 0 : index
    %c0_104 = arith.constant 0 : index
    %328 = vector.load %arg6[%c1_102, %c0_103, %c0_104] : memref<2x96x64xf32, #tpu.memory_space<vmem>>, vector<1x96x64xf32>
    %329 = vector.shape_cast %328 : vector<1x96x64xf32> to vector<96x64xf32>
    %330 = vector.extract_strided_slice %327 {offsets = [0, 0], sizes = [1, 32], strides = [1, 1]} : vector<16x64xf32> to vector<1x32xf32>
    %331 = vector.extract_strided_slice %327 {offsets = [1, 0], sizes = [1, 32], strides = [1, 1]} : vector<16x64xf32> to vector<1x32xf32>
    %cst_105 = arith.constant dense<0.000000e+00> : vector<16xf32>
    %332 = vector.multi_reduction <add>, %325, %cst_105 [1] : vector<16x32xf32> to vector<16xf32>
    %333 = vector.shape_cast %332 : vector<16xf32> to vector<16x1xf32>
    %cst_106 = arith.constant 3.200000e+01 : f32
    %334 = vector.broadcast %cst_106 : f32 to vector<16x1xf32>
    %335 = arith.divf %333, %334 : vector<16x1xf32>
    %336 = vector.broadcast %335 : vector<16x1xf32> to vector<16x32xf32>
    %337 = arith.subf %325, %336 : vector<16x32xf32>
    %338 = arith.mulf %337, %337 : vector<16x32xf32>
    %cst_107 = arith.constant dense<0.000000e+00> : vector<16xf32>
    %339 = vector.multi_reduction <add>, %338, %cst_107 [1] : vector<16x32xf32> to vector<16xf32>
    %340 = vector.shape_cast %339 : vector<16xf32> to vector<16x1xf32>
    %cst_108 = arith.constant 3.200000e+01 : f32
    %341 = vector.broadcast %cst_108 : f32 to vector<16x1xf32>
    %342 = arith.divf %340, %341 : vector<16x1xf32>
    %cst_109 = arith.constant 9.99999974E-6 : f32
    %343 = vector.broadcast %cst_109 : f32 to vector<16x1xf32>
    %344 = arith.addf %342, %343 : vector<16x1xf32>
    %345 = math.rsqrt %344 : vector<16x1xf32>
    %346 = vector.broadcast %345 : vector<16x1xf32> to vector<16x32xf32>
    %347 = arith.mulf %337, %346 : vector<16x32xf32>
    %348 = vector.broadcast %330 : vector<1x32xf32> to vector<16x32xf32>
    %349 = arith.mulf %347, %348 : vector<16x32xf32>
    %350 = vector.broadcast %331 : vector<1x32xf32> to vector<16x32xf32>
    %351 = arith.addf %349, %350 : vector<16x32xf32>
    %352 = arith.addf %351, %0 : vector<16x32xf32>
    %c8 = arith.constant 8 : index
    %c0_110 = arith.constant 0 : index
    %c0_111 = arith.constant 0 : index
    %353 = vector.load %arg5[%c8, %c0_110, %c0_111] : memref<16x32x32xf32, #tpu.memory_space<vmem>>, vector<1x32x32xf32>
    %354 = vector.shape_cast %353 : vector<1x32x32xf32> to vector<32x32xf32>
    %c9 = arith.constant 9 : index
    %c0_112 = arith.constant 0 : index
    %c0_113 = arith.constant 0 : index
    %355 = vector.load %arg5[%c9, %c0_112, %c0_113] : memref<16x32x32xf32, #tpu.memory_space<vmem>>, vector<1x32x32xf32>
    %356 = vector.shape_cast %355 : vector<1x32x32xf32> to vector<32x32xf32>
    %c10 = arith.constant 10 : index
    %c0_114 = arith.constant 0 : index
    %c0_115 = arith.constant 0 : index
    %357 = vector.load %arg5[%c10, %c0_114, %c0_115] : memref<16x32x32xf32, #tpu.memory_space<vmem>>, vector<1x32x32xf32>
    %358 = vector.shape_cast %357 : vector<1x32x32xf32> to vector<32x32xf32>
    %c11 = arith.constant 11 : index
    %c0_116 = arith.constant 0 : index
    %c0_117 = arith.constant 0 : index
    %359 = vector.load %arg5[%c11, %c0_116, %c0_117] : memref<16x32x32xf32, #tpu.memory_space<vmem>>, vector<1x32x32xf32>
    %360 = vector.shape_cast %359 : vector<1x32x32xf32> to vector<32x32xf32>
    %361 = vector.extract_strided_slice %327 {offsets = [6, 0], sizes = [1, 32], strides = [1, 1]} : vector<16x64xf32> to vector<1x32xf32>
    %362 = vector.extract_strided_slice %327 {offsets = [7, 0], sizes = [1, 32], strides = [1, 1]} : vector<16x64xf32> to vector<1x32xf32>
    %363 = vector.extract_strided_slice %327 {offsets = [8, 0], sizes = [1, 32], strides = [1, 1]} : vector<16x64xf32> to vector<1x32xf32>
    %364 = vector.extract_strided_slice %327 {offsets = [9, 0], sizes = [1, 32], strides = [1, 1]} : vector<16x64xf32> to vector<1x32xf32>
    %cst_118 = arith.constant dense<0.000000e+00> : vector<16x32xf32>
    %365 = tpu.matmul %352, %354, %cst_118 {dimension_numbers = #tpu.dot_dimension_numbers<[1], [0], [0], [1], [0, 0, 1, 1], [], []>} : vector<16x32xf32>, vector<32x32xf32>, vector<16x32xf32> -> vector<16x32xf32>
    %366 = vector.broadcast %361 : vector<1x32xf32> to vector<16x32xf32>
    %367 = arith.addf %365, %366 : vector<16x32xf32>
    %cst_119 = arith.constant 0.353553385 : f32
    %368 = vector.broadcast %cst_119 : f32 to vector<16x32xf32>
    %369 = arith.mulf %367, %368 : vector<16x32xf32>
    %cst_120 = arith.constant dense<0.000000e+00> : vector<16x32xf32>
    %370 = tpu.matmul %352, %356, %cst_120 {dimension_numbers = #tpu.dot_dimension_numbers<[1], [0], [0], [1], [0, 0, 1, 1], [], []>} : vector<16x32xf32>, vector<32x32xf32>, vector<16x32xf32> -> vector<16x32xf32>
    %371 = vector.broadcast %362 : vector<1x32xf32> to vector<16x32xf32>
    %372 = arith.addf %370, %371 : vector<16x32xf32>
    %cst_121 = arith.constant dense<0.000000e+00> : vector<16x32xf32>
    %373 = tpu.matmul %351, %358, %cst_121 {dimension_numbers = #tpu.dot_dimension_numbers<[1], [0], [0], [1], [0, 0, 1, 1], [], []>} : vector<16x32xf32>, vector<32x32xf32>, vector<16x32xf32> -> vector<16x32xf32>
    %374 = vector.broadcast %363 : vector<1x32xf32> to vector<16x32xf32>
    %375 = arith.addf %373, %374 : vector<16x32xf32>
    %cst_122 = arith.constant 0.000000e+00 : f32
    %376 = vector.broadcast %cst_122 : f32 to vector<16x32xf32>
    %377 = vector.broadcast %18 : vector<1x32xf32> to vector<16x32xf32>
    %378 = arith.mulf %369, %377 : vector<16x32xf32>
    %cst_123 = arith.constant dense<0.000000e+00> : vector<16x16xf32>
    %379 = tpu.matmul %378, %372, %cst_123 {dimension_numbers = #tpu.dot_dimension_numbers<[1], [1], [0], [0], [0, 0, 1, 0], [], []>} : vector<16x32xf32>, vector<16x32xf32>, vector<16x16xf32> -> vector<16x16xf32>
    %380 = arith.addf %379, %8 : vector<16x16xf32>
    %cst_124 = arith.constant dense<0xFF800000> : vector<16xf32>
    %381 = vector.multi_reduction <maximumf>, %380, %cst_124 [1] : vector<16x16xf32> to vector<16xf32>
    %382 = vector.shape_cast %381 : vector<16xf32> to vector<16x1xf32>
    %383 = vector.broadcast %382 : vector<16x1xf32> to vector<16x16xf32>
    %384 = arith.subf %380, %383 : vector<16x16xf32>
    %385 = math.exp %384 : vector<16x16xf32>
    %cst_125 = arith.constant dense<0.000000e+00> : vector<16xf32>
    %386 = vector.multi_reduction <add>, %385, %cst_125 [1] : vector<16x16xf32> to vector<16xf32>
    %387 = vector.shape_cast %386 : vector<16xf32> to vector<16x1xf32>
    %388 = tpu.reciprocal %387 {approx = true} : vector<16x1xf32> -> vector<16x1xf32>
    %389 = vector.broadcast %388 : vector<16x1xf32> to vector<16x16xf32>
    %390 = arith.mulf %385, %389 : vector<16x16xf32>
    %391 = vector.broadcast %18 : vector<1x32xf32> to vector<16x32xf32>
    %392 = arith.mulf %375, %391 : vector<16x32xf32>
    %cst_126 = arith.constant dense<0.000000e+00> : vector<16x32xf32>
    %393 = tpu.matmul %390, %392, %cst_126 {dimension_numbers = #tpu.dot_dimension_numbers<[1], [0], [0], [1], [0, 0, 1, 1], [], []>} : vector<16x16xf32>, vector<16x32xf32>, vector<16x32xf32> -> vector<16x32xf32>
    %394 = arith.addf %376, %393 : vector<16x32xf32>
    %395 = vector.broadcast %25 : vector<1x32xf32> to vector<16x32xf32>
    %396 = arith.mulf %369, %395 : vector<16x32xf32>
    %cst_127 = arith.constant dense<0.000000e+00> : vector<16x16xf32>
    %397 = tpu.matmul %396, %372, %cst_127 {dimension_numbers = #tpu.dot_dimension_numbers<[1], [1], [0], [0], [0, 0, 1, 0], [], []>} : vector<16x32xf32>, vector<16x32xf32>, vector<16x16xf32> -> vector<16x16xf32>
    %398 = arith.addf %397, %8 : vector<16x16xf32>
    %cst_128 = arith.constant dense<0xFF800000> : vector<16xf32>
    %399 = vector.multi_reduction <maximumf>, %398, %cst_128 [1] : vector<16x16xf32> to vector<16xf32>
    %400 = vector.shape_cast %399 : vector<16xf32> to vector<16x1xf32>
    %401 = vector.broadcast %400 : vector<16x1xf32> to vector<16x16xf32>
    %402 = arith.subf %398, %401 : vector<16x16xf32>
    %403 = math.exp %402 : vector<16x16xf32>
    %cst_129 = arith.constant dense<0.000000e+00> : vector<16xf32>
    %404 = vector.multi_reduction <add>, %403, %cst_129 [1] : vector<16x16xf32> to vector<16xf32>
    %405 = vector.shape_cast %404 : vector<16xf32> to vector<16x1xf32>
    %406 = tpu.reciprocal %405 {approx = true} : vector<16x1xf32> -> vector<16x1xf32>
    %407 = vector.broadcast %406 : vector<16x1xf32> to vector<16x16xf32>
    %408 = arith.mulf %403, %407 : vector<16x16xf32>
    %409 = vector.broadcast %25 : vector<1x32xf32> to vector<16x32xf32>
    %410 = arith.mulf %375, %409 : vector<16x32xf32>
    %cst_130 = arith.constant dense<0.000000e+00> : vector<16x32xf32>
    %411 = tpu.matmul %408, %410, %cst_130 {dimension_numbers = #tpu.dot_dimension_numbers<[1], [0], [0], [1], [0, 0, 1, 1], [], []>} : vector<16x16xf32>, vector<16x32xf32>, vector<16x32xf32> -> vector<16x32xf32>
    %412 = arith.addf %394, %411 : vector<16x32xf32>
    %413 = vector.broadcast %32 : vector<1x32xf32> to vector<16x32xf32>
    %414 = arith.mulf %369, %413 : vector<16x32xf32>
    %cst_131 = arith.constant dense<0.000000e+00> : vector<16x16xf32>
    %415 = tpu.matmul %414, %372, %cst_131 {dimension_numbers = #tpu.dot_dimension_numbers<[1], [1], [0], [0], [0, 0, 1, 0], [], []>} : vector<16x32xf32>, vector<16x32xf32>, vector<16x16xf32> -> vector<16x16xf32>
    %416 = arith.addf %415, %8 : vector<16x16xf32>
    %cst_132 = arith.constant dense<0xFF800000> : vector<16xf32>
    %417 = vector.multi_reduction <maximumf>, %416, %cst_132 [1] : vector<16x16xf32> to vector<16xf32>
    %418 = vector.shape_cast %417 : vector<16xf32> to vector<16x1xf32>
    %419 = vector.broadcast %418 : vector<16x1xf32> to vector<16x16xf32>
    %420 = arith.subf %416, %419 : vector<16x16xf32>
    %421 = math.exp %420 : vector<16x16xf32>
    %cst_133 = arith.constant dense<0.000000e+00> : vector<16xf32>
    %422 = vector.multi_reduction <add>, %421, %cst_133 [1] : vector<16x16xf32> to vector<16xf32>
    %423 = vector.shape_cast %422 : vector<16xf32> to vector<16x1xf32>
    %424 = tpu.reciprocal %423 {approx = true} : vector<16x1xf32> -> vector<16x1xf32>
    %425 = vector.broadcast %424 : vector<16x1xf32> to vector<16x16xf32>
    %426 = arith.mulf %421, %425 : vector<16x16xf32>
    %427 = vector.broadcast %32 : vector<1x32xf32> to vector<16x32xf32>
    %428 = arith.mulf %375, %427 : vector<16x32xf32>
    %cst_134 = arith.constant dense<0.000000e+00> : vector<16x32xf32>
    %429 = tpu.matmul %426, %428, %cst_134 {dimension_numbers = #tpu.dot_dimension_numbers<[1], [0], [0], [1], [0, 0, 1, 1], [], []>} : vector<16x16xf32>, vector<16x32xf32>, vector<16x32xf32> -> vector<16x32xf32>
    %430 = arith.addf %412, %429 : vector<16x32xf32>
    %431 = vector.broadcast %39 : vector<1x32xf32> to vector<16x32xf32>
    %432 = arith.mulf %369, %431 : vector<16x32xf32>
    %cst_135 = arith.constant dense<0.000000e+00> : vector<16x16xf32>
    %433 = tpu.matmul %432, %372, %cst_135 {dimension_numbers = #tpu.dot_dimension_numbers<[1], [1], [0], [0], [0, 0, 1, 0], [], []>} : vector<16x32xf32>, vector<16x32xf32>, vector<16x16xf32> -> vector<16x16xf32>
    %434 = arith.addf %433, %8 : vector<16x16xf32>
    %cst_136 = arith.constant dense<0xFF800000> : vector<16xf32>
    %435 = vector.multi_reduction <maximumf>, %434, %cst_136 [1] : vector<16x16xf32> to vector<16xf32>
    %436 = vector.shape_cast %435 : vector<16xf32> to vector<16x1xf32>
    %437 = vector.broadcast %436 : vector<16x1xf32> to vector<16x16xf32>
    %438 = arith.subf %434, %437 : vector<16x16xf32>
    %439 = math.exp %438 : vector<16x16xf32>
    %cst_137 = arith.constant dense<0.000000e+00> : vector<16xf32>
    %440 = vector.multi_reduction <add>, %439, %cst_137 [1] : vector<16x16xf32> to vector<16xf32>
    %441 = vector.shape_cast %440 : vector<16xf32> to vector<16x1xf32>
    %442 = tpu.reciprocal %441 {approx = true} : vector<16x1xf32> -> vector<16x1xf32>
    %443 = vector.broadcast %442 : vector<16x1xf32> to vector<16x16xf32>
    %444 = arith.mulf %439, %443 : vector<16x16xf32>
    %445 = vector.broadcast %39 : vector<1x32xf32> to vector<16x32xf32>
    %446 = arith.mulf %375, %445 : vector<16x32xf32>
    %cst_138 = arith.constant dense<0.000000e+00> : vector<16x32xf32>
    %447 = tpu.matmul %444, %446, %cst_138 {dimension_numbers = #tpu.dot_dimension_numbers<[1], [0], [0], [1], [0, 0, 1, 1], [], []>} : vector<16x16xf32>, vector<16x32xf32>, vector<16x32xf32> -> vector<16x32xf32>
    %448 = arith.addf %430, %447 : vector<16x32xf32>
    %cst_139 = arith.constant dense<0.000000e+00> : vector<16x32xf32>
    %449 = tpu.matmul %448, %360, %cst_139 {dimension_numbers = #tpu.dot_dimension_numbers<[1], [0], [0], [1], [0, 0, 1, 1], [], []>} : vector<16x32xf32>, vector<32x32xf32>, vector<16x32xf32> -> vector<16x32xf32>
    %450 = vector.broadcast %364 : vector<1x32xf32> to vector<16x32xf32>
    %451 = arith.addf %449, %450 : vector<16x32xf32>
    %452 = arith.addf %325, %451 : vector<16x32xf32>
    %453 = vector.extract_strided_slice %327 {offsets = [2, 0], sizes = [1, 32], strides = [1, 1]} : vector<16x64xf32> to vector<1x32xf32>
    %454 = vector.extract_strided_slice %327 {offsets = [3, 0], sizes = [1, 32], strides = [1, 1]} : vector<16x64xf32> to vector<1x32xf32>
    %cst_140 = arith.constant dense<0.000000e+00> : vector<16xf32>
    %455 = vector.multi_reduction <add>, %452, %cst_140 [1] : vector<16x32xf32> to vector<16xf32>
    %456 = vector.shape_cast %455 : vector<16xf32> to vector<16x1xf32>
    %cst_141 = arith.constant 3.200000e+01 : f32
    %457 = vector.broadcast %cst_141 : f32 to vector<16x1xf32>
    %458 = arith.divf %456, %457 : vector<16x1xf32>
    %459 = vector.broadcast %458 : vector<16x1xf32> to vector<16x32xf32>
    %460 = arith.subf %452, %459 : vector<16x32xf32>
    %461 = arith.mulf %460, %460 : vector<16x32xf32>
    %cst_142 = arith.constant dense<0.000000e+00> : vector<16xf32>
    %462 = vector.multi_reduction <add>, %461, %cst_142 [1] : vector<16x32xf32> to vector<16xf32>
    %463 = vector.shape_cast %462 : vector<16xf32> to vector<16x1xf32>
    %cst_143 = arith.constant 3.200000e+01 : f32
    %464 = vector.broadcast %cst_143 : f32 to vector<16x1xf32>
    %465 = arith.divf %463, %464 : vector<16x1xf32>
    %cst_144 = arith.constant 9.99999974E-6 : f32
    %466 = vector.broadcast %cst_144 : f32 to vector<16x1xf32>
    %467 = arith.addf %465, %466 : vector<16x1xf32>
    %468 = math.rsqrt %467 : vector<16x1xf32>
    %469 = vector.broadcast %468 : vector<16x1xf32> to vector<16x32xf32>
    %470 = arith.mulf %460, %469 : vector<16x32xf32>
    %471 = vector.broadcast %453 : vector<1x32xf32> to vector<16x32xf32>
    %472 = arith.mulf %470, %471 : vector<16x32xf32>
    %473 = vector.broadcast %454 : vector<1x32xf32> to vector<16x32xf32>
    %474 = arith.addf %472, %473 : vector<16x32xf32>
    %475 = arith.addf %474, %0 : vector<16x32xf32>
    %c12 = arith.constant 12 : index
    %c0_145 = arith.constant 0 : index
    %c0_146 = arith.constant 0 : index
    %476 = vector.load %arg5[%c12, %c0_145, %c0_146] : memref<16x32x32xf32, #tpu.memory_space<vmem>>, vector<1x32x32xf32>
    %477 = vector.shape_cast %476 : vector<1x32x32xf32> to vector<32x32xf32>
    %c13 = arith.constant 13 : index
    %c0_147 = arith.constant 0 : index
    %c0_148 = arith.constant 0 : index
    %478 = vector.load %arg5[%c13, %c0_147, %c0_148] : memref<16x32x32xf32, #tpu.memory_space<vmem>>, vector<1x32x32xf32>
    %479 = vector.shape_cast %478 : vector<1x32x32xf32> to vector<32x32xf32>
    %c14 = arith.constant 14 : index
    %c0_149 = arith.constant 0 : index
    %c0_150 = arith.constant 0 : index
    %480 = vector.load %arg5[%c14, %c0_149, %c0_150] : memref<16x32x32xf32, #tpu.memory_space<vmem>>, vector<1x32x32xf32>
    %481 = vector.shape_cast %480 : vector<1x32x32xf32> to vector<32x32xf32>
    %c15 = arith.constant 15 : index
    %c0_151 = arith.constant 0 : index
    %c0_152 = arith.constant 0 : index
    %482 = vector.load %arg5[%c15, %c0_151, %c0_152] : memref<16x32x32xf32, #tpu.memory_space<vmem>>, vector<1x32x32xf32>
    %483 = vector.shape_cast %482 : vector<1x32x32xf32> to vector<32x32xf32>
    %484 = vector.extract_strided_slice %327 {offsets = [10, 0], sizes = [1, 32], strides = [1, 1]} : vector<16x64xf32> to vector<1x32xf32>
    %485 = vector.extract_strided_slice %327 {offsets = [11, 0], sizes = [1, 32], strides = [1, 1]} : vector<16x64xf32> to vector<1x32xf32>
    %486 = vector.extract_strided_slice %327 {offsets = [12, 0], sizes = [1, 32], strides = [1, 1]} : vector<16x64xf32> to vector<1x32xf32>
    %487 = vector.extract_strided_slice %327 {offsets = [13, 0], sizes = [1, 32], strides = [1, 1]} : vector<16x64xf32> to vector<1x32xf32>
    %cst_153 = arith.constant dense<0.000000e+00> : vector<16x32xf32>
    %488 = tpu.matmul %475, %477, %cst_153 {dimension_numbers = #tpu.dot_dimension_numbers<[1], [0], [0], [1], [0, 0, 1, 1], [], []>} : vector<16x32xf32>, vector<32x32xf32>, vector<16x32xf32> -> vector<16x32xf32>
    %489 = vector.broadcast %484 : vector<1x32xf32> to vector<16x32xf32>
    %490 = arith.addf %488, %489 : vector<16x32xf32>
    %cst_154 = arith.constant 0.353553385 : f32
    %491 = vector.broadcast %cst_154 : f32 to vector<16x32xf32>
    %492 = arith.mulf %490, %491 : vector<16x32xf32>
    %cst_155 = arith.constant dense<0.000000e+00> : vector<32x32xf32>
    %493 = tpu.matmul %4, %479, %cst_155 {dimension_numbers = #tpu.dot_dimension_numbers<[1], [0], [0], [1], [0, 0, 1, 1], [], []>} : vector<32x32xf32>, vector<32x32xf32>, vector<32x32xf32> -> vector<32x32xf32>
    %494 = vector.broadcast %485 : vector<1x32xf32> to vector<32x32xf32>
    %495 = arith.addf %493, %494 : vector<32x32xf32>
    %cst_156 = arith.constant dense<0.000000e+00> : vector<32x32xf32>
    %496 = tpu.matmul %6, %481, %cst_156 {dimension_numbers = #tpu.dot_dimension_numbers<[1], [0], [0], [1], [0, 0, 1, 1], [], []>} : vector<32x32xf32>, vector<32x32xf32>, vector<32x32xf32> -> vector<32x32xf32>
    %497 = vector.broadcast %486 : vector<1x32xf32> to vector<32x32xf32>
    %498 = arith.addf %496, %497 : vector<32x32xf32>
    %cst_157 = arith.constant 0.000000e+00 : f32
    %499 = vector.broadcast %cst_157 : f32 to vector<16x32xf32>
    %500 = vector.broadcast %18 : vector<1x32xf32> to vector<16x32xf32>
    %501 = arith.mulf %492, %500 : vector<16x32xf32>
    %cst_158 = arith.constant dense<0.000000e+00> : vector<16x32xf32>
    %502 = tpu.matmul %501, %495, %cst_158 {dimension_numbers = #tpu.dot_dimension_numbers<[1], [1], [0], [0], [0, 0, 1, 0], [], []>} : vector<16x32xf32>, vector<32x32xf32>, vector<16x32xf32> -> vector<16x32xf32>
    %503 = arith.addf %502, %10 : vector<16x32xf32>
    %cst_159 = arith.constant dense<0xFF800000> : vector<16xf32>
    %504 = vector.multi_reduction <maximumf>, %503, %cst_159 [1] : vector<16x32xf32> to vector<16xf32>
    %505 = vector.shape_cast %504 : vector<16xf32> to vector<16x1xf32>
    %506 = vector.broadcast %505 : vector<16x1xf32> to vector<16x32xf32>
    %507 = arith.subf %503, %506 : vector<16x32xf32>
    %508 = math.exp %507 : vector<16x32xf32>
    %cst_160 = arith.constant dense<0.000000e+00> : vector<16xf32>
    %509 = vector.multi_reduction <add>, %508, %cst_160 [1] : vector<16x32xf32> to vector<16xf32>
    %510 = vector.shape_cast %509 : vector<16xf32> to vector<16x1xf32>
    %511 = tpu.reciprocal %510 {approx = true} : vector<16x1xf32> -> vector<16x1xf32>
    %512 = vector.broadcast %511 : vector<16x1xf32> to vector<16x32xf32>
    %513 = arith.mulf %508, %512 : vector<16x32xf32>
    %514 = vector.broadcast %18 : vector<1x32xf32> to vector<32x32xf32>
    %515 = arith.mulf %498, %514 : vector<32x32xf32>
    %cst_161 = arith.constant dense<0.000000e+00> : vector<16x32xf32>
    %516 = tpu.matmul %513, %515, %cst_161 {dimension_numbers = #tpu.dot_dimension_numbers<[1], [0], [0], [1], [0, 0, 1, 1], [], []>} : vector<16x32xf32>, vector<32x32xf32>, vector<16x32xf32> -> vector<16x32xf32>
    %517 = arith.addf %499, %516 : vector<16x32xf32>
    %518 = vector.broadcast %25 : vector<1x32xf32> to vector<16x32xf32>
    %519 = arith.mulf %492, %518 : vector<16x32xf32>
    %cst_162 = arith.constant dense<0.000000e+00> : vector<16x32xf32>
    %520 = tpu.matmul %519, %495, %cst_162 {dimension_numbers = #tpu.dot_dimension_numbers<[1], [1], [0], [0], [0, 0, 1, 0], [], []>} : vector<16x32xf32>, vector<32x32xf32>, vector<16x32xf32> -> vector<16x32xf32>
    %521 = arith.addf %520, %10 : vector<16x32xf32>
    %cst_163 = arith.constant dense<0xFF800000> : vector<16xf32>
    %522 = vector.multi_reduction <maximumf>, %521, %cst_163 [1] : vector<16x32xf32> to vector<16xf32>
    %523 = vector.shape_cast %522 : vector<16xf32> to vector<16x1xf32>
    %524 = vector.broadcast %523 : vector<16x1xf32> to vector<16x32xf32>
    %525 = arith.subf %521, %524 : vector<16x32xf32>
    %526 = math.exp %525 : vector<16x32xf32>
    %cst_164 = arith.constant dense<0.000000e+00> : vector<16xf32>
    %527 = vector.multi_reduction <add>, %526, %cst_164 [1] : vector<16x32xf32> to vector<16xf32>
    %528 = vector.shape_cast %527 : vector<16xf32> to vector<16x1xf32>
    %529 = tpu.reciprocal %528 {approx = true} : vector<16x1xf32> -> vector<16x1xf32>
    %530 = vector.broadcast %529 : vector<16x1xf32> to vector<16x32xf32>
    %531 = arith.mulf %526, %530 : vector<16x32xf32>
    %532 = vector.broadcast %25 : vector<1x32xf32> to vector<32x32xf32>
    %533 = arith.mulf %498, %532 : vector<32x32xf32>
    %cst_165 = arith.constant dense<0.000000e+00> : vector<16x32xf32>
    %534 = tpu.matmul %531, %533, %cst_165 {dimension_numbers = #tpu.dot_dimension_numbers<[1], [0], [0], [1], [0, 0, 1, 1], [], []>} : vector<16x32xf32>, vector<32x32xf32>, vector<16x32xf32> -> vector<16x32xf32>
    %535 = arith.addf %517, %534 : vector<16x32xf32>
    %536 = vector.broadcast %32 : vector<1x32xf32> to vector<16x32xf32>
    %537 = arith.mulf %492, %536 : vector<16x32xf32>
    %cst_166 = arith.constant dense<0.000000e+00> : vector<16x32xf32>
    %538 = tpu.matmul %537, %495, %cst_166 {dimension_numbers = #tpu.dot_dimension_numbers<[1], [1], [0], [0], [0, 0, 1, 0], [], []>} : vector<16x32xf32>, vector<32x32xf32>, vector<16x32xf32> -> vector<16x32xf32>
    %539 = arith.addf %538, %10 : vector<16x32xf32>
    %cst_167 = arith.constant dense<0xFF800000> : vector<16xf32>
    %540 = vector.multi_reduction <maximumf>, %539, %cst_167 [1] : vector<16x32xf32> to vector<16xf32>
    %541 = vector.shape_cast %540 : vector<16xf32> to vector<16x1xf32>
    %542 = vector.broadcast %541 : vector<16x1xf32> to vector<16x32xf32>
    %543 = arith.subf %539, %542 : vector<16x32xf32>
    %544 = math.exp %543 : vector<16x32xf32>
    %cst_168 = arith.constant dense<0.000000e+00> : vector<16xf32>
    %545 = vector.multi_reduction <add>, %544, %cst_168 [1] : vector<16x32xf32> to vector<16xf32>
    %546 = vector.shape_cast %545 : vector<16xf32> to vector<16x1xf32>
    %547 = tpu.reciprocal %546 {approx = true} : vector<16x1xf32> -> vector<16x1xf32>
    %548 = vector.broadcast %547 : vector<16x1xf32> to vector<16x32xf32>
    %549 = arith.mulf %544, %548 : vector<16x32xf32>
    %550 = vector.broadcast %32 : vector<1x32xf32> to vector<32x32xf32>
    %551 = arith.mulf %498, %550 : vector<32x32xf32>
    %cst_169 = arith.constant dense<0.000000e+00> : vector<16x32xf32>
    %552 = tpu.matmul %549, %551, %cst_169 {dimension_numbers = #tpu.dot_dimension_numbers<[1], [0], [0], [1], [0, 0, 1, 1], [], []>} : vector<16x32xf32>, vector<32x32xf32>, vector<16x32xf32> -> vector<16x32xf32>
    %553 = arith.addf %535, %552 : vector<16x32xf32>
    %554 = vector.broadcast %39 : vector<1x32xf32> to vector<16x32xf32>
    %555 = arith.mulf %492, %554 : vector<16x32xf32>
    %cst_170 = arith.constant dense<0.000000e+00> : vector<16x32xf32>
    %556 = tpu.matmul %555, %495, %cst_170 {dimension_numbers = #tpu.dot_dimension_numbers<[1], [1], [0], [0], [0, 0, 1, 0], [], []>} : vector<16x32xf32>, vector<32x32xf32>, vector<16x32xf32> -> vector<16x32xf32>
    %557 = arith.addf %556, %10 : vector<16x32xf32>
    %cst_171 = arith.constant dense<0xFF800000> : vector<16xf32>
    %558 = vector.multi_reduction <maximumf>, %557, %cst_171 [1] : vector<16x32xf32> to vector<16xf32>
    %559 = vector.shape_cast %558 : vector<16xf32> to vector<16x1xf32>
    %560 = vector.broadcast %559 : vector<16x1xf32> to vector<16x32xf32>
    %561 = arith.subf %557, %560 : vector<16x32xf32>
    %562 = math.exp %561 : vector<16x32xf32>
    %cst_172 = arith.constant dense<0.000000e+00> : vector<16xf32>
    %563 = vector.multi_reduction <add>, %562, %cst_172 [1] : vector<16x32xf32> to vector<16xf32>
    %564 = vector.shape_cast %563 : vector<16xf32> to vector<16x1xf32>
    %565 = tpu.reciprocal %564 {approx = true} : vector<16x1xf32> -> vector<16x1xf32>
    %566 = vector.broadcast %565 : vector<16x1xf32> to vector<16x32xf32>
    %567 = arith.mulf %562, %566 : vector<16x32xf32>
    %568 = vector.broadcast %39 : vector<1x32xf32> to vector<32x32xf32>
    %569 = arith.mulf %498, %568 : vector<32x32xf32>
    %cst_173 = arith.constant dense<0.000000e+00> : vector<16x32xf32>
    %570 = tpu.matmul %567, %569, %cst_173 {dimension_numbers = #tpu.dot_dimension_numbers<[1], [0], [0], [1], [0, 0, 1, 1], [], []>} : vector<16x32xf32>, vector<32x32xf32>, vector<16x32xf32> -> vector<16x32xf32>
    %571 = arith.addf %553, %570 : vector<16x32xf32>
    %cst_174 = arith.constant dense<0.000000e+00> : vector<16x32xf32>
    %572 = tpu.matmul %571, %483, %cst_174 {dimension_numbers = #tpu.dot_dimension_numbers<[1], [0], [0], [1], [0, 0, 1, 1], [], []>} : vector<16x32xf32>, vector<32x32xf32>, vector<16x32xf32> -> vector<16x32xf32>
    %573 = vector.broadcast %487 : vector<1x32xf32> to vector<16x32xf32>
    %574 = arith.addf %572, %573 : vector<16x32xf32>
    %575 = arith.addf %452, %574 : vector<16x32xf32>
    %576 = vector.extract_strided_slice %327 {offsets = [4, 0], sizes = [1, 32], strides = [1, 1]} : vector<16x64xf32> to vector<1x32xf32>
    %577 = vector.extract_strided_slice %327 {offsets = [5, 0], sizes = [1, 32], strides = [1, 1]} : vector<16x64xf32> to vector<1x32xf32>
    %cst_175 = arith.constant dense<0.000000e+00> : vector<16xf32>
    %578 = vector.multi_reduction <add>, %575, %cst_175 [1] : vector<16x32xf32> to vector<16xf32>
    %579 = vector.shape_cast %578 : vector<16xf32> to vector<16x1xf32>
    %cst_176 = arith.constant 3.200000e+01 : f32
    %580 = vector.broadcast %cst_176 : f32 to vector<16x1xf32>
    %581 = arith.divf %579, %580 : vector<16x1xf32>
    %582 = vector.broadcast %581 : vector<16x1xf32> to vector<16x32xf32>
    %583 = arith.subf %575, %582 : vector<16x32xf32>
    %584 = arith.mulf %583, %583 : vector<16x32xf32>
    %cst_177 = arith.constant dense<0.000000e+00> : vector<16xf32>
    %585 = vector.multi_reduction <add>, %584, %cst_177 [1] : vector<16x32xf32> to vector<16xf32>
    %586 = vector.shape_cast %585 : vector<16xf32> to vector<16x1xf32>
    %cst_178 = arith.constant 3.200000e+01 : f32
    %587 = vector.broadcast %cst_178 : f32 to vector<16x1xf32>
    %588 = arith.divf %586, %587 : vector<16x1xf32>
    %cst_179 = arith.constant 9.99999974E-6 : f32
    %589 = vector.broadcast %cst_179 : f32 to vector<16x1xf32>
    %590 = arith.addf %588, %589 : vector<16x1xf32>
    %591 = math.rsqrt %590 : vector<16x1xf32>
    %592 = vector.broadcast %591 : vector<16x1xf32> to vector<16x32xf32>
    %593 = arith.mulf %583, %592 : vector<16x32xf32>
    %594 = vector.broadcast %576 : vector<1x32xf32> to vector<16x32xf32>
    %595 = arith.mulf %593, %594 : vector<16x32xf32>
    %596 = vector.broadcast %577 : vector<1x32xf32> to vector<16x32xf32>
    %597 = arith.addf %595, %596 : vector<16x32xf32>
    %598 = vector.extract_strided_slice %329 {offsets = [0, 0], sizes = [32, 64], strides = [1, 1]} : vector<96x64xf32> to vector<32x64xf32>
    %cst_180 = arith.constant dense<0.000000e+00> : vector<16x64xf32>
    %599 = tpu.matmul %597, %598, %cst_180 {dimension_numbers = #tpu.dot_dimension_numbers<[1], [0], [0], [1], [0, 0, 1, 1], [], []>} : vector<16x32xf32>, vector<32x64xf32>, vector<16x64xf32> -> vector<16x64xf32>
    %600 = vector.extract_strided_slice %327 {offsets = [15, 0], sizes = [1, 64], strides = [1, 1]} : vector<16x64xf32> to vector<1x64xf32>
    %601 = vector.broadcast %600 : vector<1x64xf32> to vector<16x64xf32>
    %602 = arith.addf %599, %601 : vector<16x64xf32>
    %cst_181 = arith.constant 0.000000e+00 : f32
    %603 = vector.broadcast %cst_181 : f32 to vector<16x64xf32>
    %604 = arith.maximumf %602, %603 : vector<16x64xf32>
    %605 = vector.extract_strided_slice %329 {offsets = [32, 0], sizes = [64, 32], strides = [1, 1]} : vector<96x64xf32> to vector<64x32xf32>
    %cst_182 = arith.constant dense<0.000000e+00> : vector<16x32xf32>
    %606 = tpu.matmul %604, %605, %cst_182 {dimension_numbers = #tpu.dot_dimension_numbers<[1], [0], [0], [1], [0, 0, 1, 1], [], []>} : vector<16x64xf32>, vector<64x32xf32>, vector<16x32xf32> -> vector<16x32xf32>
    %607 = arith.addf %575, %606 : vector<16x32xf32>
    %608 = vector.extract_strided_slice %327 {offsets = [14, 0], sizes = [1, 32], strides = [1, 1]} : vector<16x64xf32> to vector<1x32xf32>
    %609 = vector.broadcast %608 : vector<1x32xf32> to vector<16x32xf32>
    %610 = arith.addf %607, %609 : vector<16x32xf32>
    %c0_183 = arith.constant 0 : index
    %c0_184 = arith.constant 0 : index
    %611 = vector.load %arg8[%c0_183, %c0_184] : memref<35x32xf32, #tpu.memory_space<vmem>>, vector<35x32xf32>
    %612 = vector.extract_strided_slice %611 {offsets = [0, 0], sizes = [1, 32], strides = [1, 1]} : vector<35x32xf32> to vector<1x32xf32>
    %613 = vector.extract_strided_slice %611 {offsets = [1, 0], sizes = [1, 32], strides = [1, 1]} : vector<35x32xf32> to vector<1x32xf32>
    %cst_185 = arith.constant dense<0.000000e+00> : vector<16xf32>
    %614 = vector.multi_reduction <add>, %610, %cst_185 [1] : vector<16x32xf32> to vector<16xf32>
    %615 = vector.shape_cast %614 : vector<16xf32> to vector<16x1xf32>
    %cst_186 = arith.constant 3.200000e+01 : f32
    %616 = vector.broadcast %cst_186 : f32 to vector<16x1xf32>
    %617 = arith.divf %615, %616 : vector<16x1xf32>
    %618 = vector.broadcast %617 : vector<16x1xf32> to vector<16x32xf32>
    %619 = arith.subf %610, %618 : vector<16x32xf32>
    %620 = arith.mulf %619, %619 : vector<16x32xf32>
    %cst_187 = arith.constant dense<0.000000e+00> : vector<16xf32>
    %621 = vector.multi_reduction <add>, %620, %cst_187 [1] : vector<16x32xf32> to vector<16xf32>
    %622 = vector.shape_cast %621 : vector<16xf32> to vector<16x1xf32>
    %cst_188 = arith.constant 3.200000e+01 : f32
    %623 = vector.broadcast %cst_188 : f32 to vector<16x1xf32>
    %624 = arith.divf %622, %623 : vector<16x1xf32>
    %cst_189 = arith.constant 9.99999974E-6 : f32
    %625 = vector.broadcast %cst_189 : f32 to vector<16x1xf32>
    %626 = arith.addf %624, %625 : vector<16x1xf32>
    %627 = math.rsqrt %626 : vector<16x1xf32>
    %628 = vector.broadcast %627 : vector<16x1xf32> to vector<16x32xf32>
    %629 = arith.mulf %619, %628 : vector<16x32xf32>
    %630 = vector.broadcast %612 : vector<1x32xf32> to vector<16x32xf32>
    %631 = arith.mulf %629, %630 : vector<16x32xf32>
    %632 = vector.broadcast %613 : vector<1x32xf32> to vector<16x32xf32>
    %633 = arith.addf %631, %632 : vector<16x32xf32>
    %634 = vector.extract_strided_slice %611 {offsets = [3, 0], sizes = [32, 12], strides = [1, 1]} : vector<35x32xf32> to vector<32x12xf32>
    %cst_190 = arith.constant dense<0.000000e+00> : vector<16x12xf32>
    %635 = tpu.matmul %633, %634, %cst_190 {dimension_numbers = #tpu.dot_dimension_numbers<[1], [0], [0], [1], [0, 0, 1, 1], [], []>} : vector<16x32xf32>, vector<32x12xf32>, vector<16x12xf32> -> vector<16x12xf32>
    %636 = vector.extract_strided_slice %611 {offsets = [2, 0], sizes = [1, 12], strides = [1, 1]} : vector<35x32xf32> to vector<1x12xf32>
    %637 = vector.broadcast %636 : vector<1x12xf32> to vector<16x12xf32>
    %638 = arith.addf %635, %637 : vector<16x12xf32>
    %c0_191 = arith.constant 0 : index
    %c0_192 = arith.constant 0 : index
    %c0_193 = arith.constant 0 : index
    %639 = vector.load %arg9[%c0_191, %c0_192, %c0_193] : memref<1x16x12xf32, #tpu.memory_space<vmem>>, vector<1x16x12xf32>
    %640 = vector.shape_cast %639 : vector<1x16x12xf32> to vector<16x12xf32>
    %641 = vector.shape_cast %638 : vector<16x12xf32> to vector<1x16x12xf32>
    tpu.vector_store %arg9[%c0_191, %c0_192, %c0_193], %641 {strides = array<i32>} : memref<1x16x12xf32, #tpu.memory_space<vmem>>, vector<1x16x12xf32>,
    return
  }
  func.func @transform_0(%arg0: i32) -> (i32, i32) {
    %c0_i32 = arith.constant 0 : i32
    %c0_i32_0 = arith.constant 0 : i32
    %c0_i32_1 = arith.constant 0 : i32
    return %c0_i32, %c0_i32_0 : i32, i32
  }
  func.func @transform_1(%arg0: i32) -> (i32, i32, i32, i32) {
    %c0_i32 = arith.constant 0 : i32
    %c0_i32_0 = arith.constant 0 : i32
    %c0_i32_1 = arith.constant 0 : i32
    %c0_i32_2 = arith.constant 0 : i32
    return %arg0, %c0_i32, %c0_i32_0, %c0_i32_1 : i32, i32, i32, i32
  }
  func.func @transform_2(%arg0: i32) -> (i32, i32, i32) {
    %c0_i32 = arith.constant 0 : i32
    %c0_i32_0 = arith.constant 0 : i32
    %c0_i32_1 = arith.constant 0 : i32
    return %arg0, %c0_i32, %c0_i32_0 : i32, i32, i32
  }
  func.func @transform_3(%arg0: i32) -> (i32, i32, i32) {
    %c0_i32 = arith.constant 0 : i32
    %c0_i32_0 = arith.constant 0 : i32
    %c0_i32_1 = arith.constant 0 : i32
    return %arg0, %c0_i32, %c0_i32_0 : i32, i32, i32
  }
  func.func @transform_4(%arg0: i32) -> (i32, i32, i32) {
    %c0_i32 = arith.constant 0 : i32
    %c0_i32_0 = arith.constant 0 : i32
    %c0_i32_1 = arith.constant 0 : i32
    %c0_i32_2 = arith.constant 0 : i32
    return %c0_i32, %c0_i32_0, %c0_i32_1 : i32, i32, i32
  }
  func.func @transform_5(%arg0: i32) -> (i32, i32, i32) {
    %c0_i32 = arith.constant 0 : i32
    %c0_i32_0 = arith.constant 0 : i32
    %c0_i32_1 = arith.constant 0 : i32
    %c0_i32_2 = arith.constant 0 : i32
    return %c0_i32, %c0_i32_0, %c0_i32_1 : i32, i32, i32
  }
  func.func @transform_6(%arg0: i32) -> (i32, i32, i32) {
    %c0_i32 = arith.constant 0 : i32
    %c0_i32_0 = arith.constant 0 : i32
    %c0_i32_1 = arith.constant 0 : i32
    %c0_i32_2 = arith.constant 0 : i32
    return %c0_i32, %c0_i32_0, %c0_i32_1 : i32, i32, i32
  }
  func.func @transform_7(%arg0: i32) -> (i32, i32) {
    %c0_i32 = arith.constant 0 : i32
    %c0_i32_0 = arith.constant 0 : i32
    %c0_i32_1 = arith.constant 0 : i32
    return %c0_i32, %c0_i32_0 : i32, i32
  }
  func.func @transform_8(%arg0: i32) -> (i32, i32, i32) {
    %c0_i32 = arith.constant 0 : i32
    %c0_i32_0 = arith.constant 0 : i32
    %c0_i32_1 = arith.constant 0 : i32
    return %arg0, %c0_i32, %c0_i32_0 : i32, i32, i32
  }
}

</mosaic_0001>

<bundles_post_ra>
// kernel: tpu_custom_call.1
= control target key start
LH: loop header
LB: loop body
LE: loop exit
PB: predicated region body
PF: predicated region fallthrough
CT: control target
= control target key end

     0   :  { %13 = vsyncpa [#allocation3], 0  ;;  %s6623_s27 = smov [#allocation2]   ;;  %s7746_s0 = inlined_call_operand.vmem [shape: f32[16,32], index: 0, kind: input, shape index: {}]   ;;  %s7747_s1 = inlined_call_operand.vmem [shape: f32[1,2,32,32], index: 1, kind: input, shape index: {}]   ;;  %s7748_s2 = inlined_call_operand.vmem [shape: f32[1,16,16], index: 2, kind: input, shape index: {}]   ;;  %s7749_s3 = inlined_call_operand.vmem [shape: f32[1,16,32], index: 3, kind: input, shape index: {}]   ;;  %s7750_s4 = inlined_call_operand.hbm [shape: f32[16,32,32], index: 4, kind: input, shape index: {}]   ;;  %s7751_s5 = inlined_call_operand.vmem [shape: f32[2,96,64], index: 5, kind: input, shape index: {}]   ;;  %s7752_s6 = inlined_call_operand.vmem [shape: f32[2,16,64], index: 6, kind: input, shape index: {}]   ;;  %s7753_s7 = inlined_call_operand.vmem [shape: f32[35,32], index: 7, kind: input, shape index: {}]   ;;  %s7754_s8 = inlined_call_operand.vmem [shape: f32[1,16,12], index: 8, kind: output, shape index: {}]  }
   0x1   :  { %s27_s28 = sshll.u32 %s6623_s27, 4  ;;  %s28_s28 = int_to_ptr.vmem [resolvable:$true] %s27_s28 }
   0x2   :  { %s6609_s29 = scalar_lea.vmem %s28_s28, 8192  ;;  %p6614_p1 = scmp.lt.s32.totalorder %s28_s28, %s28_s28 }
   0x3   :  { %p6610_p0 = scmp.ne.s32.totalorder %s28_s28, %s6609_s29  ;;  %p6615_p2 = scmp.lt.s32.totalorder %s6609_s29, %s6609_s29 }
   0x5   :  { %p6616_p3 = por %p6615_p2, %p6614_p1 }
   0x7   :  { %p6617_p4 = pnand %p6616_p3, %p6610_p0 }
   0x9   :  { %6620 = shalt.err (!%p6617_p4)
}
   0xa   :  { %s6624_s30 = smov 128   ;;  %s6625_s9 = smov 8   ;;  %v57_v0 = vlaneseq }
   0xb   :  { %33 = dma.hbm_to_vmem [thread:$0]  %s7750_s4, 8192, %s28_s28, [#allocation3], %s6624_s30, %s6624_s30, %s6625_s9  }
   0xc   :  { %6621 = dma.done.wait [#allocation3], 8192  }
   0xd   :  { %6622 = vsyncadd [#allocation3], 4294959104  ;;  %v6626_v1 = vmov 0.0   ;;  %v58_v2 = vand.u32 127, %v57_v0  ;;  %vm99_vm10 = vcmask 261120   ;;  %v122_v12 = vld [vmem:[#allocation2 + $0x18] sm:$0xff] }
   0xe   :  { %93 = vadd.xlane.f32.xlu0 %v6626_v1  ;;  %v127_v13 = vld [vmem:[#allocation2 + $0x38] sm:$0xff]  ;;  %v121_v14 = vld [vmem:[#allocation2 + $0x10] sm:$0xff]  ;;  %5878 = vmatprep.subr.mxu0 %v122_v12  ;;  %v120_v16 = vld [vmem:[#allocation2 + $0x8] sm:$0xff]  ;;  %v6684_v24 = vshrl.u32 %v57_v0, 7  ;;  %vm475_vm11 = vcmask 130048   ;;  %vm2573_vm12 = vcmask 523264  }
   0xf   :  { %vm60_vm0 = vcmp.lt.s32.totalorder %v58_v2, 8  ;;  %vm64_vm1 = vcmp.ge.s32.totalorder %v58_v2, 8  ;;  %vm65_vm2 = vcmp.lt.s32.totalorder %v58_v2, 16  ;;  %vm69_vm3 = vcmp.ge.s32.totalorder %v58_v2, 16  ;;  %5889 = vmatprep.subr.mxu1 %v127_v13  ;;  %v126_v15 = vld [vmem:[#allocation2 + $0x30] sm:$0xff]  ;;  %5879 = vmatpush3.msra.mxu0 %v122_v12  ;;  %v125_v17 = vld [vmem:[#allocation2 + $0x28] sm:$0xff] }
  0x10   :  { %v6675_v3 = vsel %vm60_vm0, 1.0, %v6626_v1  ;;  %vm66_vm4 = vmand %vm64_vm1, %vm65_vm2  ;;  %vm70_vm5 = vcmp.lt.s32.totalorder %v58_v2, 24  ;;  %vm74_vm6 = vcmp.ge.s32.totalorder %v58_v2, 24  ;;  %vm75_vm7 = vcmp.lt.s32.totalorder %v58_v2, 32  ;;  %5890 = vmatpush3.msra.mxu1 %v127_v13  ;;  %5880 = vmatprep.subr.mxu0 %v121_v14  ;;  %v119_v18 = vld [vmem:[#allocation2] sm:$0xff]  ;;  %v132_v20 = vld [vmem:[#allocation2 + $0x58] sm:$0xff] }
  0x11   :  { %v6677_v4 = vsel %vm66_vm4, 1.0, %v6626_v1  ;;  %vm71_vm8 = vmand %vm69_vm3, %vm70_vm5  ;;  %5891 = vmatprep.subr.mxu1 %v126_v15  ;;  %5881 = vmatpush3.msra.mxu0 %v121_v14  ;;  %v124_v19 = vld [vmem:[#allocation2 + $0x20] sm:$0xff]  ;;  %v6687_v25 = vsub.s32 0, %v6684_v24  ;;  %v6695_v27 = vsub.s32 1, %v6684_v24  ;;  %v6709_v34 = vld [vmem:[%s7746_s0 + $0x8] sm:$0xff]  ;;  %v6720_v41 = vsub.s32 6, %v6684_v24 }
  0x12   :  { %v6679_v5 = vsel %vm71_vm8, 1.0, %v6626_v1  ;;  %vm76_vm9 = vmand %vm74_vm6, %vm75_vm7  ;;  %5892 = vmatpush3.msra.mxu1 %v126_v15  ;;  %5882 = vmatprep.subr.mxu0 %v120_v16  ;;  %v6692_v26 = vld [vmem:[%s7752_s6] sm:$0xff]  ;;  %v131_v38 = vld [vmem:[#allocation2 + $0x50] sm:$0xff]  ;;  %v6723_v42 = vsub.s32 7, %v6684_v24  ;;  %vm5293_vm13 = vcmask 1044480   ;;  %vm5388_vm14 = vcmask 97280  }
  0x13   :  { %v6681_v6 = vsel %vm76_vm9, 1.0, %v6626_v1  ;;  %5893 = vmatprep.subr.mxu1 %v125_v17  ;;  %5883 = vmatpush3.msra.mxu0 %v120_v16  ;;  %v110_v28 = vrot.slane %v6692_v26, %v6687_v25  ;;  %v115_v31 = vrot.slane %v6692_v26, %v6695_v27  ;;  %v6704_v33 = vld [vmem:[%s7746_s0] sm:$0xff]  ;;  %v130_v39 = vld [vmem:[#allocation2 + $0x48] sm:$0xff]  ;;  %v141_v43 = vrot.slane %v6692_v26, %v6720_v41 }
  0x14   :  { %5894 = vmatpush3.msra.mxu1 %v125_v17  ;;  %5884 = vmatprep.subr.mxu0 %v119_v18  ;;  %v129_v40 = vld [vmem:[#allocation2 + $0x40] sm:$0xff]  ;;  %v228_v44 = vrot.slane %v6692_v26, %v6723_v42  ;;  %v6734_v51 = vld [vmem:[%s7752_s6 + $0x8] sm:$0xff] }
  0x15   :  { %5895 = vmatprep.subr.mxu1 %v124_v19  ;;  %5885 = vmatpush3.msra.mxu0 %v119_v18  ;;  %v307_v55 = vrot.slane %v6734_v51, %v6687_v25  ;;  %v6802_v12 = vld [vmem:[%s7748_s2] sm:$0xff]  ;;  %v6807_v13 = vld [vmem:[%s7748_s2 + $0x8] sm:$0xff] }
  0x16   :  { %5896 = vmatpush3.msra.mxu1 %v124_v19  ;;  %5900 = vmatprep.subr.mxu0 %v132_v20 }
  0x97   :  { %v94_v7 = vpop.xlane.xlu0 %93 }
  0x98   :  { %v96_v8 = vmul.f32 0.03125, %v94_v7 }
  0x9a   :  { %v97_v9 = vsub.f32 0.0, %v96_v8 }
  0x9c   :  { %v98_v10 = vmul.f32 %v97_v9, %v97_v9 }
  0x9e   :  { %v100_v11 = vsel %vm99_vm10, %v98_v10, 0.0 }
  0x9f   :  { %101 = vadd.xlane.f32.xlu0 %v100_v11 }
 0x128   :  { %v102_v21 = vpop.xlane.xlu0 %101 }
 0x129   :  { %v103_v22 = vmul.f32 0.03125, %v102_v21 }
 0x12b   :  { %v104_v23 = vadd.f32 1e-05, %v103_v22 }
 0x12d   :  { %6429 = vrsqrt.f32 %v104_v23 }
 0x13a   :  { %v6430_v29 = vpop.eup %6429 }
 0x13b   :  { %v106_v30 = vmul.f32 %v6430_v29, %v97_v9 }
 0x13d   :  { %v111_v32 = vmul.f32 %v110_v28, %v106_v30 }
 0x13f   :  { %v116_v35 = vadd.f32 %v115_v31, %v111_v32 }
 0x141   :  { %v117_v36 = vadd.f32 %v116_v35, %v6704_v33  ;;  %v118_v37 = vadd.f32 %v116_v35, %v6709_v34 }
 0x143   :  { %5886 = vmatprep.mubr.msk.f32.mxu0 %vm99_vm10, %v117_v36  ;;  %5897 = vmatprep.mubr.msk.f32.mxu1 %vm99_vm10, %v117_v36 }
 0x144   :  { %5887 = vmatmul.mubr.msk.f32.vlgmr.msra.gmra.mxu0 %vm99_vm10, %v118_v37  ;;  %5898 = vmatmul.mubr.msk.f32.vlgmr.msra.gmra.mxu1 %vm99_vm10, %v118_v37 }
 0x145   :  { %5901 = vmatpush3.msra.mxu0 %v132_v20  ;;  %5908 = vmatprep.mubr.msk.f32.mxu0 %vm99_vm10, %v116_v35 }
 0x146   :  { %5902 = vmatprep.subr.mxu0 %v131_v38 }
 0x147   :  { %5903 = vmatpush3.msra.mxu0 %v131_v38 }
 0x148   :  { %5904 = vmatprep.subr.mxu0 %v130_v39 }
 0x149   :  { %5905 = vmatpush3.msra.mxu0 %v130_v39 }
 0x14a   :  { %5906 = vmatprep.subr.mxu0 %v129_v40 }
 0x14b   :  { %5907 = vmatpush3.msra.mxu0 %v129_v40 }
 0x14c   :  { %5909 = vmatmul.mubr.msk.f32.vlgmr.msra.gmra.mxu0 %vm99_vm10, %v116_v35 }
 0x204   :  { %v5888_v45 = vpop.f32.mrf.mxu0  ;;  %v5899_v46 = vpop.f32.mrf.mxu1 }
 0x205   :  { %v220_v47 = vadd.f32 %v5888_v45, %v141_v43  ;;  %v6729_v48 = vadd.f32 %v5899_v46, %v228_v44 }
 0x206   :  { %v214_v49 = vpop.f32.mrf.mxu0  ;;  %v295_v50 = vpop.f32.mrf.mxu1 }
 0x207   :  { %v215_v52 = vadd.f32 %v214_v49, %v141_v43  ;;  %v6736_v53 = vadd.f32 %v295_v50, %v228_v44  ;;  %5911 = vmatprep.subr.msk.mxu1 %vm99_vm10, %v6729_v48  ;;  %5918 = vmatprep.subr.msk.mxu0 %vm99_vm10, %v6729_v48  ;;  %v6746_v54 = vmul.f32 0.35355338, %v220_v47 }
 0x208   :  { %5912 = vmatpush3.xpose.msk.msra.mxu1 %vm99_vm10, %v6729_v48  ;;  %5919 = vmatpush3.xpose.msk.msra.mxu0 %vm99_vm10, %v6729_v48 }
 0x209   :  { %5913 = vmatprep.subr.msk.mxu1 %vm99_vm10, %v6736_v53  ;;  %v6752_v56 = vmul.f32 0.35355338, %v215_v52  ;;  %5920 = vmatprep.subr.msk.mxu0 %vm99_vm10, %v6736_v53  ;;  %v387_v60 = vmul.f32 %v6675_v3, %v6746_v54  ;;  %v501_v61 = vmul.f32 %v6677_v4, %v6746_v54  ;;  %v770_v9 = vmul.f32 %v6679_v5, %v6746_v54 }
 0x20b   :  { %v386_v58 = vmul.f32 %v6675_v3, %v6752_v56  ;;  %v500_v59 = vmul.f32 %v6677_v4, %v6752_v56  ;;  %v769_v0 = vmul.f32 %v6679_v5, %v6752_v56 }
 0x20c   :  { %v5910_v57 = vpop.f32.mrf.mxu0  ;;  %5914 = vmatpush3.xpose.msk.msra.mxu1 %vm99_vm10, %v6736_v53  ;;  %5921 = vmatpush3.xpose.msk.msra.mxu0 %vm99_vm10, %v6736_v53 }
 0x20d   :  { %v6768_v62 = vadd.f32 %v5910_v57, %v307_v55  ;;  %5939 = vmatprep.subr.msk.mxu0 %vm99_vm10, %v6729_v48  ;;  %5915 = vmatprep.mubr.msk.f32.mxu1 %vm99_vm10, %v386_v58 }
 0x20e   :  { %v377_v63 = vpop.f32.mrf.mxu0  ;;  %5922 = vmatprep.mubr.msk.f32.mxu0 %vm99_vm10, %v500_v59 }
 0x20f   :  { %v6776_v1 = vadd.f32 %v377_v63, %v307_v55  ;;  %5916 = vmatmul.mubr.msk.f32.vlgmr.msra.gmra.mxu1 %vm99_vm10, %v387_v60  ;;  %5923 = vmatmul.mubr.msk.f32.vlgmr.msra.gmra.mxu0 %vm99_vm10, %v501_v61  ;;  %v606_v2 = vmul.f32 %v6677_v4, %v6768_v62  ;;  %v6791_v8 = vmul.f32 %v6675_v3, %v6768_v62 }
 0x210   :  { %5940 = vmatpush3.xpose.msk.msra.mxu0 %vm99_vm10, %v6729_v48  ;;  %5943 = vmatprep.mubr.msk.f32.mxu0 %vm99_vm10, %v769_v0 }
 0x211   :  { %5925 = vmatprep.subr.mxu1 %v606_v2  ;;  %5941 = vmatprep.subr.msk.mxu0 %vm99_vm10, %v6736_v53  ;;  %v605_v7 = vmul.f32 %v6677_v4, %v6776_v1 }
 0x212   :  { %5926 = vmatpush3.msra.mxu1 %v606_v2 }
 0x213   :  { %5927 = vmatprep.subr.mxu1 %v605_v7 }
 0x214   :  { %5928 = vmatpush3.msra.mxu1 %v605_v7  ;;  %5942 = vmatpush3.xpose.msk.msra.mxu0 %vm99_vm10, %v6736_v53 }
 0x215   :  { %5932 = vmatprep.subr.mxu1 %v6791_v8 }
 0x217   :  { %5944 = vmatmul.mubr.msk.f32.vlgmr.msra.gmra.mxu0 %vm99_vm10, %v770_v9 }
 0x2cf   :  { %v5917_v10 = vpop.f32.mrf.mxu1  ;;  %v5924_v11 = vpop.f32.mrf.mxu0 }
 0x2d0   :  { %v580_v18 = vadd.f32 %v5924_v11, %v6807_v13  ;;  %v472_v22 = vadd.f32 %v5917_v10, %v6807_v13 }
 0x2d1   :  { %v466_v14 = vpop.f32.mrf.mxu1  ;;  %v574_v15 = vpop.f32.mrf.mxu0 }
 0x2d2   :  { %v467_v16 = vadd.f32 %v466_v14, %v6802_v12  ;;  %v575_v17 = vadd.f32 %v574_v15, %v6802_v12  ;;  %v586_v23 = vsel %vm475_vm11, %v580_v18, -inf  ;;  %v479_v31 = vsel %vm475_vm11, %v472_v22, -inf }
 0x2d4   :  { %v583_v19 = vsel %vm475_vm11, %v575_v17, -inf  ;;  %v476_v20 = vsel %vm475_vm11, %v467_v16, -inf }
 0x2d5   :  { %584 = vmax.xlane.f32.xlu1 %v583_v19  ;;  %477 = vmax.xlane.f32.xlu0 %v476_v20 }
 0x2d7   :  { %v5945_v21 = vpop.f32.mrf.mxu0 }
 0x2d8   :  { %v849_v30 = vadd.f32 %v5945_v21, %v6807_v13 }
 0x2d9   :  { %v843_v28 = vpop.f32.mrf.mxu0  ;;  %587 = vmax.xlane.f32.xlu1 %v586_v23 }
 0x2da   :  { %v844_v29 = vadd.f32 %v843_v28, %v6802_v12  ;;  %v855_v35 = vsel %vm475_vm11, %v849_v30, -inf }
 0x2dc   :  { %v852_v32 = vsel %vm475_vm11, %v844_v29, -inf }
 0x2dd   :  { %480 = vmax.xlane.f32.xlu1 %v479_v31  ;;  %853 = vmax.xlane.f32.xlu0 %v852_v32 }
 0x2e1   :  { %856 = vmax.xlane.f32.xlu1 %v855_v35 }
 0x35e   :  { %v585_v36 = vpop.xlane.xlu1 %584  ;;  %v478_v37 = vpop.xlane.xlu0 %477 }
 0x35f   :  { %v589_v38 = vsub.f32 %v575_v17, %v585_v36  ;;  %v482_v39 = vsub.f32 %v467_v16, %v478_v37  ;;  %v498_v36 = vmul.f32 %v6675_v3, %v6776_v1 }
 0x361   :  { %v591_v40 = vmul.f32 1.442695, %v589_v38  ;;  %v484_v43 = vmul.f32 1.442695, %v482_v39  ;;  %v875_v39 = vmul.f32 %v6679_v5, %v6768_v62 }
 0x362   :  { %v588_v44 = vpop.xlane.xlu1 %587 }
 0x363   :  { %6431 = vpow2.f32 %v591_v40  ;;  %v590_v45 = vsub.f32 %v580_v18, %v588_v44  ;;  %v874_v44 = vmul.f32 %v6679_v5, %v6776_v1 }
 0x364   :  { %6433 = vpow2.f32 %v484_v43 }
 0x365   :  { %v593_v46 = vmul.f32 1.442695, %v590_v45 }
 0x366   :  { %v481_v47 = vpop.xlane.xlu1 %480  ;;  %v854_v49 = vpop.xlane.xlu0 %853 }
 0x367   :  { %6435 = vpow2.f32 %v593_v46  ;;  %v483_v50 = vsub.f32 %v472_v22, %v481_v47  ;;  %v858_v52 = vsub.f32 %v844_v29, %v854_v49  ;;  %v959_v46 = vmul.f32 %v6681_v6, %v6752_v56 }
 0x368   :  { %v1065_v47 = vmul.f32 %v6681_v6, %v6768_v62  ;;  %v960_v56 = vmul.f32 %v6681_v6, %v6746_v54 }
 0x369   :  { %v486_v55 = vmul.f32 1.442695, %v483_v50  ;;  %v860_v57 = vmul.f32 1.442695, %v858_v52 }
 0x36a   :  { %v857_v58 = vpop.xlane.xlu1 %856 }
 0x36b   :  { %6437 = vpow2.f32 %v486_v55  ;;  %v859_v59 = vsub.f32 %v849_v30, %v857_v58 }
 0x36c   :  { %6439 = vpow2.f32 %v860_v57 }
 0x36d   :  { %v862_v60 = vmul.f32 1.442695, %v859_v59 }
 0x36f   :  { %6441 = vpow2.f32 %v862_v60 }
 0x370   :  { %v6432_v61 = vpop.eup %6431 }
 0x371   :  { %v595_v63 = vsel %vm475_vm11, %v6432_v61, 0.0  ;;  %v6434_v0 = vpop.eup %6433 }
 0x372   :  { %596 = vadd.xlane.f32.xlu0 %v595_v63  ;;  %v488_v9 = vsel %vm475_vm11, %v6434_v0, 0.0 }
 0x374   :  { %v6436_v2 = vpop.eup %6435 }
 0x375   :  { %v598_v7 = vsel %vm475_vm11, %v6436_v2, 0.0 }
 0x376   :  { %599 = vadd.xlane.f32.xlu1 %v598_v7  ;;  %489 = vadd.xlane.f32.xlu0 %v488_v9 }
 0x378   :  { %v6438_v10 = vpop.eup %6437 }
 0x379   :  { %v6440_v11 = vpop.eup %6439  ;;  %v491_v14 = vsel %vm475_vm11, %v6438_v10, 0.0 }
 0x37a   :  { %492 = vadd.xlane.f32.xlu1 %v491_v14  ;;  %v864_v15 = vsel %vm475_vm11, %v6440_v11, 0.0 }
 0x37b   :  { %865 = vadd.xlane.f32.xlu0 %v864_v15 }
 0x37c   :  { %v6442_v16 = vpop.eup %6441 }
 0x37d   :  { %v867_v17 = vsel %vm475_vm11, %v6442_v16, 0.0 }
 0x37e   :  { %868 = vadd.xlane.f32.xlu1 %v867_v17 }
 0x3fb   :  { %v597_v18 = vpop.xlane.xlu0 %596 }
 0x3fc   :  { %6443 = vrcp.f32 %v597_v18  ;;  %v137_v18 = vld [vmem:[#allocation2 + $0x78] sm:$0xff] }
 0x3fd   :  { %5967 = vmatprep.subr.mxu0 %v137_v18 }
 0x3fe   :  { %5968 = vmatpush3.msra.mxu0 %v137_v18  ;;  %v6902_v18 = vsub.s32 3, %v6684_v24 }
 0x3ff   :  { %v600_v19 = vpop.xlane.xlu1 %599  ;;  %v490_v20 = vpop.xlane.xlu0 %489 }
 0x400   :  { %6445 = vrcp.f32 %v600_v19 }
 0x401   :  { %6447 = vrcp.f32 %v490_v20 }
 0x403   :  { %v493_v21 = vpop.xlane.xlu1 %492 }
 0x404   :  { %6449 = vrcp.f32 %v493_v21  ;;  %v866_v22 = vpop.xlane.xlu0 %865 }
 0x405   :  { %6451 = vrcp.f32 %v866_v22 }
 0x407   :  { %v869_v23 = vpop.xlane.xlu1 %868 }
 0x408   :  { %6453 = vrcp.f32 %v869_v23 }
 0x409   :  { %v6444_v28 = vpop.eup %6443 }
 0x40a   :  { %v603_v29 = vmul.f32 %v6444_v28, %v6432_v61 }
 0x40c   :  { %5929 = vmatprep.mubr.msk.f32.mxu1 %vm475_vm11, %v603_v29  ;;  %v136_v29 = vld [vmem:[#allocation2 + $0x70] sm:$0xff] }
 0x40d   :  { %v6446_v30 = vpop.eup %6445  ;;  %5969 = vmatprep.subr.mxu0 %v136_v29 }
 0x40e   :  { %v6448_v31 = vpop.eup %6447  ;;  %v604_v32 = vmul.f32 %v6446_v30, %v6436_v2  ;;  %5970 = vmatpush3.msra.mxu0 %v136_v29  ;;  %v135_v30 = vld [vmem:[#allocation2 + $0x68] sm:$0xff] }
 0x40f   :  { %v496_v35 = vmul.f32 %v6448_v31, %v6434_v0  ;;  %5971 = vmatprep.subr.mxu0 %v135_v30  ;;  %v134_v31 = vld [vmem:[#allocation2 + $0x60] sm:$0xff] }
 0x410   :  { %5930 = vmatmul.mubr.msk.f32.vlgmr.msra.gmra.mxu1 %vm475_vm11, %v604_v32  ;;  %5972 = vmatpush3.msra.mxu0 %v135_v30 }
 0x411   :  { %v6450_v37 = vpop.eup %6449  ;;  %5933 = vmatpush3.msra.mxu1 %v6791_v8  ;;  %5936 = vmatprep.mubr.msk.f32.mxu1 %vm475_vm11, %v496_v35 }
 0x412   :  { %v6452_v38 = vpop.eup %6451  ;;  %5934 = vmatprep.subr.mxu1 %v498_v36  ;;  %v497_v40 = vmul.f32 %v6450_v37, %v6438_v10  ;;  %5973 = vmatprep.subr.mxu0 %v134_v31 }
 0x413   :  { %5935 = vmatpush3.msra.mxu1 %v498_v36  ;;  %v872_v43 = vmul.f32 %v6452_v38, %v6440_v11  ;;  %5974 = vmatpush3.msra.mxu0 %v134_v31  ;;  %v1152_v38 = vrot.slane %v6734_v51, %v6695_v27 }
 0x414   :  { %5946 = vmatprep.subr.mxu1 %v875_v39  ;;  %5937 = vmatmul.mubr.msk.f32.vlgmr.msra.gmra.mxu1 %vm475_vm11, %v497_v40 }
 0x415   :  { %v6454_v45 = vpop.eup %6453  ;;  %5947 = vmatpush3.msra.mxu1 %v875_v39  ;;  %5950 = vmatprep.mubr.msk.f32.mxu1 %vm475_vm11, %v872_v43 }
 0x416   :  { %5948 = vmatprep.subr.mxu1 %v874_v44  ;;  %v873_v8 = vmul.f32 %v6454_v45, %v6442_v16 }
 0x417   :  { %5949 = vmatpush3.msra.mxu1 %v874_v44 }
 0x418   :  { %5953 = vmatprep.subr.msk.mxu1 %vm99_vm10, %v6729_v48  ;;  %5951 = vmatmul.mubr.msk.f32.vlgmr.msra.gmra.mxu1 %vm475_vm11, %v873_v8 }
 0x419   :  { %5954 = vmatpush3.xpose.msk.msra.mxu1 %vm99_vm10, %v6729_v48  ;;  %5957 = vmatprep.mubr.msk.f32.mxu1 %vm99_vm10, %v959_v46  ;;  %v1064_v48 = vmul.f32 %v6681_v6, %v6776_v1  ;;  %v1285_v46 = vld [vmem:[#allocation2 + $0xb8] sm:$0xff] }
 0x41a   :  { %5955 = vmatprep.subr.msk.mxu1 %vm99_vm10, %v6736_v53  ;;  %5989 = vmatprep.subr.mxu0 %v1285_v46 }
 0x41d   :  { %5956 = vmatpush3.xpose.msk.msra.mxu1 %vm99_vm10, %v6736_v53 }
 0x41e   :  { %5960 = vmatprep.subr.mxu1 %v1065_v47 }
 0x420   :  { %5958 = vmatmul.mubr.msk.f32.vlgmr.msra.gmra.mxu1 %vm99_vm10, %v960_v56  ;;  %v45_v56 = vld [vmem:[%s7747_s1] sm:$0xff] }
 0x421   :  { %5961 = vmatpush3.msra.mxu1 %v1065_v47  ;;  %v1284_v47 = vld [vmem:[#allocation2 + $0xb0] sm:$0xff] }
 0x422   :  { %5962 = vmatprep.subr.mxu1 %v1064_v48 }
 0x423   :  { %5963 = vmatpush3.msra.mxu1 %v1064_v48  ;;  %v1283_v48 = vld [vmem:[#allocation2 + $0xa8] sm:$0xff] }
 0x4d0   :  { %v5931_v49 = vpop.f32.mrf.mxu1 }
 0x4d2   :  { %v679_v50 = vpop.f32.mrf.mxu1 }
 0x4d4   :  { %v5938_v52 = vpop.f32.mrf.mxu1 }
 0x4d5   :  { %v766_v55 = vadd.f32 %v5938_v52, %v5931_v49  ;;  %v1282_v49 = vld [vmem:[#allocation2 + $0xa0] sm:$0xff] }
 0x4d6   :  { %v760_v62 = vpop.f32.mrf.mxu1 }
 0x4d7   :  { %v761_v57 = vadd.f32 %v760_v62, %v679_v50  ;;  %v46_v50 = vld [vmem:[%s7747_s1 + $0x8] sm:$0xff] }
 0x4d8   :  { %v5952_v58 = vpop.f32.mrf.mxu1 }
 0x4d9   :  { %v958_v53 = vadd.f32 %v5952_v58, %v766_v55 }
 0x4da   :  { %v948_v59 = vpop.f32.mrf.mxu1 }
 0x4db   :  { %v957_v60 = vadd.f32 %v948_v59, %v761_v57 }
 0x4e0   :  { %v5959_v54 = vpop.f32.mrf.mxu1 }
 0x4e1   :  { %v1039_v61 = vadd.f32 %v5959_v54, %v6807_v13 }
 0x4e2   :  { %v1033_v63 = vpop.f32.mrf.mxu1 }
 0x4e3   :  { %v1034_v0 = vadd.f32 %v1033_v63, %v6802_v12  ;;  %v1045_v1 = vsel %vm475_vm11, %v1039_v61, -inf  ;;  %v47_v63 = vld [vmem:[%s7747_s1 + $0x10] sm:$0xff] }
 0x4e4   :  { %1046 = vmax.xlane.f32.xlu1 %v1045_v1  ;;  %v1280_v1 = vld [vmem:[#allocation2 + $0x98] sm:$0xff] }
 0x4e5   :  { %v1042_v2 = vsel %vm475_vm11, %v1034_v0, -inf  ;;  %5978 = vmatprep.subr.mxu1 %v1280_v1 }
 0x4e6   :  { %1043 = vmax.xlane.f32.xlu0 %v1042_v2  ;;  %v1279_v2 = vld [vmem:[#allocation2 + $0x90] sm:$0xff] }
 0x56d   :  { %v1047_v7 = vpop.xlane.xlu1 %1046 }
 0x56e   :  { %v1049_v9 = vsub.f32 %v1039_v61, %v1047_v7  ;;  %v1278_v7 = vld [vmem:[#allocation2 + $0x88] sm:$0xff] }
 0x56f   :  { %v1044_v10 = vpop.xlane.xlu0 %1043 }
 0x570   :  { %v1052_v11 = vmul.f32 1.442695, %v1049_v9  ;;  %v1048_v14 = vsub.f32 %v1034_v0, %v1044_v10  ;;  %v48_v0 = vld [vmem:[%s7747_s1 + $0x18] sm:$0xff]  ;;  %v1277_v9 = vld [vmem:[#allocation2 + $0x80] sm:$0xff] }
 0x571   :  { %v1290_v10 = vld [vmem:[#allocation2 + $0xd8] sm:$0xff] }
 0x572   :  { %6455 = vpow2.f32 %v1052_v11  ;;  %v1050_v15 = vmul.f32 1.442695, %v1048_v14 }
 0x574   :  { %6457 = vpow2.f32 %v1050_v15 }
 0x57f   :  { %v6456_v16 = vpop.eup %6455 }
 0x580   :  { %v1057_v13 = vsel %vm475_vm11, %v6456_v16, 0.0 }
 0x581   :  { %v6458_v17 = vpop.eup %6457  ;;  %1058 = vadd.xlane.f32.xlu1 %v1057_v13 }
 0x582   :  { %v1054_v12 = vsel %vm475_vm11, %v6458_v17, 0.0 }
 0x583   :  { %1055 = vadd.xlane.f32.xlu0 %v1054_v12  ;;  %v6899_v12 = vsub.s32 2, %v6684_v24 }
 0x60a   :  { %v1059_v19 = vpop.xlane.xlu1 %1058 }
 0x60b   :  { %6459 = vrcp.f32 %v1059_v19  ;;  %v1265_v19 = vrot.slane %v6692_v26, %v6899_v12 }
 0x60c   :  { %v1056_v20 = vpop.xlane.xlu0 %1055 }
 0x60d   :  { %6461 = vrcp.f32 %v1056_v20 }
 0x618   :  { %v6460_v21 = vpop.eup %6459 }
 0x619   :  { %v1063_v28 = vmul.f32 %v6460_v21, %v6456_v16 }
 0x61a   :  { %v6462_v22 = vpop.eup %6461 }
 0x61b   :  { %v1062_v23 = vmul.f32 %v6462_v22, %v6458_v17 }
 0x61d   :  { %5964 = vmatprep.mubr.msk.f32.mxu1 %vm475_vm11, %v1062_v23  ;;  %v1271_v23 = vrot.slane %v6692_v26, %v6902_v18  ;;  %v1288_v26 = vld [vmem:[#allocation2 + $0xc8] sm:$0xff] }
 0x61e   :  { %5965 = vmatmul.mubr.msk.f32.vlgmr.msra.gmra.mxu1 %vm475_vm11, %v1063_v28 }
 0x61f   :  { %5979 = vmatpush3.msra.mxu1 %v1280_v1 }
 0x620   :  { %5980 = vmatprep.subr.mxu1 %v1279_v2 }
 0x621   :  { %5981 = vmatpush3.msra.mxu1 %v1279_v2 }
 0x622   :  { %5982 = vmatprep.subr.mxu1 %v1278_v7 }
 0x623   :  { %5983 = vmatpush3.msra.mxu1 %v1278_v7 }
 0x624   :  { %5984 = vmatprep.subr.mxu1 %v1277_v9 }
 0x625   :  { %5985 = vmatpush3.msra.mxu1 %v1277_v9 }
 0x626   :  { %6003 = vmatprep.subr.mxu1 %v1290_v10 }
 0x6de   :  { %v5966_v32 = vpop.f32.mrf.mxu1 }
 0x6df   :  { %v1148_v37 = vadd.f32 %v5966_v32, %v958_v53 }
 0x6e0   :  { %v1138_v35 = vpop.f32.mrf.mxu1 }
 0x6e1   :  { %v1147_v36 = vadd.f32 %v1138_v35, %v957_v60 }
 0x6e3   :  { %5975 = vmatprep.mubr.msk.f32.mxu0 %vm99_vm10, %v1147_v36 }
 0x6e4   :  { %5976 = vmatmul.mubr.msk.f32.vlgmr.msra.gmra.mxu0 %vm99_vm10, %v1148_v37  ;;  %v49_v37 = vld [vmem:[%s7747_s1 + $0x20] sm:$0xff] }
 0x6e5   :  { %5990 = vmatpush3.msra.mxu0 %v1285_v46  ;;  %5997 = vmatprep.mubr.msk.f32.mxu0 %vm99_vm10, %v45_v56  ;;  %v1386_v46 = vrot.slane %v6734_v51, %v6902_v18 }
 0x6e6   :  { %5991 = vmatprep.subr.mxu0 %v1284_v47 }
 0x6e7   :  { %5992 = vmatpush3.msra.mxu0 %v1284_v47 }
 0x6e8   :  { %5993 = vmatprep.subr.mxu0 %v1283_v48 }
 0x6e9   :  { %5994 = vmatpush3.msra.mxu0 %v1283_v48 }
 0x6ea   :  { %5995 = vmatprep.subr.mxu0 %v1282_v49 }
 0x6eb   :  { %5996 = vmatpush3.msra.mxu0 %v1282_v49 }
 0x6ec   :  { %5998 = vmatmul.mubr.msk.f32.vlgmr.msra.gmra.mxu0 %vm99_vm10, %v46_v50 }
 0x6ed   :  { %6000 = vmatprep.mubr.msk.f32.mxu0 %vm99_vm10, %v47_v63 }
 0x6f0   :  { %6001 = vmatmul.mubr.msk.f32.gmra.mxu0 %vm99_vm10, %v48_v0 }
 0x7a4   :  { %v5977_v39 = vpop.f32.mrf.mxu0 }
 0x7a5   :  { %v6870_v40 = vadd.f32 %v5977_v39, %v1152_v38  ;;  %v1287_v39 = vld [vmem:[#allocation2 + $0xc0] sm:$0xff] }
 0x7a6   :  { %v1225_v43 = vpop.f32.mrf.mxu0 }
 0x7a7   :  { %v6872_v44 = vadd.f32 %v1225_v43, %v1152_v38  ;;  %v1239_v45 = vsel %vm99_vm10, %v6870_v40, 0.0  ;;  %v1289_v38 = vld [vmem:[#allocation2 + $0xd0] sm:$0xff]  ;;  %v52_v43 = vld [vmem:[%s7747_s1 + $0x38] sm:$0xff] }
 0x7a8   :  { %1240 = vadd.xlane.f32.xlu1 %v1239_v45 }
 0x7a9   :  { %v1236_v8 = vsel %vm99_vm10, %v6872_v44, 0.0 }
 0x7aa   :  { %1237 = vadd.xlane.f32.xlu0 %v1236_v8 }
 0x7ac   :  { %v5999_v45 = vpop.f32.mrf.mxu0 }
 0x7ad   :  { %v6942_v50 = vadd.f32 %v5999_v45, %v1386_v46 }
 0x7ae   :  { %v1465_v8 = vpop.f32.mrf.mxu0 }
 0x7b0   :  { %v6002_v47 = vpop.f32.mrf.mxu0 }
 0x7b1   :  { %v6930_v56 = vadd.f32 %v6002_v47, %v1386_v46 }
 0x7b2   :  { %v1475_v48 = vpop.f32.mrf.mxu0 }
 0x7b3   :  { %6017 = vmatprep.subr.msk.mxu0 %vm99_vm10, %v6930_v56  ;;  %v6936_v49 = vadd.f32 %v1475_v48, %v1386_v46 }
 0x7b4   :  { %6018 = vmatpush3.xpose.msk.msra.mxu0 %vm99_vm10, %v6930_v56 }
 0x7b5   :  { %6019 = vmatprep.subr.msk.mxu0 %vm99_vm10, %v6936_v49 }
 0x7b8   :  { %6020 = vmatpush3.xpose.msk.msra.mxu0 %vm99_vm10, %v6936_v49 }
 0x7b9   :  { %6021 = vmatprep.subr.msk.mxu0 %vm99_vm10, %v6942_v50 }
 0x7bc   :  { %6022 = vmatpush3.xpose.msk.msra.mxu0 %vm99_vm10, %v6942_v50 }
 0x831   :  { %v1241_v52 = vpop.xlane.xlu1 %1240 }
 0x832   :  { %v1243_v55 = vmul.f32 0.03125, %v1241_v52  ;;  %v6952_v52 = vadd.f32 %v1465_v8, %v1386_v46 }
 0x833   :  { %v1238_v62 = vpop.xlane.xlu0 %1237 }
 0x834   :  { %v1245_v57 = vsub.f32 %v6870_v40, %v1243_v55  ;;  %v1242_v58 = vmul.f32 0.03125, %v1238_v62  ;;  %6023 = vmatprep.subr.msk.mxu0 %vm99_vm10, %v6952_v52  ;;  %v1299_v55 = vrot.slane %v6734_v51, %v6899_v12 }
 0x835   :  { %6024 = vmatpush3.xpose.msk.msra.mxu0 %vm99_vm10, %v6952_v52 }
 0x836   :  { %v1244_v53 = vsub.f32 %v6872_v44, %v1242_v58  ;;  %v1247_v59 = vmul.f32 %v1245_v57, %v1245_v57 }
 0x838   :  { %v1251_v60 = vsel %vm99_vm10, %v1247_v59, 0.0  ;;  %v1246_v54 = vmul.f32 %v1244_v53, %v1244_v53 }
 0x839   :  { %1252 = vadd.xlane.f32.xlu1 %v1251_v60  ;;  %v6975_v60 = vsub.s32 4, %v6684_v24 }
 0x83a   :  { %v1248_v61 = vsel %vm99_vm10, %v1246_v54, 0.0 }
 0x83b   :  { %1249 = vadd.xlane.f32.xlu0 %v1248_v61  ;;  %v1487_v7 = vrot.slane %v6734_v51, %v6975_v60 }
 0x8c2   :  { %v1253_v11 = vpop.xlane.xlu1 %1252 }
 0x8c3   :  { %v1255_v14 = vmul.f32 0.03125, %v1253_v11 }
 0x8c4   :  { %v1250_v15 = vpop.xlane.xlu0 %1249 }
 0x8c5   :  { %v1257_v16 = vadd.f32 1e-05, %v1255_v14  ;;  %v1254_v13 = vmul.f32 0.03125, %v1250_v15 }
 0x8c7   :  { %6463 = vrsqrt.f32 %v1257_v16  ;;  %v1256_v17 = vadd.f32 1e-05, %v1254_v13 }
 0x8c9   :  { %6465 = vrsqrt.f32 %v1256_v17 }
 0x8d4   :  { %v6464_v20 = vpop.eup %6463 }
 0x8d5   :  { %v1261_v21 = vmul.f32 %v6464_v20, %v1245_v57 }
 0x8d6   :  { %v6466_v22 = vpop.eup %6465 }
 0x8d7   :  { %v1260_v28 = vmul.f32 %v6466_v22, %v1244_v53  ;;  %v1267_v29 = vmul.f32 %v1265_v19, %v1261_v21 }
 0x8d9   :  { %v1266_v30 = vmul.f32 %v1265_v19, %v1260_v28  ;;  %v1273_v31 = vadd.f32 %v1271_v23, %v1267_v29 }
 0x8db   :  { %v1272_v32 = vadd.f32 %v1271_v23, %v1266_v30  ;;  %v1275_v36 = vadd.f32 %v1273_v31, %v6709_v34  ;;  %v51_v34 = vld [vmem:[%s7747_s1 + $0x30] sm:$0xff]  ;;  %v7027_v30 = vld [vmem:[%s7749_s3 + $0x8] sm:$0xff] }
 0x8dd   :  { %v1274_v35 = vadd.f32 %v1272_v32, %v6704_v33  ;;  %v50_v33 = vld [vmem:[%s7747_s1 + $0x28] sm:$0xff]  ;;  %v7032_v32 = vld [vmem:[%s7749_s3] sm:$0xff] }
 0x8df   :  { %5986 = vmatprep.mubr.msk.f32.mxu1 %vm99_vm10, %v1274_v35 }
 0x8e0   :  { %5987 = vmatmul.mubr.msk.f32.vlgmr.msra.gmra.mxu1 %vm99_vm10, %v1275_v36 }
 0x8e1   :  { %6004 = vmatpush3.msra.mxu1 %v1290_v10  ;;  %6011 = vmatprep.mubr.msk.f32.mxu1 %vm99_vm10, %v49_v37 }
 0x8e2   :  { %6005 = vmatprep.subr.mxu1 %v1289_v38 }
 0x8e3   :  { %6006 = vmatpush3.msra.mxu1 %v1289_v38 }
 0x8e4   :  { %6007 = vmatprep.subr.mxu1 %v1288_v26 }
 0x8e5   :  { %6008 = vmatpush3.msra.mxu1 %v1288_v26 }
 0x8e6   :  { %6009 = vmatprep.subr.mxu1 %v1287_v39 }
 0x8e7   :  { %6010 = vmatpush3.msra.mxu1 %v1287_v39 }
 0x8e8   :  { %6012 = vmatmul.mubr.msk.f32.vlgmr.msra.gmra.mxu1 %vm99_vm10, %v50_v33  ;;  %6028 = vmatprep.subr.msk.mxu1 %vm99_vm10, %v6930_v56 }
 0x8e9   :  { %6014 = vmatprep.mubr.msk.f32.mxu1 %vm99_vm10, %v51_v34  ;;  %6029 = vmatpush3.xpose.msk.msra.mxu1 %vm99_vm10, %v6930_v56 }
 0x8ea   :  { %6030 = vmatprep.subr.msk.mxu1 %vm99_vm10, %v6936_v49 }
 0x8ec   :  { %6015 = vmatmul.mubr.msk.f32.gmra.mxu1 %vm99_vm10, %v52_v43 }
 0x8ed   :  { %6031 = vmatpush3.xpose.msk.msra.mxu1 %vm99_vm10, %v6936_v49 }
 0x8ee   :  { %6032 = vmatprep.subr.msk.mxu1 %vm99_vm10, %v6942_v50 }
 0x8f1   :  { %6033 = vmatpush3.xpose.msk.msra.mxu1 %vm99_vm10, %v6942_v50 }
 0x8f2   :  { %6034 = vmatprep.subr.msk.mxu1 %vm99_vm10, %v6952_v52 }
 0x8f5   :  { %6035 = vmatpush3.xpose.msk.msra.mxu1 %vm99_vm10, %v6952_v52 }
 0x9a0   :  { %v5988_v62 = vpop.f32.mrf.mxu1 }
 0x9a1   :  { %v1378_v57 = vadd.f32 %v5988_v62, %v1299_v55 }
 0x9a2   :  { %v1372_v58 = vpop.f32.mrf.mxu1 }
 0x9a3   :  { %v1373_v53 = vadd.f32 %v1372_v58, %v1299_v55  ;;  %v6972_v59 = vmul.f32 0.35355338, %v1378_v57 }
 0x9a5   :  { %v6977_v54 = vmul.f32 0.35355338, %v1373_v53  ;;  %v1586_v1 = vmul.f32 %v6675_v3, %v6972_v59  ;;  %v1707_v2 = vmul.f32 %v6677_v4, %v6972_v59 }
 0x9a7   :  { %v1585_v63 = vmul.f32 %v6675_v3, %v6977_v54  ;;  %v1706_v0 = vmul.f32 %v6677_v4, %v6977_v54 }
 0x9a8   :  { %v6013_v61 = vpop.f32.mrf.mxu1 }
 0x9a9   :  { %6025 = vmatprep.mubr.msk.f32.mxu0 %vm99_vm10, %v1585_v63  ;;  %6036 = vmatprep.mubr.msk.f32.mxu1 %vm99_vm10, %v1706_v0  ;;  %v6993_v10 = vadd.f32 %v6013_v61, %v1487_v7 }
 0x9aa   :  { %v1566_v9 = vpop.f32.mrf.mxu1  ;;  %6026 = vmatmul.mubr.msk.f32.vlgmr.msra.gmra.mxu0 %vm99_vm10, %v1586_v1  ;;  %6037 = vmatmul.mubr.msk.f32.vlgmr.msra.gmra.mxu1 %vm99_vm10, %v1707_v2 }
 0x9ab   :  { %v6997_v16 = vadd.f32 %v1566_v9, %v1487_v7  ;;  %v1812_v19 = vmul.f32 %v6677_v4, %v6993_v10  ;;  %v1703_v22 = vmul.f32 %v6675_v3, %v6993_v10 }
 0x9ac   :  { %v6016_v11 = vpop.f32.mrf.mxu1 }
 0x9ad   :  { %v6995_v14 = vadd.f32 %v6016_v11, %v1487_v7  ;;  %v1811_v23 = vmul.f32 %v6677_v4, %v6997_v16  ;;  %v1702_v28 = vmul.f32 %v6675_v3, %v6997_v16 }
 0x9ae   :  { %v1576_v15 = vpop.f32.mrf.mxu1 }
 0x9af   :  { %v6999_v13 = vadd.f32 %v1576_v15, %v1487_v7  ;;  %v1814_v51 = vmul.f32 %v6677_v4, %v6995_v14  ;;  %v1705_v17 = vmul.f32 %v6675_v3, %v6995_v14  ;;  %v7021_v29 = vmul.f32 %v6679_v5, %v6995_v14 }
 0x9b0   :  { %v1977_v15 = vmul.f32 %v6679_v5, %v6977_v54 }
 0x9b1   :  { %6039 = vmatprep.subr.mxu0 %v1814_v51  ;;  %v1813_v20 = vmul.f32 %v6677_v4, %v6999_v13  ;;  %6050 = vmatprep.subr.mxu1 %v1705_v17  ;;  %v1704_v21 = vmul.f32 %v6675_v3, %v6999_v13 }
 0x9b2   :  { %6040 = vmatpush3.msra.mxu0 %v1814_v51  ;;  %6051 = vmatpush3.msra.mxu1 %v1705_v17  ;;  %v2277_v51 = vmul.f32 %v6681_v6, %v6995_v14  ;;  %v1978_v17 = vmul.f32 %v6679_v5, %v6972_v59  ;;  %v2274_v14 = vmul.f32 %v6681_v6, %v6997_v16 }
 0x9b3   :  { %6041 = vmatprep.subr.mxu0 %v1813_v20  ;;  %6052 = vmatprep.subr.mxu1 %v1704_v21 }
 0x9b4   :  { %6042 = vmatpush3.msra.mxu0 %v1813_v20  ;;  %6053 = vmatpush3.msra.mxu1 %v1704_v21  ;;  %v2275_v20 = vmul.f32 %v6681_v6, %v6993_v10 }
 0x9b5   :  { %6043 = vmatprep.subr.mxu0 %v1812_v19  ;;  %6054 = vmatprep.subr.mxu1 %v1703_v22 }
 0x9b6   :  { %6044 = vmatpush3.msra.mxu0 %v1812_v19  ;;  %6055 = vmatpush3.msra.mxu1 %v1703_v22  ;;  %v2276_v19 = vmul.f32 %v6681_v6, %v6999_v13 }
 0x9b7   :  { %6045 = vmatprep.subr.mxu0 %v1811_v23  ;;  %6056 = vmatprep.subr.mxu1 %v1702_v28 }
 0x9b8   :  { %6046 = vmatpush3.msra.mxu0 %v1811_v23  ;;  %6057 = vmatpush3.msra.mxu1 %v1702_v28 }
 0x9b9   :  { %6061 = vmatprep.subr.msk.mxu0 %vm99_vm10, %v6930_v56  ;;  %6072 = vmatprep.subr.mxu1 %v7021_v29 }
 0xa6a   :  { %v6038_v31 = vpop.f32.mrf.mxu1  ;;  %v6027_v46 = vpop.f32.mrf.mxu0 }
 0xa6b   :  { %v1786_v35 = vadd.f32 %v6038_v31, %v7027_v30  ;;  %v1677_v55 = vadd.f32 %v6027_v46, %v7027_v30 }
 0xa6c   :  { %v1780_v36 = vpop.f32.mrf.mxu1  ;;  %v1671_v48 = vpop.f32.mrf.mxu0 }
 0xa6d   :  { %v1781_v37 = vadd.f32 %v1780_v36, %v7032_v32  ;;  %v1792_v38 = vsel %vm99_vm10, %v1786_v35, -inf  ;;  %v1672_v58 = vadd.f32 %v1671_v48, %v7032_v32  ;;  %v1683_v61 = vsel %vm99_vm10, %v1677_v55, -inf }
 0xa6e   :  { %1793 = vmax.xlane.f32.xlu1 %v1792_v38 }
 0xa6f   :  { %v1789_v26 = vsel %vm99_vm10, %v1781_v37, -inf  ;;  %v1680_v63 = vsel %vm99_vm10, %v1672_v58, -inf }
 0xa70   :  { %1790 = vmax.xlane.f32.xlu0 %v1789_v26 }
 0xaf7   :  { %v1794_v39 = vpop.xlane.xlu1 %1793 }
 0xaf8   :  { %v1796_v33 = vsub.f32 %v1786_v35, %v1794_v39 }
 0xaf9   :  { %v1791_v34 = vpop.xlane.xlu0 %1790 }
 0xafa   :  { %v1799_v43 = vmul.f32 1.442695, %v1796_v33  ;;  %v1795_v45 = vsub.f32 %v1781_v37, %v1791_v34 }
 0xafc   :  { %6467 = vpow2.f32 %v1799_v43  ;;  %v1797_v8 = vmul.f32 1.442695, %v1795_v45 }
 0xafe   :  { %6469 = vpow2.f32 %v1797_v8 }
 0xb09   :  { %v6468_v47 = vpop.eup %6467 }
 0xb0a   :  { %v1804_v62 = vsel %vm99_vm10, %v6468_v47, 0.0 }
 0xb0b   :  { %v6470_v57 = vpop.eup %6469  ;;  %1805 = vadd.xlane.f32.xlu1 %v1804_v62 }
 0xb0c   :  { %v1801_v53 = vsel %vm99_vm10, %v6470_v57, 0.0 }
 0xb0d   :  { %1802 = vadd.xlane.f32.xlu0 %v1801_v53 }
 0xb0f   :  { %1684 = vmax.xlane.f32.xlu1 %v1683_v61 }
 0xb11   :  { %1681 = vmax.xlane.f32.xlu0 %v1680_v63 }
 0xb94   :  { %v1806_v0 = vpop.xlane.xlu1 %1805 }
 0xb95   :  { %6471 = vrcp.f32 %v1806_v0 }
 0xb96   :  { %v1803_v1 = vpop.xlane.xlu0 %1802 }
 0xb97   :  { %6473 = vrcp.f32 %v1803_v1 }
 0xb98   :  { %v1685_v21 = vpop.xlane.xlu1 %1684 }
 0xb99   :  { %v1687_v23 = vsub.f32 %v1677_v55, %v1685_v21 }
 0xb9a   :  { %v1682_v22 = vpop.xlane.xlu0 %1681 }
 0xb9b   :  { %v1686_v28 = vsub.f32 %v1672_v58, %v1682_v22  ;;  %v1690_v31 = vmul.f32 1.442695, %v1687_v23 }
 0xb9d   :  { %v1688_v35 = vmul.f32 1.442695, %v1686_v28  ;;  %6475 = vpow2.f32 %v1690_v31 }
 0xb9f   :  { %6477 = vpow2.f32 %v1688_v35 }
 0xba2   :  { %v6472_v2 = vpop.eup %6471 }
 0xba3   :  { %v1810_v11 = vmul.f32 %v6472_v2, %v6468_v47 }
 0xba4   :  { %v6474_v7 = vpop.eup %6473 }
 0xba5   :  { %v1809_v9 = vmul.f32 %v6474_v7, %v6470_v57 }
 0xba7   :  { %6047 = vmatprep.mubr.msk.f32.mxu0 %vm99_vm10, %v1809_v9 }
 0xba8   :  { %6048 = vmatmul.mubr.msk.f32.vlgmr.msra.gmra.mxu0 %vm99_vm10, %v1810_v11 }
 0xba9   :  { %6062 = vmatpush3.xpose.msk.msra.mxu0 %vm99_vm10, %v6930_v56  ;;  %6069 = vmatprep.mubr.msk.f32.mxu0 %vm99_vm10, %v1977_v15 }
 0xbaa   :  { %6063 = vmatprep.subr.msk.mxu0 %vm99_vm10, %v6936_v49  ;;  %v6476_v43 = vpop.eup %6475 }
 0xbab   :  { %v1695_v46 = vsel %vm99_vm10, %v6476_v43, 0.0 }
 0xbac   :  { %v6478_v8 = vpop.eup %6477 }
 0xbad   :  { %6064 = vmatpush3.xpose.msk.msra.mxu0 %vm99_vm10, %v6936_v49  ;;  %v1692_v47 = vsel %vm99_vm10, %v6478_v8, 0.0 }
 0xbae   :  { %6065 = vmatprep.subr.msk.mxu0 %vm99_vm10, %v6942_v50 }
 0xbb1   :  { %6066 = vmatpush3.xpose.msk.msra.mxu0 %vm99_vm10, %v6942_v50 }
 0xbb2   :  { %6067 = vmatprep.subr.msk.mxu0 %vm99_vm10, %v6952_v52 }
 0xbb5   :  { %6068 = vmatpush3.xpose.msk.msra.mxu0 %vm99_vm10, %v6952_v52 }
 0xbb6   :  { %6094 = vmatprep.subr.mxu0 %v2277_v51 }
 0xbb8   :  { %6070 = vmatmul.mubr.msk.f32.vlgmr.msra.gmra.mxu0 %vm99_vm10, %v1978_v17  ;;  %v2084_v17 = vmul.f32 %v6679_v5, %v6999_v13 }
 0xbb9   :  { %6095 = vmatpush3.msra.mxu0 %v2277_v51 }
 0xbba   :  { %6096 = vmatprep.subr.mxu0 %v2276_v19 }
 0xbbb   :  { %6097 = vmatpush3.msra.mxu0 %v2276_v19  ;;  %v2083_v19 = vmul.f32 %v6679_v5, %v6993_v10  ;;  %v2169_v10 = vmul.f32 %v6681_v6, %v6977_v54 }
 0xbbc   :  { %6098 = vmatprep.subr.mxu0 %v2275_v20 }
 0xbbd   :  { %6099 = vmatpush3.msra.mxu0 %v2275_v20  ;;  %v2082_v20 = vmul.f32 %v6679_v5, %v6997_v16 }
 0xbbe   :  { %6100 = vmatprep.subr.mxu0 %v2274_v14 }
 0xbbf   :  { %6101 = vmatpush3.msra.mxu0 %v2274_v14 }
 0xc68   :  { %v7074_v36 = vpop.f32.mrf.mxu0 }
 0xc6a   :  { %v7076_v37 = vpop.f32.mrf.mxu0 }
 0xc78   :  { %v6071_v38 = vpop.f32.mrf.mxu0 }
 0xc79   :  { %v2057_v26 = vadd.f32 %v6071_v38, %v7027_v30 }
 0xc7a   :  { %v2051_v39 = vpop.f32.mrf.mxu0 }
 0xc7b   :  { %v2052_v33 = vadd.f32 %v2051_v39, %v7032_v32  ;;  %v2063_v34 = vsel %vm99_vm10, %v2057_v26, -inf }
 0xc7c   :  { %2064 = vmax.xlane.f32.xlu1 %v2063_v34 }
 0xc7d   :  { %v2060_v45 = vsel %vm99_vm10, %v2052_v33, -inf }
 0xc7e   :  { %2061 = vmax.xlane.f32.xlu0 %v2060_v45 }
 0xc80   :  { %1696 = vadd.xlane.f32.xlu1 %v1695_v46 }
 0xc82   :  { %1693 = vadd.xlane.f32.xlu0 %v1692_v47 }
 0xd05   :  { %v2065_v48 = vpop.xlane.xlu1 %2064 }
 0xd06   :  { %v2067_v55 = vsub.f32 %v2057_v26, %v2065_v48  ;;  %v1295_v48 = vld [vmem:[#allocation2 + $0xf8] sm:$0xff] }
 0xd07   :  { %v2062_v62 = vpop.xlane.xlu0 %2061  ;;  %6105 = vmatprep.subr.mxu0 %v1295_v48 }
 0xd08   :  { %v2070_v57 = vmul.f32 1.442695, %v2067_v55  ;;  %v2066_v58 = vsub.f32 %v2052_v33, %v2062_v62 }
 0xd09   :  { %v1697_v53 = vpop.xlane.xlu1 %1696 }
 0xd0a   :  { %6479 = vpow2.f32 %v2070_v57  ;;  %v2068_v61 = vmul.f32 1.442695, %v2066_v58 }
 0xd0b   :  { %6481 = vrcp.f32 %v1697_v53  ;;  %v1694_v63 = vpop.xlane.xlu0 %1693 }
 0xd0c   :  { %6483 = vpow2.f32 %v2068_v61 }
 0xd0d   :  { %6485 = vrcp.f32 %v1694_v63  ;;  %v1294_v63 = vld [vmem:[#allocation2 + $0xf0] sm:$0xff] }
 0xd17   :  { %v6480_v0 = vpop.eup %6479 }
 0xd18   :  { %v6482_v1 = vpop.eup %6481  ;;  %v2075_v2 = vsel %vm99_vm10, %v6480_v0, 0.0 }
 0xd19   :  { %v6484_v7 = vpop.eup %6483  ;;  %2076 = vadd.xlane.f32.xlu1 %v2075_v2  ;;  %v1701_v51 = vmul.f32 %v6482_v1, %v6476_v43  ;;  %v1292_v1 = vld [vmem:[#allocation2 + $0xe0] sm:$0xff] }
 0xd1a   :  { %v6486_v9 = vpop.eup %6485  ;;  %v2072_v11 = vsel %vm99_vm10, %v6484_v7, 0.0 }
 0xd1b   :  { %2073 = vadd.xlane.f32.xlu0 %v2072_v11  ;;  %v1700_v15 = vmul.f32 %v6486_v9, %v6478_v8 }
 0xd1d   :  { %6058 = vmatprep.mubr.msk.f32.mxu1 %vm99_vm10, %v1700_v15 }
 0xd1e   :  { %6059 = vmatmul.mubr.msk.f32.vlgmr.msra.gmra.mxu1 %vm99_vm10, %v1701_v51 }
 0xd1f   :  { %6073 = vmatpush3.msra.mxu1 %v7021_v29 }
 0xd20   :  { %6074 = vmatprep.subr.mxu1 %v2084_v17 }
 0xd21   :  { %6075 = vmatpush3.msra.mxu1 %v2084_v17  ;;  %v7132_v17 = vsub.s32 5, %v6684_v24 }
 0xd22   :  { %6076 = vmatprep.subr.mxu1 %v2083_v19 }
 0xd23   :  { %6077 = vmatpush3.msra.mxu1 %v2083_v19  ;;  %v7137_v19 = vld [vmem:[%s7752_s6 + $0x8] sm:$0xff] }
 0xd24   :  { %6078 = vmatprep.subr.mxu1 %v2082_v20 }
 0xd25   :  { %6079 = vmatpush3.msra.mxu1 %v2082_v20 }
 0xd26   :  { %6083 = vmatprep.subr.msk.mxu1 %vm99_vm10, %v6930_v56 }
 0xda2   :  { %v2077_v14 = vpop.xlane.xlu1 %2076 }
 0xda3   :  { %6487 = vrcp.f32 %v2077_v14 }
 0xda4   :  { %v2074_v13 = vpop.xlane.xlu0 %2073 }
 0xda5   :  { %6489 = vrcp.f32 %v2074_v13 }
 0xdb0   :  { %v6488_v29 = vpop.eup %6487 }
 0xdb1   :  { %v2081_v23 = vmul.f32 %v6488_v29, %v6480_v0  ;;  %v1293_v0 = vld [vmem:[#allocation2 + $0xe8] sm:$0xff] }
 0xdb2   :  { %v6490_v21 = vpop.eup %6489 }
 0xdb3   :  { %v2080_v22 = vmul.f32 %v6490_v21, %v6484_v7 }
 0xdb5   :  { %6080 = vmatprep.mubr.msk.f32.mxu1 %vm99_vm10, %v2080_v22 }
 0xdb6   :  { %6081 = vmatmul.mubr.msk.f32.vlgmr.msra.gmra.mxu1 %vm99_vm10, %v2081_v23 }
 0xdb7   :  { %6084 = vmatpush3.xpose.msk.msra.mxu1 %vm99_vm10, %v6930_v56  ;;  %6091 = vmatprep.mubr.msk.f32.mxu1 %vm99_vm10, %v2169_v10  ;;  %v2170_v56 = vmul.f32 %v6681_v6, %v6972_v59 }
 0xdb8   :  { %6085 = vmatprep.subr.msk.mxu1 %vm99_vm10, %v6936_v49 }
 0xdbb   :  { %6086 = vmatpush3.xpose.msk.msra.mxu1 %vm99_vm10, %v6936_v49 }
 0xdbc   :  { %6087 = vmatprep.subr.msk.mxu1 %vm99_vm10, %v6942_v50 }
 0xdbf   :  { %6088 = vmatpush3.xpose.msk.msra.mxu1 %vm99_vm10, %v6942_v50 }
 0xdc0   :  { %6089 = vmatprep.subr.msk.mxu1 %vm99_vm10, %v6952_v52 }
 0xdc3   :  { %6090 = vmatpush3.xpose.msk.msra.mxu1 %vm99_vm10, %v6952_v52 }
 0xdc6   :  { %6092 = vmatmul.mubr.msk.f32.vlgmr.msra.gmra.mxu1 %vm99_vm10, %v2170_v56 }
 0xdde   :  { %v6060_v54 = vpop.f32.mrf.mxu1 }
 0xddf   :  { %v1974_v49 = vadd.f32 %v6060_v54, %v7074_v36 }
 0xde0   :  { %v1968_v16 = vpop.f32.mrf.mxu1 }
 0xde1   :  { %v1969_v2 = vadd.f32 %v1968_v16, %v7076_v37  ;;  %v2364_v37 = vrot.slane %v7137_v19, %v7132_v17 }
 0xe76   :  { %v6082_v28 = vpop.f32.mrf.mxu1 }
 0xe77   :  { %v2168_v31 = vadd.f32 %v6082_v28, %v1974_v49 }
 0xe78   :  { %v2158_v35 = vpop.f32.mrf.mxu1 }
 0xe79   :  { %v2167_v9 = vadd.f32 %v2158_v35, %v1969_v2  ;;  %v87_v2 = vld [vmem:[%s7751_s5 + $0x30] sm:$0xff] }
 0xe86   :  { %v6093_v38 = vpop.f32.mrf.mxu1 }
 0xe87   :  { %v2249_v50 = vadd.f32 %v6093_v38, %v7027_v30  ;;  %v84_v38 = vld [vmem:[%s7751_s5 + $0x18] sm:$0xff] }
 0xe88   :  { %v2243_v26 = vpop.f32.mrf.mxu1  ;;  %6116 = vmatprep.subr.mxu1 %v84_v38 }
 0xe89   :  { %v2244_v39 = vadd.f32 %v2243_v26, %v7032_v32  ;;  %v2255_v52 = vsel %vm99_vm10, %v2249_v50, -inf  ;;  %6117 = vmatpush3.msra.mxu1 %v84_v38  ;;  %v82_v26 = vld [vmem:[%s7751_s5 + $0x8] sm:$0xff] }
 0xe8a   :  { %2256 = vmax.xlane.f32.xlu1 %v2255_v52  ;;  %v92_v52 = vld [vmem:[%s7751_s5 + $0x58] sm:$0xff] }
 0xe8b   :  { %v2252_v59 = vsel %vm99_vm10, %v2244_v39, -inf }
 0xe8c   :  { %2253 = vmax.xlane.f32.xlu0 %v2252_v59  ;;  %v91_v59 = vld [vmem:[%s7751_s5 + $0x50] sm:$0xff] }
 0xf13   :  { %v2257_v33 = vpop.xlane.xlu1 %2256 }
 0xf14   :  { %v2259_v34 = vsub.f32 %v2249_v50, %v2257_v33  ;;  %v83_v50 = vld [vmem:[%s7751_s5 + $0x10] sm:$0xff]  ;;  %v90_v33 = vld [vmem:[%s7751_s5 + $0x48] sm:$0xff] }
 0xf15   :  { %v2254_v43 = vpop.xlane.xlu0 %2253  ;;  %6118 = vmatprep.subr.mxu1 %v83_v50 }
 0xf16   :  { %v2262_v45 = vmul.f32 1.442695, %v2259_v34  ;;  %v2258_v36 = vsub.f32 %v2244_v39, %v2254_v43  ;;  %6119 = vmatpush3.msra.mxu1 %v83_v50  ;;  %v81_v39 = vld [vmem:[%s7751_s5] sm:$0xff] }
 0xf17   :  { %6120 = vmatprep.subr.mxu1 %v82_v26  ;;  %v89_v34 = vld [vmem:[%s7751_s5 + $0x40] sm:$0xff] }
 0xf18   :  { %6491 = vpow2.f32 %v2262_v45  ;;  %v2260_v8 = vmul.f32 1.442695, %v2258_v36  ;;  %6121 = vmatpush3.msra.mxu1 %v82_v26 }
 0xf19   :  { %6122 = vmatprep.subr.mxu1 %v81_v39 }
 0xf1a   :  { %6493 = vpow2.f32 %v2260_v8  ;;  %6123 = vmatpush3.msra.mxu1 %v81_v39  ;;  %v2733_v39 = vld [vmem:[#allocation2 + $0x158] sm:$0xff] }
 0xf25   :  { %v6492_v46 = vpop.eup %6491 }
 0xf26   :  { %v2267_v30 = vsel %vm99_vm10, %v6492_v46, 0.0 }
 0xf27   :  { %v6494_v47 = vpop.eup %6493  ;;  %2268 = vadd.xlane.f32.xlu1 %v2267_v30 }
 0xf28   :  { %v2264_v32 = vsel %vm99_vm10, %v6494_v47, 0.0 }
 0xf29   :  { %2265 = vadd.xlane.f32.xlu0 %v2264_v32  ;;  %v6584_v32 = vld [vmem:[%s7752_s6] sm:$0xff] }
 0xfb0   :  { %v2269_v55 = vpop.xlane.xlu1 %2268 }
 0xfb1   :  { %6495 = vrcp.f32 %v2269_v55 }
 0xfb2   :  { %v2266_v62 = vpop.xlane.xlu0 %2265 }
 0xfb3   :  { %6497 = vrcp.f32 %v2266_v62 }
 0xfbe   :  { %v6496_v57 = vpop.eup %6495 }
 0xfbf   :  { %v2273_v61 = vmul.f32 %v6496_v57, %v6492_v46 }
 0xfc0   :  { %v6498_v58 = vpop.eup %6497 }
 0xfc1   :  { %v2272_v53 = vmul.f32 %v6498_v58, %v6494_v47 }
 0xfc3   :  { %6102 = vmatprep.mubr.msk.f32.mxu0 %vm99_vm10, %v2272_v53  ;;  %v2483_v53 = vrot.slane %v6584_v32, %v7132_v17 }
 0xfc4   :  { %6103 = vmatmul.mubr.msk.f32.vlgmr.msra.gmra.mxu0 %vm99_vm10, %v2273_v61 }
 0xfc5   :  { %6106 = vmatpush3.msra.mxu0 %v1295_v48  ;;  %v2477_v48 = vrot.slane %v6584_v32, %v6975_v60 }
 0xfc6   :  { %6107 = vmatprep.subr.mxu0 %v1294_v63 }
 0xfc7   :  { %6108 = vmatpush3.msra.mxu0 %v1294_v63 }
 0xfc8   :  { %6109 = vmatprep.subr.mxu0 %v1293_v0 }
 0xfc9   :  { %6110 = vmatpush3.msra.mxu0 %v1293_v0 }
 0xfca   :  { %6111 = vmatprep.subr.mxu0 %v1292_v1 }
 0xfcb   :  { %6112 = vmatpush3.msra.mxu0 %v1292_v1  ;;  %v88_v1 = vld [vmem:[%s7751_s5 + $0x38] sm:$0xff] }
 0xfcc   :  { %6127 = vmatprep.subr.mxu0 %v92_v52 }
0x1084   :  { %v6104_v7 = vpop.f32.mrf.mxu0 }
0x1085   :  { %v2360_v51 = vadd.f32 %v6104_v7, %v2168_v31  ;;  %v86_v7 = vld [vmem:[%s7751_s5 + $0x28] sm:$0xff] }
0x1086   :  { %v2350_v11 = vpop.f32.mrf.mxu0 }
0x1087   :  { %v2359_v15 = vadd.f32 %v2350_v11, %v2167_v9  ;;  %v85_v9 = vld [vmem:[%s7751_s5 + $0x20] sm:$0xff]  ;;  %v2489_v11 = vrot.slane %v7137_v19, %v6723_v42 }
0x1089   :  { %6113 = vmatprep.mubr.msk.f32.mxu0 %vm99_vm10, %v2359_v15 }
0x108a   :  { %6114 = vmatmul.mubr.msk.f32.vlgmr.msra.gmra.mxu0 %vm99_vm10, %v2360_v51 }
0x108b   :  { %6128 = vmatpush3.msra.mxu0 %v92_v52  ;;  %v2723_v52 = vld [vmem:[#allocation2 + $0x118] sm:$0xff] }
0x108c   :  { %6129 = vmatprep.subr.mxu0 %v91_v59  ;;  %6146 = vmatprep.subr.mxu1 %v2723_v52 }
0x108d   :  { %6130 = vmatpush3.msra.mxu0 %v91_v59  ;;  %v2732_v59 = vld [vmem:[#allocation2 + $0x150] sm:$0xff] }
0x108e   :  { %6131 = vmatprep.subr.mxu0 %v90_v33 }
0x108f   :  { %6132 = vmatpush3.msra.mxu0 %v90_v33  ;;  %v2722_v33 = vld [vmem:[#allocation2 + $0x110] sm:$0xff] }
0x1090   :  { %6133 = vmatprep.subr.mxu0 %v89_v34 }
0x1091   :  { %6134 = vmatpush3.msra.mxu0 %v89_v34  ;;  %v2731_v34 = vld [vmem:[#allocation2 + $0x148] sm:$0xff] }
0x1092   :  { %6135 = vmatprep.subr.mxu0 %v88_v1 }
0x1093   :  { %6136 = vmatpush3.msra.mxu0 %v88_v1 }
0x1094   :  { %6137 = vmatprep.subr.mxu0 %v87_v2 }
0x1095   :  { %6138 = vmatpush3.msra.mxu0 %v87_v2 }
0x1096   :  { %6139 = vmatprep.subr.mxu0 %v86_v7 }
0x1097   :  { %6140 = vmatpush3.msra.mxu0 %v86_v7 }
0x1098   :  { %6141 = vmatprep.subr.mxu0 %v85_v9 }
0x1099   :  { %6142 = vmatpush3.msra.mxu0 %v85_v9 }
0x109a   :  { %6168 = vmatprep.subr.mxu0 %v2733_v39 }
0x114a   :  { %v6115_v20 = vpop.f32.mrf.mxu0 }
0x114b   :  { %v2443_v14 = vadd.f32 %v6115_v20, %v2364_v37 }
0x114c   :  { %v2437_v13 = vpop.f32.mrf.mxu0 }
0x114d   :  { %v7142_v29 = vadd.f32 %v2443_v14, %v6870_v40  ;;  %v2438_v21 = vadd.f32 %v2437_v13, %v2364_v37 }
0x114f   :  { %v7145_v22 = vadd.f32 %v2438_v21, %v6872_v44  ;;  %v2451_v24 = vsel %vm99_vm10, %v7142_v29, 0.0  ;;  %v2660_v21 = vrot.slane %v7137_v19, %v6720_v41 }
0x1150   :  { %2452 = vadd.xlane.f32.xlu1 %v2451_v24 }
0x1151   :  { %v2448_v23 = vsel %vm99_vm10, %v7145_v22, 0.0 }
0x1152   :  { %2449 = vadd.xlane.f32.xlu0 %v2448_v23 }
0x11d9   :  { %v2453_v10 = vpop.xlane.xlu1 %2452 }
0x11da   :  { %v2455_v56 = vmul.f32 0.03125, %v2453_v10 }
0x11db   :  { %v2450_v54 = vpop.xlane.xlu0 %2449 }
0x11dc   :  { %v2457_v16 = vsub.f32 %v7142_v29, %v2455_v56  ;;  %v2454_v49 = vmul.f32 0.03125, %v2450_v54 }
0x11de   :  { %v2456_v40 = vsub.f32 %v7145_v22, %v2454_v49  ;;  %v2459_v28 = vmul.f32 %v2457_v16, %v2457_v16 }
0x11e0   :  { %v2463_v44 = vsel %vm99_vm10, %v2459_v28, 0.0  ;;  %v2458_v31 = vmul.f32 %v2456_v40, %v2456_v40 }
0x11e1   :  { %2464 = vadd.xlane.f32.xlu1 %v2463_v44 }
0x11e2   :  { %v2460_v35 = vsel %vm99_vm10, %v2458_v31, 0.0 }
0x11e3   :  { %2461 = vadd.xlane.f32.xlu0 %v2460_v35 }
0x126a   :  { %v2465_v43 = vpop.xlane.xlu1 %2464 }
0x126b   :  { %v2467_v45 = vmul.f32 0.03125, %v2465_v43  ;;  %v2721_v43 = vld [vmem:[#allocation2 + $0x108] sm:$0xff] }
0x126c   :  { %v2462_v36 = vpop.xlane.xlu0 %2461 }
0x126d   :  { %v2469_v8 = vadd.f32 1e-05, %v2467_v45  ;;  %v2466_v46 = vmul.f32 0.03125, %v2462_v36  ;;  %v2730_v45 = vld [vmem:[#allocation2 + $0x140] sm:$0xff] }
0x126e   :  { %v2720_v36 = vld [vmem:[#allocation2 + $0x100] sm:$0xff] }
0x126f   :  { %6499 = vrsqrt.f32 %v2469_v8  ;;  %v2468_v30 = vadd.f32 1e-05, %v2466_v46  ;;  %v2728_v8 = vld [vmem:[#allocation2 + $0x138] sm:$0xff] }
0x1271   :  { %6501 = vrsqrt.f32 %v2468_v30 }
0x127c   :  { %v6500_v47 = vpop.eup %6499 }
0x127d   :  { %v2473_v55 = vmul.f32 %v6500_v47, %v2457_v16 }
0x127e   :  { %v6502_v62 = vpop.eup %6501 }
0x127f   :  { %v2472_v57 = vmul.f32 %v6502_v62, %v2456_v40  ;;  %v2479_v58 = vmul.f32 %v2477_v48, %v2473_v55  ;;  %v7221_v62 = vld [vmem:[%s7752_s6 + $0x10] sm:$0xff] }
0x1281   :  { %v2478_v61 = vmul.f32 %v2477_v48, %v2472_v57  ;;  %v2485_v0 = vadd.f32 %v2483_v53, %v2479_v58  ;;  %v2708_v57 = vrot.slane %v7221_v62, %v6687_v25 }
0x1283   :  { %v2484_v63 = vadd.f32 %v2483_v53, %v2478_v61 }
0x1285   :  { %6124 = vmatprep.mubr.msk.f32.mxu1 %vm99_vm10, %v2484_v63  ;;  %v2714_v63 = vrot.slane %v7221_v62, %v6695_v27 }
0x1286   :  { %6125 = vmatmul.mubr.msk.f32.vlgmr.msra.gmra.mxu1 %vm99_vm10, %v2485_v0 }
0x1287   :  { %6147 = vmatpush3.msra.mxu1 %v2723_v52 }
0x1288   :  { %6148 = vmatprep.subr.mxu1 %v2722_v33 }
0x1289   :  { %6149 = vmatpush3.msra.mxu1 %v2722_v33 }
0x128a   :  { %6150 = vmatprep.subr.mxu1 %v2721_v43 }
0x128b   :  { %6151 = vmatpush3.msra.mxu1 %v2721_v43 }
0x128c   :  { %6152 = vmatprep.subr.mxu1 %v2720_v36 }
0x128d   :  { %6153 = vmatpush3.msra.mxu1 %v2720_v36 }
0x128e   :  { %6157 = vmatprep.subr.mxu1 %v2728_v8 }
0x1346   :  { %v6126_v15 = vpop.f32.mrf.mxu1 }
0x1347   :  { %v2568_v51 = vadd.f32 %v6126_v15, %v2489_v11 }
0x1348   :  { %v2562_v37 = vpop.f32.mrf.mxu1 }
0x1349   :  { %v2563_v20 = vadd.f32 %v2562_v37, %v2489_v11  ;;  %v2572_v13 = vmax.f32 %v2568_v51, 0.0  ;;  %v7231_v11 = vld [vmem:[%s7746_s0] sm:$0xff]  ;;  %v7238_v51 = vld [vmem:[%s7746_s0 + $0x8] sm:$0xff] }
0x134b   :  { %v2571_v14 = vmax.f32 %v2563_v20, 0.0  ;;  %v2727_v20 = vld [vmem:[#allocation2 + $0x130] sm:$0xff] }
0x134d   :  { %6143 = vmatprep.mubr.msk.f32.mxu0 %vm2573_vm12, %v2571_v14  ;;  %v2726_v14 = vld [vmem:[#allocation2 + $0x128] sm:$0xff] }
0x134e   :  { %6144 = vmatmul.mubr.msk.f32.vlgmr.msra.gmra.mxu0 %vm2573_vm12, %v2572_v13  ;;  %v2725_v13 = vld [vmem:[#allocation2 + $0x120] sm:$0xff] }
0x134f   :  { %6169 = vmatpush3.msra.mxu0 %v2733_v39 }
0x1350   :  { %6170 = vmatprep.subr.mxu0 %v2732_v59 }
0x1351   :  { %6171 = vmatpush3.msra.mxu0 %v2732_v59 }
0x1352   :  { %6172 = vmatprep.subr.mxu0 %v2731_v34 }
0x1353   :  { %6173 = vmatpush3.msra.mxu0 %v2731_v34 }
0x1354   :  { %6174 = vmatprep.subr.mxu0 %v2730_v45 }
0x1355   :  { %6175 = vmatpush3.msra.mxu0 %v2730_v45 }
0x140e   :  { %v6145_v24 = vpop.f32.mrf.mxu0 }
0x140f   :  { %v2656_v23 = vadd.f32 %v6145_v24, %v7142_v29  ;;  %v2742_v24 = vrot.slane %v7221_v62, %v6720_v41 }
0x1410   :  { %v2646_v10 = vpop.f32.mrf.mxu0 }
0x1411   :  { %v7205_v56 = vadd.f32 %v2660_v21, %v2656_v23  ;;  %v2655_v54 = vadd.f32 %v2646_v10, %v7145_v22 }
0x1413   :  { %v7208_v16 = vadd.f32 %v2660_v21, %v2655_v54  ;;  %v2682_v49 = vsel %vm99_vm10, %v7205_v56, 0.0  ;;  %v7250_v54 = vld [vmem:[%s7752_s6 + $0x18] sm:$0xff] }
0x1414   :  { %2683 = vadd.xlane.f32.xlu1 %v2682_v49  ;;  %v2829_v49 = vrot.slane %v7221_v62, %v6723_v42 }
0x1415   :  { %v2679_v40 = vsel %vm99_vm10, %v7208_v16, 0.0 }
0x1416   :  { %2680 = vadd.xlane.f32.xlu0 %v2679_v40 }
0x149d   :  { %v2684_v28 = vpop.xlane.xlu1 %2683 }
0x149e   :  { %v2686_v19 = vmul.f32 0.03125, %v2684_v28  ;;  %v2908_v28 = vrot.slane %v7250_v54, %v6687_v25 }
0x149f   :  { %v2681_v44 = vpop.xlane.xlu0 %2680 }
0x14a0   :  { %v2688_v29 = vsub.f32 %v7205_v56, %v2686_v19  ;;  %v2685_v31 = vmul.f32 0.03125, %v2681_v44 }
0x14a2   :  { %v2687_v35 = vsub.f32 %v7208_v16, %v2685_v31  ;;  %v2690_v38 = vmul.f32 %v2688_v29, %v2688_v29 }
0x14a4   :  { %v2694_v22 = vsel %vm99_vm10, %v2690_v38, 0.0  ;;  %v2689_v50 = vmul.f32 %v2687_v35, %v2687_v35 }
0x14a5   :  { %2695 = vadd.xlane.f32.xlu1 %v2694_v22 }
0x14a6   :  { %v2691_v26 = vsel %vm99_vm10, %v2689_v50, 0.0 }
0x14a7   :  { %2692 = vadd.xlane.f32.xlu0 %v2691_v26 }
0x152e   :  { %v2696_v46 = vpop.xlane.xlu1 %2695 }
0x152f   :  { %v2698_v30 = vmul.f32 0.03125, %v2696_v46 }
0x1530   :  { %v2693_v47 = vpop.xlane.xlu0 %2692 }
0x1531   :  { %v2700_v32 = vadd.f32 1e-05, %v2698_v30  ;;  %v2697_v48 = vmul.f32 0.03125, %v2693_v47 }
0x1533   :  { %6503 = vrsqrt.f32 %v2700_v32  ;;  %v2699_v55 = vadd.f32 1e-05, %v2697_v48 }
0x1535   :  { %6505 = vrsqrt.f32 %v2699_v55  ;;  %v7326_v55 = vld [vmem:[%s7748_s2 + $0x8] sm:$0xff] }
0x1540   :  { %v6504_v58 = vpop.eup %6503 }
0x1541   :  { %v2704_v53 = vmul.f32 %v6504_v58, %v2688_v29 }
0x1542   :  { %v6506_v61 = vpop.eup %6505 }
0x1543   :  { %v2703_v0 = vmul.f32 %v6506_v61, %v2687_v35  ;;  %v2710_v1 = vmul.f32 %v2708_v57, %v2704_v53 }
0x1545   :  { %v2709_v2 = vmul.f32 %v2708_v57, %v2703_v0  ;;  %v2716_v7 = vadd.f32 %v2714_v63, %v2710_v1 }
0x1547   :  { %v2715_v9 = vadd.f32 %v2714_v63, %v2709_v2  ;;  %v2718_v37 = vadd.f32 %v7238_v51, %v2716_v7  ;;  %v7333_v63 = vld [vmem:[%s7748_s2] sm:$0xff] }
0x1549   :  { %6176 = vmatprep.mubr.msk.f32.mxu0 %vm99_vm10, %v2715_v9  ;;  %v2717_v15 = vadd.f32 %v7231_v11, %v2715_v9 }
0x154a   :  { %6177 = vmatmul.mubr.msk.f32.vlgmr.msra.gmra.mxu0 %vm99_vm10, %v2716_v7 }
0x154b   :  { %6154 = vmatprep.mubr.msk.f32.mxu1 %vm99_vm10, %v2717_v15 }
0x154c   :  { %6155 = vmatmul.mubr.msk.f32.vlgmr.msra.gmra.mxu1 %vm99_vm10, %v2718_v37 }
0x154d   :  { %6158 = vmatpush3.msra.mxu1 %v2728_v8  ;;  %6165 = vmatprep.mubr.msk.f32.mxu1 %vm99_vm10, %v2717_v15 }
0x154e   :  { %6159 = vmatprep.subr.mxu1 %v2727_v20 }
0x154f   :  { %6160 = vmatpush3.msra.mxu1 %v2727_v20 }
0x1550   :  { %6161 = vmatprep.subr.mxu1 %v2726_v14 }
0x1551   :  { %6162 = vmatpush3.msra.mxu1 %v2726_v14 }
0x1552   :  { %6163 = vmatprep.subr.mxu1 %v2725_v13 }
0x1553   :  { %6164 = vmatpush3.msra.mxu1 %v2725_v13 }
0x1554   :  { %6166 = vmatmul.mubr.msk.f32.vlgmr.msra.gmra.mxu1 %vm99_vm10, %v2718_v37 }
0x160a   :  { %v6178_v19 = vpop.f32.mrf.mxu0 }
0x160b   :  { %v7266_v50 = vadd.f32 %v6178_v19, %v2908_v28 }
0x160c   :  { %v6156_v21 = vpop.f32.mrf.mxu1  ;;  %v2981_v39 = vpop.f32.mrf.mxu0 }
0x160d   :  { %v2821_v35 = vadd.f32 %v6156_v21, %v2742_v24  ;;  %v7284_v59 = vadd.f32 %v2981_v39, %v2908_v28  ;;  %v3209_v33 = vmul.f32 %v6677_v4, %v7266_v50  ;;  %v7309_v8 = vmul.f32 %v6675_v3, %v7266_v50 }
0x160e   :  { %v2815_v23 = vpop.f32.mrf.mxu1  ;;  %v3668_v46 = vmul.f32 %v6681_v6, %v7266_v50 }
0x160f   :  { %v2816_v10 = vadd.f32 %v2815_v23, %v2742_v24  ;;  %v7278_v52 = vmul.f32 0.35355338, %v2821_v35  ;;  %v3208_v36 = vmul.f32 %v6677_v4, %v7284_v59  ;;  %v3667_v47 = vmul.f32 %v6681_v6, %v7284_v59 }
0x1611   :  { %v7254_v40 = vmul.f32 0.35355338, %v2816_v10  ;;  %v2991_v34 = vmul.f32 %v6675_v3, %v7278_v52  ;;  %v3104_v43 = vmul.f32 %v6677_v4, %v7278_v52  ;;  %v3373_v30 = vmul.f32 %v6679_v5, %v7278_v52 }
0x1613   :  { %v2990_v29 = vmul.f32 %v6675_v3, %v7254_v40  ;;  %v3103_v31 = vmul.f32 %v6677_v4, %v7254_v40  ;;  %v3372_v45 = vmul.f32 %v6679_v5, %v7254_v40 }
0x1614   :  { %v6167_v44 = vpop.f32.mrf.mxu1 }
0x1615   :  { %v7262_v38 = vadd.f32 %v6167_v44, %v2829_v49  ;;  %6183 = vmatprep.mubr.msk.f32.mxu1 %vm99_vm10, %v2990_v29  ;;  %6190 = vmatprep.mubr.msk.f32.mxu0 %vm99_vm10, %v3103_v31 }
0x1616   :  { %v2896_v22 = vpop.f32.mrf.mxu1 }
0x1617   :  { %v7268_v26 = vadd.f32 %v2896_v22, %v2829_v49  ;;  %6179 = vmatprep.subr.msk.mxu1 %vm99_vm10, %v7262_v38  ;;  %6186 = vmatprep.subr.msk.mxu0 %vm99_vm10, %v7262_v38 }
0x1618   :  { %6180 = vmatpush3.xpose.msk.msra.mxu1 %vm99_vm10, %v7262_v38  ;;  %6187 = vmatpush3.xpose.msk.msra.mxu0 %vm99_vm10, %v7262_v38 }
0x1619   :  { %6181 = vmatprep.subr.msk.mxu1 %vm99_vm10, %v7268_v26  ;;  %6188 = vmatprep.subr.msk.mxu0 %vm99_vm10, %v7268_v26 }
0x161c   :  { %6182 = vmatpush3.xpose.msk.msra.mxu1 %vm99_vm10, %v7268_v26  ;;  %6189 = vmatpush3.xpose.msk.msra.mxu0 %vm99_vm10, %v7268_v26 }
0x161d   :  { %6193 = vmatprep.subr.mxu1 %v3209_v33  ;;  %6207 = vmatprep.subr.msk.mxu0 %vm99_vm10, %v7262_v38 }
0x161f   :  { %6184 = vmatmul.mubr.msk.f32.vlgmr.msra.gmra.mxu1 %vm99_vm10, %v2991_v34  ;;  %6191 = vmatmul.mubr.msk.f32.vlgmr.msra.gmra.mxu0 %vm99_vm10, %v3104_v43 }
0x1620   :  { %6194 = vmatpush3.msra.mxu1 %v3209_v33  ;;  %6208 = vmatpush3.xpose.msk.msra.mxu0 %vm99_vm10, %v7262_v38 }
0x1621   :  { %6211 = vmatprep.mubr.msk.f32.mxu0 %vm99_vm10, %v3372_v45  ;;  %6195 = vmatprep.subr.mxu1 %v3208_v36 }
0x1622   :  { %6209 = vmatprep.subr.msk.mxu0 %vm99_vm10, %v7268_v26  ;;  %6196 = vmatpush3.msra.mxu1 %v3208_v36 }
0x1623   :  { %6200 = vmatprep.subr.mxu1 %v7309_v8 }
0x1624   :  { %6210 = vmatpush3.xpose.msk.msra.mxu0 %vm99_vm10, %v7268_v26 }
0x1625   :  { %6228 = vmatprep.subr.mxu0 %v3668_v46 }
0x1627   :  { %6212 = vmatmul.mubr.msk.f32.vlgmr.msra.gmra.mxu0 %vm99_vm10, %v3373_v30 }
0x1628   :  { %6229 = vmatpush3.msra.mxu0 %v3668_v46 }
0x1629   :  { %6230 = vmatprep.subr.mxu0 %v3667_v47 }
0x162a   :  { %6231 = vmatpush3.msra.mxu0 %v3667_v47 }
0x16df   :  { %v6185_v32 = vpop.f32.mrf.mxu1  ;;  %v6192_v48 = vpop.f32.mrf.mxu0 }
0x16e0   :  { %v3183_v57 = vadd.f32 %v7326_v55, %v6192_v48  ;;  %v3076_v61 = vadd.f32 %v7326_v55, %v6185_v32 }
0x16e1   :  { %v3070_v58 = vpop.f32.mrf.mxu1  ;;  %v3177_v53 = vpop.f32.mrf.mxu0 }
0x16e2   :  { %v3178_v0 = vadd.f32 %v7333_v63, %v3177_v53  ;;  %v3189_v1 = vsel %vm475_vm11, %v3183_v57, -inf  ;;  %v3071_v2 = vadd.f32 %v7333_v63, %v3070_v58  ;;  %v3082_v9 = vsel %vm475_vm11, %v3076_v61, -inf }
0x16e3   :  { %3190 = vmax.xlane.f32.xlu1 %v3189_v1 }
0x16e4   :  { %v3186_v7 = vsel %vm475_vm11, %v3178_v0, -inf  ;;  %v3079_v20 = vsel %vm475_vm11, %v3071_v2, -inf }
0x16e5   :  { %3187 = vmax.xlane.f32.xlu0 %v3186_v7 }
0x16e7   :  { %v6213_v15 = vpop.f32.mrf.mxu0  ;;  %3083 = vmax.xlane.f32.xlu1 %v3082_v9 }
0x16e8   :  { %v3452_v37 = vadd.f32 %v7326_v55, %v6213_v15 }
0x16e9   :  { %v3446_v14 = vpop.f32.mrf.mxu0  ;;  %3080 = vmax.xlane.f32.xlu0 %v3079_v20 }
0x16ea   :  { %v3447_v13 = vadd.f32 %v7333_v63, %v3446_v14  ;;  %v3458_v21 = vsel %vm475_vm11, %v3452_v37, -inf }
0x16eb   :  { %3459 = vmax.xlane.f32.xlu1 %v3458_v21 }
0x16ec   :  { %v3455_v24 = vsel %vm475_vm11, %v3447_v13, -inf }
0x16ed   :  { %3456 = vmax.xlane.f32.xlu0 %v3455_v24 }
0x176c   :  { %v3191_v23 = vpop.xlane.xlu1 %3190 }
0x176d   :  { %v3193_v10 = vsub.f32 %v3183_v57, %v3191_v23 }
0x176e   :  { %v3188_v49 = vpop.xlane.xlu0 %3187 }
0x176f   :  { %v3196_v28 = vmul.f32 1.442695, %v3193_v10  ;;  %v3192_v19 = vsub.f32 %v3178_v0, %v3188_v49 }
0x1770   :  { %v3084_v44 = vpop.xlane.xlu1 %3083 }
0x1771   :  { %6507 = vpow2.f32 %v3196_v28  ;;  %v3194_v29 = vmul.f32 1.442695, %v3192_v19  ;;  %v3086_v31 = vsub.f32 %v3076_v61, %v3084_v44  ;;  %v3101_v44 = vmul.f32 %v6675_v3, %v7284_v59 }
0x1772   :  { %v3081_v35 = vpop.xlane.xlu0 %3080 }
0x1773   :  { %6509 = vpow2.f32 %v3194_v29  ;;  %v3089_v22 = vmul.f32 1.442695, %v3086_v31  ;;  %v3085_v39 = vsub.f32 %v3071_v2, %v3081_v35  ;;  %v3478_v31 = vmul.f32 %v6679_v5, %v7266_v50 }
0x1774   :  { %v3460_v33 = vpop.xlane.xlu1 %3459  ;;  %v3562_v50 = vmul.f32 %v6681_v6, %v7254_v40 }
0x1775   :  { %6511 = vpow2.f32 %v3089_v22  ;;  %v3087_v34 = vmul.f32 1.442695, %v3085_v39  ;;  %v3462_v43 = vsub.f32 %v3452_v37, %v3460_v33  ;;  %v3477_v33 = vmul.f32 %v6679_v5, %v7284_v59 }
0x1776   :  { %v3457_v45 = vpop.xlane.xlu0 %3456  ;;  %v3563_v59 = vmul.f32 %v6681_v6, %v7278_v52 }
0x1777   :  { %6513 = vpow2.f32 %v3087_v34  ;;  %v3465_v36 = vmul.f32 1.442695, %v3462_v43  ;;  %v3461_v46 = vsub.f32 %v3447_v13, %v3457_v45 }
0x1779   :  { %6515 = vpow2.f32 %v3465_v36  ;;  %v3463_v30 = vmul.f32 1.442695, %v3461_v46 }
0x177b   :  { %6517 = vpow2.f32 %v3463_v30 }
0x177e   :  { %v6508_v47 = vpop.eup %6507 }
0x177f   :  { %v3201_v32 = vsel %vm475_vm11, %v6508_v47, 0.0 }
0x1780   :  { %v6510_v48 = vpop.eup %6509  ;;  %3202 = vadd.xlane.f32.xlu1 %v3201_v32 }
0x1781   :  { %v3198_v57 = vsel %vm475_vm11, %v6510_v48, 0.0 }
0x1782   :  { %v6512_v58 = vpop.eup %6511  ;;  %3199 = vadd.xlane.f32.xlu0 %v3198_v57 }
0x1783   :  { %v3094_v53 = vsel %vm475_vm11, %v6512_v58, 0.0 }
0x1784   :  { %v6514_v61 = vpop.eup %6513  ;;  %3095 = vadd.xlane.f32.xlu1 %v3094_v53 }
0x1785   :  { %v3091_v0 = vsel %vm475_vm11, %v6514_v61, 0.0 }
0x1786   :  { %v6516_v1 = vpop.eup %6515  ;;  %3092 = vadd.xlane.f32.xlu0 %v3091_v0 }
0x1787   :  { %v3470_v2 = vsel %vm475_vm11, %v6516_v1, 0.0 }
0x1788   :  { %v6518_v7 = vpop.eup %6517  ;;  %3471 = vadd.xlane.f32.xlu1 %v3470_v2 }
0x1789   :  { %v3467_v9 = vsel %vm475_vm11, %v6518_v7, 0.0 }
0x178a   :  { %3468 = vadd.xlane.f32.xlu0 %v3467_v9 }
0x1809   :  { %v3203_v15 = vpop.xlane.xlu1 %3202 }
0x180a   :  { %6519 = vrcp.f32 %v3203_v15 }
0x180b   :  { %v3200_v37 = vpop.xlane.xlu0 %3199 }
0x180c   :  { %6521 = vrcp.f32 %v3200_v37 }
0x180d   :  { %v3096_v20 = vpop.xlane.xlu1 %3095 }
0x180e   :  { %6523 = vrcp.f32 %v3096_v20 }
0x180f   :  { %v3093_v14 = vpop.xlane.xlu0 %3092 }
0x1810   :  { %6525 = vrcp.f32 %v3093_v14  ;;  %v2738_v14 = vld [vmem:[#allocation2 + $0x178] sm:$0xff] }
0x1811   :  { %v3472_v13 = vpop.xlane.xlu1 %3471  ;;  %6235 = vmatprep.subr.mxu0 %v2738_v14 }
0x1812   :  { %6527 = vrcp.f32 %v3472_v13 }
0x1813   :  { %v3469_v21 = vpop.xlane.xlu0 %3468 }
0x1814   :  { %6529 = vrcp.f32 %v3469_v21 }
0x1817   :  { %v6520_v24 = vpop.eup %6519 }
0x1818   :  { %v3207_v49 = vmul.f32 %v6520_v24, %v6508_v47 }
0x1819   :  { %v6522_v23 = vpop.eup %6521 }
0x181a   :  { %v3206_v10 = vmul.f32 %v6522_v23, %v6510_v48 }
0x181b   :  { %v6524_v28 = vpop.eup %6523 }
0x181c   :  { %6197 = vmatprep.mubr.msk.f32.mxu1 %vm475_vm11, %v3206_v10  ;;  %v3100_v35 = vmul.f32 %v6524_v28, %v6512_v58  ;;  %v2737_v28 = vld [vmem:[#allocation2 + $0x170] sm:$0xff] }
0x181d   :  { %v6526_v19 = vpop.eup %6525  ;;  %6198 = vmatmul.mubr.msk.f32.vlgmr.msra.gmra.mxu1 %vm475_vm11, %v3207_v49 }
0x181e   :  { %6201 = vmatpush3.msra.mxu1 %v7309_v8  ;;  %v3099_v29 = vmul.f32 %v6526_v19, %v6514_v61  ;;  %v2736_v19 = vld [vmem:[#allocation2 + $0x168] sm:$0xff] }
0x181f   :  { %6202 = vmatprep.subr.mxu1 %v3101_v44  ;;  %v6528_v22 = vpop.eup %6527 }
0x1820   :  { %6203 = vmatpush3.msra.mxu1 %v3101_v44  ;;  %6204 = vmatprep.mubr.msk.f32.mxu1 %vm475_vm11, %v3099_v29  ;;  %v3476_v8 = vmul.f32 %v6528_v22, %v6516_v1  ;;  %v2735_v44 = vld [vmem:[#allocation2 + $0x160] sm:$0xff] }
0x1821   :  { %v6530_v39 = vpop.eup %6529  ;;  %6214 = vmatprep.subr.mxu1 %v3478_v31  ;;  %6205 = vmatmul.mubr.msk.f32.vlgmr.msra.gmra.mxu1 %vm475_vm11, %v3100_v35 }
0x1822   :  { %6215 = vmatpush3.msra.mxu1 %v3478_v31  ;;  %v3475_v34 = vmul.f32 %v6530_v39, %v6518_v7  ;;  %v6589_v39 = vld [vmem:[%s7747_s1] sm:$0xff] }
0x1823   :  { %6216 = vmatprep.subr.mxu1 %v3477_v33 }
0x1824   :  { %6217 = vmatpush3.msra.mxu1 %v3477_v33  ;;  %6218 = vmatprep.mubr.msk.f32.mxu1 %vm475_vm11, %v3475_v34  ;;  %v3755_v33 = vrot.slane %v7250_v54, %v6695_v27 }
0x1825   :  { %6221 = vmatprep.subr.msk.mxu1 %vm99_vm10, %v7262_v38  ;;  %6219 = vmatmul.mubr.msk.f32.vlgmr.msra.gmra.mxu1 %vm475_vm11, %v3476_v8 }
0x1826   :  { %6222 = vmatpush3.xpose.msk.msra.mxu1 %vm99_vm10, %v7262_v38  ;;  %6225 = vmatprep.mubr.msk.f32.mxu1 %vm99_vm10, %v3562_v50 }
0x1827   :  { %6223 = vmatprep.subr.msk.mxu1 %vm99_vm10, %v7268_v26 }
0x182a   :  { %6224 = vmatpush3.xpose.msk.msra.mxu1 %vm99_vm10, %v7268_v26 }
0x182d   :  { %6226 = vmatmul.mubr.msk.f32.vlgmr.msra.gmra.mxu1 %vm99_vm10, %v3563_v59 }
0x18dd   :  { %v6199_v40 = vpop.f32.mrf.mxu1 }
0x18df   :  { %v3282_v43 = vpop.f32.mrf.mxu1 }
0x18e1   :  { %v6206_v45 = vpop.f32.mrf.mxu1 }
0x18e2   :  { %v3369_v36 = vadd.f32 %v6206_v45, %v6199_v40 }
0x18e3   :  { %v3363_v46 = vpop.f32.mrf.mxu1 }
0x18e4   :  { %v3364_v30 = vadd.f32 %v3363_v46, %v3282_v43  ;;  %v3888_v46 = vld [vmem:[#allocation2 + $0x1b8] sm:$0xff] }
0x18e5   :  { %v6220_v38 = vpop.f32.mrf.mxu1 }
0x18e6   :  { %v3561_v47 = vadd.f32 %v6220_v38, %v3369_v36  ;;  %v3886_v38 = vld [vmem:[#allocation2 + $0x1a8] sm:$0xff] }
0x18e7   :  { %v3551_v32 = vpop.f32.mrf.mxu1 }
0x18e8   :  { %v3560_v48 = vadd.f32 %v3551_v32, %v3364_v30  ;;  %v3887_v30 = vld [vmem:[#allocation2 + $0x1b0] sm:$0xff]  ;;  %v6592_v32 = vld [vmem:[%s7747_s1 + $0x18] sm:$0xff] }
0x18ed   :  { %v6227_v57 = vpop.f32.mrf.mxu1 }
0x18ee   :  { %v3642_v58 = vadd.f32 %v7326_v55, %v6227_v57 }
0x18ef   :  { %v3636_v53 = vpop.f32.mrf.mxu1 }
0x18f0   :  { %v3637_v26 = vadd.f32 %v7333_v63, %v3636_v53  ;;  %v3648_v52 = vsel %vm475_vm11, %v3642_v58, -inf }
0x18f1   :  { %3649 = vmax.xlane.f32.xlu1 %v3648_v52 }
0x18f2   :  { %v3645_v61 = vsel %vm475_vm11, %v3637_v26, -inf }
0x18f3   :  { %3646 = vmax.xlane.f32.xlu0 %v3645_v61 }
0x197a   :  { %v3650_v0 = vpop.xlane.xlu1 %3649 }
0x197b   :  { %v3652_v1 = vsub.f32 %v3642_v58, %v3650_v0 }
0x197c   :  { %v3647_v2 = vpop.xlane.xlu0 %3646 }
0x197d   :  { %v3655_v7 = vmul.f32 1.442695, %v3652_v1  ;;  %v3651_v9 = vsub.f32 %v3637_v26, %v3647_v2 }
0x197f   :  { %6531 = vpow2.f32 %v3655_v7  ;;  %v3653_v15 = vmul.f32 1.442695, %v3651_v9  ;;  %v3883_v7 = vld [vmem:[#allocation2 + $0x198] sm:$0xff]  ;;  %v3882_v9 = vld [vmem:[#allocation2 + $0x190] sm:$0xff] }
0x1980   :  { %6246 = vmatprep.subr.mxu1 %v3883_v7 }
0x1981   :  { %6533 = vpow2.f32 %v3653_v15  ;;  %6247 = vmatpush3.msra.mxu1 %v3883_v7  ;;  %v3881_v15 = vld [vmem:[#allocation2 + $0x188] sm:$0xff] }
0x1982   :  { %6248 = vmatprep.subr.mxu1 %v3882_v9 }
0x1983   :  { %6249 = vmatpush3.msra.mxu1 %v3882_v9  ;;  %v4078_v9 = vrot.slane %v7250_v54, %v6975_v60 }
0x1984   :  { %6250 = vmatprep.subr.mxu1 %v3881_v15 }
0x1985   :  { %6251 = vmatpush3.msra.mxu1 %v3881_v15 }
0x198c   :  { %v6532_v37 = vpop.eup %6531 }
0x198d   :  { %v3660_v55 = vsel %vm475_vm11, %v6532_v37, 0.0 }
0x198e   :  { %v6534_v20 = vpop.eup %6533  ;;  %3661 = vadd.xlane.f32.xlu1 %v3660_v55  ;;  %v3893_v55 = vld [vmem:[#allocation2 + $0x1d8] sm:$0xff] }
0x198f   :  { %v3657_v63 = vsel %vm475_vm11, %v6534_v20, 0.0 }
0x1990   :  { %3658 = vadd.xlane.f32.xlu0 %v3657_v63  ;;  %v3989_v63 = vrot.slane %v7250_v54, %v6902_v18 }
0x1a17   :  { %v3662_v13 = vpop.xlane.xlu1 %3661 }
0x1a18   :  { %6535 = vrcp.f32 %v3662_v13 }
0x1a19   :  { %v3659_v21 = vpop.xlane.xlu0 %3658 }
0x1a1a   :  { %6537 = vrcp.f32 %v3659_v21 }
0x1a25   :  { %v6536_v24 = vpop.eup %6535 }
0x1a26   :  { %v3666_v49 = vmul.f32 %v6536_v24, %v6532_v37  ;;  %v3880_v37 = vld [vmem:[#allocation2 + $0x180] sm:$0xff] }
0x1a27   :  { %v6538_v23 = vpop.eup %6537  ;;  %6252 = vmatprep.subr.mxu1 %v3880_v37 }
0x1a28   :  { %v3665_v10 = vmul.f32 %v6538_v23, %v6534_v20  ;;  %6253 = vmatpush3.msra.mxu1 %v3880_v37 }
0x1a29   :  { %6271 = vmatprep.subr.mxu1 %v3893_v55 }
0x1a2a   :  { %6232 = vmatprep.mubr.msk.f32.mxu0 %vm475_vm11, %v3665_v10 }
0x1a2b   :  { %6233 = vmatmul.mubr.msk.f32.vlgmr.msra.gmra.mxu0 %vm475_vm11, %v3666_v49 }
0x1a2c   :  { %6236 = vmatpush3.msra.mxu0 %v2738_v14 }
0x1a2d   :  { %6237 = vmatprep.subr.mxu0 %v2737_v28 }
0x1a2e   :  { %6238 = vmatpush3.msra.mxu0 %v2737_v28 }
0x1a2f   :  { %6239 = vmatprep.subr.mxu0 %v2736_v19 }
0x1a30   :  { %6240 = vmatpush3.msra.mxu0 %v2736_v19 }
0x1a31   :  { %6241 = vmatprep.subr.mxu0 %v2735_v44 }
0x1a32   :  { %6242 = vmatpush3.msra.mxu0 %v2735_v44 }
0x1a33   :  { %6257 = vmatprep.subr.mxu0 %v3888_v46 }
0x1aeb   :  { %v6234_v29 = vpop.f32.mrf.mxu0 }
0x1aec   :  { %v3751_v22 = vadd.f32 %v6234_v29, %v3561_v47  ;;  %v6591_v47 = vld [vmem:[%s7747_s1 + $0x10] sm:$0xff] }
0x1aed   :  { %v3741_v31 = vpop.f32.mrf.mxu0 }
0x1aee   :  { %v3750_v35 = vadd.f32 %v3741_v31, %v3560_v48 }
0x1af0   :  { %6243 = vmatprep.mubr.msk.f32.mxu0 %vm99_vm10, %v3750_v35 }
0x1af1   :  { %6244 = vmatmul.mubr.msk.f32.vlgmr.msra.gmra.mxu0 %vm99_vm10, %v3751_v22  ;;  %v3868_v22 = vrot.slane %v7221_v62, %v6899_v12 }
0x1af2   :  { %6265 = vmatprep.mubr.msk.f32.mxu0 %vm99_vm10, %v6589_v39  ;;  %6258 = vmatpush3.msra.mxu0 %v3888_v46 }
0x1af3   :  { %6259 = vmatprep.subr.mxu0 %v3887_v30 }
0x1af4   :  { %6260 = vmatpush3.msra.mxu0 %v3887_v30 }
0x1af5   :  { %6261 = vmatprep.subr.mxu0 %v3886_v38 }
0x1af6   :  { %6262 = vmatpush3.msra.mxu0 %v3886_v38 }
0x1bb1   :  { %v6245_v34 = vpop.f32.mrf.mxu0 }
0x1bb2   :  { %v3834_v8 = vadd.f32 %v6245_v34, %v3755_v33 }
0x1bb3   :  { %v3828_v50 = vpop.f32.mrf.mxu0 }
0x1bb4   :  { %v7395_v59 = vadd.f32 %v3834_v8, %v7205_v56  ;;  %v3829_v40 = vadd.f32 %v3828_v50, %v3755_v33  ;;  %v3885_v56 = vld [vmem:[#allocation2 + $0x1a0] sm:$0xff]  ;;  %v3874_v8 = vrot.slane %v7221_v62, %v6902_v18 }
0x1bb5   :  { %6263 = vmatprep.subr.mxu0 %v3885_v56  ;;  %v6593_v18 = vld [vmem:[%s7747_s1 + $0x20] sm:$0xff] }
0x1bb6   :  { %v7398_v43 = vadd.f32 %v3829_v40, %v7208_v16  ;;  %v3842_v45 = vsel %vm99_vm10, %v7395_v59, 0.0  ;;  %6264 = vmatpush3.msra.mxu0 %v3885_v56  ;;  %v6590_v16 = vld [vmem:[%s7747_s1 + $0x8] sm:$0xff]  ;;  %v3892_v56 = vld [vmem:[#allocation2 + $0x1d0] sm:$0xff]  ;;  %v3890_v62 = vld [vmem:[#allocation2 + $0x1c0] sm:$0xff] }
0x1bb7   :  { %3843 = vadd.xlane.f32.xlu1 %v3842_v45  ;;  %6266 = vmatmul.mubr.msk.f32.vlgmr.msra.gmra.mxu0 %vm99_vm10, %v6590_v16  ;;  %v3891_v16 = vld [vmem:[#allocation2 + $0x1c8] sm:$0xff] }
0x1bb8   :  { %v3839_v36 = vsel %vm99_vm10, %v7398_v43, 0.0  ;;  %6268 = vmatprep.mubr.msk.f32.mxu0 %vm99_vm10, %v6591_v47  ;;  %v6596_v47 = vld [vmem:[%s7747_s1 + $0x38] sm:$0xff] }
0x1bb9   :  { %3840 = vadd.xlane.f32.xlu0 %v3839_v36 }
0x1bbb   :  { %6269 = vmatmul.mubr.msk.f32.gmra.mxu0 %vm99_vm10, %v6592_v32  ;;  %v3902_v32 = vrot.slane %v7250_v54, %v6899_v12 }
0x1c40   :  { %v3844_v48 = vpop.xlane.xlu1 %3843 }
0x1c41   :  { %v3846_v57 = vmul.f32 0.03125, %v3844_v48 }
0x1c42   :  { %v3841_v58 = vpop.xlane.xlu0 %3840 }
0x1c43   :  { %v3848_v53 = vsub.f32 %v7395_v59, %v3846_v57  ;;  %v3845_v26 = vmul.f32 0.03125, %v3841_v58 }
0x1c45   :  { %v3847_v52 = vsub.f32 %v7398_v43, %v3845_v26  ;;  %v3850_v61 = vmul.f32 %v3848_v53, %v3848_v53 }
0x1c47   :  { %v3854_v0 = vsel %vm99_vm10, %v3850_v61, 0.0  ;;  %v3849_v1 = vmul.f32 %v3847_v52, %v3847_v52 }
0x1c48   :  { %3855 = vadd.xlane.f32.xlu1 %v3854_v0 }
0x1c49   :  { %v3851_v2 = vsel %vm99_vm10, %v3849_v1, 0.0 }
0x1c4a   :  { %3852 = vadd.xlane.f32.xlu0 %v3851_v2 }
0x1c77   :  { %v6267_v20 = vpop.f32.mrf.mxu0 }
0x1c78   :  { %v7430_v10 = vadd.f32 %v6267_v20, %v3989_v63 }
0x1c79   :  { %v4056_v14 = vpop.f32.mrf.mxu0 }
0x1c7a   :  { %v7436_v49 = vadd.f32 %v4056_v14, %v3989_v63 }
0x1c7b   :  { %v6270_v13 = vpop.f32.mrf.mxu0 }
0x1c7c   :  { %v7422_v21 = vadd.f32 %v6270_v13, %v3989_v63 }
0x1c7d   :  { %v4066_v24 = vpop.f32.mrf.mxu0 }
0x1c7e   :  { %6285 = vmatprep.subr.msk.mxu0 %vm99_vm10, %v7422_v21  ;;  %v7426_v23 = vadd.f32 %v4066_v24, %v3989_v63 }
0x1c7f   :  { %6286 = vmatpush3.xpose.msk.msra.mxu0 %vm99_vm10, %v7422_v21 }
0x1c80   :  { %6287 = vmatprep.subr.msk.mxu0 %vm99_vm10, %v7426_v23 }
0x1c83   :  { %6288 = vmatpush3.xpose.msk.msra.mxu0 %vm99_vm10, %v7426_v23 }
0x1c84   :  { %6289 = vmatprep.subr.msk.mxu0 %vm99_vm10, %v7430_v10 }
0x1c87   :  { %6290 = vmatpush3.xpose.msk.msra.mxu0 %vm99_vm10, %v7430_v10 }
0x1c88   :  { %6291 = vmatprep.subr.msk.mxu0 %vm99_vm10, %v7436_v49 }
0x1c8b   :  { %6292 = vmatpush3.xpose.msk.msra.mxu0 %vm99_vm10, %v7436_v49 }
0x1cd1   :  { %v3856_v28 = vpop.xlane.xlu1 %3855 }
0x1cd2   :  { %v3858_v19 = vmul.f32 0.03125, %v3856_v28 }
0x1cd3   :  { %v3853_v44 = vpop.xlane.xlu0 %3852 }
0x1cd4   :  { %v3860_v29 = vadd.f32 1e-05, %v3858_v19  ;;  %v3857_v31 = vmul.f32 0.03125, %v3853_v44 }
0x1cd6   :  { %6539 = vrsqrt.f32 %v3860_v29  ;;  %v3859_v35 = vadd.f32 1e-05, %v3857_v31 }
0x1cd8   :  { %6541 = vrsqrt.f32 %v3859_v35 }
0x1ce3   :  { %v6540_v39 = vpop.eup %6539 }
0x1ce4   :  { %v3864_v33 = vmul.f32 %v6540_v39, %v3848_v53 }
0x1ce5   :  { %v6542_v34 = vpop.eup %6541 }
0x1ce6   :  { %v3863_v50 = vmul.f32 %v6542_v34, %v3847_v52  ;;  %v3870_v40 = vmul.f32 %v3868_v22, %v3864_v33  ;;  %v7546_v34 = vld [vmem:[%s7749_s3] sm:$0xff] }
0x1ce8   :  { %v3869_v45 = vmul.f32 %v3868_v22, %v3863_v50  ;;  %v3876_v36 = vadd.f32 %v3874_v8, %v3870_v40  ;;  %v7540_v22 = vld [vmem:[%s7749_s3 + $0x8] sm:$0xff] }
0x1cea   :  { %v3875_v46 = vadd.f32 %v3874_v8, %v3869_v45  ;;  %v3878_v38 = vadd.f32 %v7238_v51, %v3876_v36  ;;  %v6595_v51 = vld [vmem:[%s7747_s1 + $0x30] sm:$0xff] }
0x1cec   :  { %v3877_v30 = vadd.f32 %v7231_v11, %v3875_v46  ;;  %v6594_v11 = vld [vmem:[%s7747_s1 + $0x28] sm:$0xff] }
0x1cee   :  { %6254 = vmatprep.mubr.msk.f32.mxu1 %vm99_vm10, %v3877_v30 }
0x1cef   :  { %6255 = vmatmul.mubr.msk.f32.vlgmr.msra.gmra.mxu1 %vm99_vm10, %v3878_v38 }
0x1cf0   :  { %6272 = vmatpush3.msra.mxu1 %v3893_v55  ;;  %6279 = vmatprep.mubr.msk.f32.mxu1 %vm99_vm10, %v6593_v18 }
0x1cf1   :  { %6273 = vmatprep.subr.mxu1 %v3892_v56 }
0x1cf2   :  { %6274 = vmatpush3.msra.mxu1 %v3892_v56 }
0x1cf3   :  { %6275 = vmatprep.subr.mxu1 %v3891_v16 }
0x1cf4   :  { %6276 = vmatpush3.msra.mxu1 %v3891_v16 }
0x1cf5   :  { %6277 = vmatprep.subr.mxu1 %v3890_v62 }
0x1cf6   :  { %6278 = vmatpush3.msra.mxu1 %v3890_v62 }
0x1cf7   :  { %6280 = vmatmul.mubr.msk.f32.vlgmr.msra.gmra.mxu1 %vm99_vm10, %v6594_v11  ;;  %6296 = vmatprep.subr.msk.mxu1 %vm99_vm10, %v7422_v21 }
0x1cf8   :  { %6282 = vmatprep.mubr.msk.f32.mxu1 %vm99_vm10, %v6595_v51  ;;  %6297 = vmatpush3.xpose.msk.msra.mxu1 %vm99_vm10, %v7422_v21 }
0x1cf9   :  { %6298 = vmatprep.subr.msk.mxu1 %vm99_vm10, %v7426_v23 }
0x1cfb   :  { %6283 = vmatmul.mubr.msk.f32.gmra.mxu1 %vm99_vm10, %v6596_v47 }
0x1cfc   :  { %6299 = vmatpush3.xpose.msk.msra.mxu1 %vm99_vm10, %v7426_v23 }
0x1cfd   :  { %6300 = vmatprep.subr.msk.mxu1 %vm99_vm10, %v7430_v10 }
0x1d00   :  { %6301 = vmatpush3.xpose.msk.msra.mxu1 %vm99_vm10, %v7430_v10 }
0x1d01   :  { %6302 = vmatprep.subr.msk.mxu1 %vm99_vm10, %v7436_v49 }
0x1d04   :  { %6303 = vmatpush3.xpose.msk.msra.mxu1 %vm99_vm10, %v7436_v49 }
0x1daf   :  { %v6256_v48 = vpop.f32.mrf.mxu1 }
0x1db0   :  { %v3981_v57 = vadd.f32 %v6256_v48, %v3902_v32 }
0x1db1   :  { %v3975_v58 = vpop.f32.mrf.mxu1 }
0x1db2   :  { %v3976_v53 = vadd.f32 %v3975_v58, %v3902_v32  ;;  %v7488_v26 = vmul.f32 0.35355338, %v3981_v57 }
0x1db4   :  { %v7490_v52 = vmul.f32 0.35355338, %v3976_v53  ;;  %v4165_v2 = vmul.f32 %v6675_v3, %v7488_v26  ;;  %v4286_v7 = vmul.f32 %v6677_v4, %v7488_v26 }
0x1db6   :  { %v4164_v0 = vmul.f32 %v6675_v3, %v7490_v52  ;;  %v4285_v1 = vmul.f32 %v6677_v4, %v7490_v52 }
0x1db7   :  { %v6281_v61 = vpop.f32.mrf.mxu1 }
0x1db8   :  { %6293 = vmatprep.mubr.msk.f32.mxu0 %vm99_vm10, %v4164_v0  ;;  %6304 = vmatprep.mubr.msk.f32.mxu1 %vm99_vm10, %v4285_v1  ;;  %v7506_v37 = vadd.f32 %v6281_v61, %v4078_v9 }
0x1db9   :  { %v4145_v15 = vpop.f32.mrf.mxu1  ;;  %6294 = vmatmul.mubr.msk.f32.vlgmr.msra.gmra.mxu0 %vm99_vm10, %v4165_v2  ;;  %6305 = vmatmul.mubr.msk.f32.vlgmr.msra.gmra.mxu1 %vm99_vm10, %v4286_v7 }
0x1dba   :  { %v7510_v14 = vadd.f32 %v4145_v15, %v4078_v9  ;;  %v4391_v28 = vmul.f32 %v6677_v4, %v7506_v37  ;;  %v4282_v29 = vmul.f32 %v6675_v3, %v7506_v37 }
0x1dbb   :  { %v6284_v55 = vpop.f32.mrf.mxu1 }
0x1dbc   :  { %v7508_v20 = vadd.f32 %v6284_v55, %v4078_v9  ;;  %v4390_v31 = vmul.f32 %v6677_v4, %v7510_v14  ;;  %v4281_v35 = vmul.f32 %v6675_v3, %v7510_v14  ;;  %v4557_v55 = vmul.f32 %v6679_v5, %v7488_v26 }
0x1dbd   :  { %v4155_v63 = vpop.f32.mrf.mxu1 }
0x1dbe   :  { %v7512_v13 = vadd.f32 %v4155_v63, %v4078_v9  ;;  %v4393_v54 = vmul.f32 %v6677_v4, %v7508_v20  ;;  %v4284_v24 = vmul.f32 %v6675_v3, %v7508_v20  ;;  %v4556_v9 = vmul.f32 %v6679_v5, %v7490_v52 }
0x1dbf   :  { %v4856_v15 = vmul.f32 %v6681_v6, %v7508_v20 }
0x1dc0   :  { %6307 = vmatprep.subr.mxu0 %v4393_v54  ;;  %v4392_v19 = vmul.f32 %v6677_v4, %v7512_v13  ;;  %6318 = vmatprep.subr.mxu1 %v4284_v24  ;;  %v4283_v44 = vmul.f32 %v6675_v3, %v7512_v13  ;;  %v7534_v4 = vmul.f32 %v6679_v5, %v7508_v20 }
0x1dc1   :  { %6308 = vmatpush3.msra.mxu0 %v4393_v54  ;;  %6319 = vmatpush3.msra.mxu1 %v4284_v24  ;;  %v4855_v63 = vmul.f32 %v6681_v6, %v7512_v13  ;;  %v4854_v54 = vmul.f32 %v6681_v6, %v7506_v37  ;;  %v4853_v20 = vmul.f32 %v6681_v6, %v7510_v14 }
0x1dc2   :  { %6309 = vmatprep.subr.mxu0 %v4392_v19  ;;  %6320 = vmatprep.subr.mxu1 %v4283_v44 }
0x1dc3   :  { %6310 = vmatpush3.msra.mxu0 %v4392_v19  ;;  %6321 = vmatpush3.msra.mxu1 %v4283_v44 }
0x1dc4   :  { %6311 = vmatprep.subr.mxu0 %v4391_v28  ;;  %6322 = vmatprep.subr.mxu1 %v4282_v29 }
0x1dc5   :  { %6312 = vmatpush3.msra.mxu0 %v4391_v28  ;;  %6323 = vmatpush3.msra.mxu1 %v4282_v29 }
0x1dc6   :  { %6313 = vmatprep.subr.mxu0 %v4390_v31  ;;  %6324 = vmatprep.subr.mxu1 %v4281_v35 }
0x1dc7   :  { %6314 = vmatpush3.msra.mxu0 %v4390_v31  ;;  %6325 = vmatpush3.msra.mxu1 %v4281_v35 }
0x1dc8   :  { %6329 = vmatprep.subr.msk.mxu0 %vm99_vm10, %v7422_v21  ;;  %6340 = vmatprep.subr.mxu1 %v7534_v4 }
0x1e79   :  { %v6306_v3 = vpop.f32.mrf.mxu1  ;;  %v6295_v16 = vpop.f32.mrf.mxu0 }
0x1e7a   :  { %v4365_v39 = vadd.f32 %v7540_v22, %v6306_v3  ;;  %v4256_v11 = vadd.f32 %v7540_v22, %v6295_v16 }
0x1e7b   :  { %v4359_v33 = vpop.f32.mrf.mxu1  ;;  %v4250_v62 = vpop.f32.mrf.mxu0 }
0x1e7c   :  { %v4360_v8 = vadd.f32 %v7546_v34, %v4359_v33  ;;  %v4371_v50 = vsel %vm99_vm10, %v4365_v39, -inf  ;;  %v4251_v32 = vadd.f32 %v7546_v34, %v4250_v62  ;;  %v4262_v57 = vsel %vm99_vm10, %v4256_v11, -inf }
0x1e7d   :  { %4372 = vmax.xlane.f32.xlu1 %v4371_v50 }
0x1e7e   :  { %v4368_v40 = vsel %vm99_vm10, %v4360_v8, -inf  ;;  %v4259_v58 = vsel %vm99_vm10, %v4251_v32, -inf }
0x1e7f   :  { %4369 = vmax.xlane.f32.xlu0 %v4368_v40 }
0x1f06   :  { %v4373_v45 = vpop.xlane.xlu1 %4372 }
0x1f07   :  { %v4375_v36 = vsub.f32 %v4365_v39, %v4373_v45 }
0x1f08   :  { %v4370_v46 = vpop.xlane.xlu0 %4369 }
0x1f09   :  { %v4378_v30 = vmul.f32 1.442695, %v4375_v36  ;;  %v4374_v38 = vsub.f32 %v4360_v8, %v4370_v46 }
0x1f0b   :  { %6543 = vpow2.f32 %v4378_v30  ;;  %v4376_v56 = vmul.f32 1.442695, %v4374_v38 }
0x1f0d   :  { %6545 = vpow2.f32 %v4376_v56 }
0x1f18   :  { %v6544_v18 = vpop.eup %6543 }
0x1f19   :  { %v4383_v51 = vsel %vm99_vm10, %v6544_v18, 0.0 }
0x1f1a   :  { %v6546_v47 = vpop.eup %6545  ;;  %4384 = vadd.xlane.f32.xlu1 %v4383_v51 }
0x1f1b   :  { %v4380_v48 = vsel %vm99_vm10, %v6546_v47, 0.0 }
0x1f1c   :  { %4381 = vadd.xlane.f32.xlu0 %v4380_v48 }
0x1f1e   :  { %4263 = vmax.xlane.f32.xlu1 %v4262_v57 }
0x1f20   :  { %4260 = vmax.xlane.f32.xlu0 %v4259_v58 }
0x1fa3   :  { %v4385_v53 = vpop.xlane.xlu1 %4384 }
0x1fa4   :  { %6547 = vrcp.f32 %v4385_v53 }
0x1fa5   :  { %v4382_v61 = vpop.xlane.xlu0 %4381 }
0x1fa6   :  { %6549 = vrcp.f32 %v4382_v61 }
0x1fa7   :  { %v4264_v24 = vpop.xlane.xlu1 %4263 }
0x1fa8   :  { %v4266_v19 = vsub.f32 %v4256_v11, %v4264_v24 }
0x1fa9   :  { %v4261_v28 = vpop.xlane.xlu0 %4260 }
0x1faa   :  { %v4265_v44 = vsub.f32 %v4251_v32, %v4261_v28  ;;  %v4269_v29 = vmul.f32 1.442695, %v4266_v19 }
0x1fac   :  { %v4267_v31 = vmul.f32 1.442695, %v4265_v44  ;;  %6551 = vpow2.f32 %v4269_v29 }
0x1fae   :  { %6553 = vpow2.f32 %v4267_v31 }
0x1fb1   :  { %v6548_v0 = vpop.eup %6547 }
0x1fb2   :  { %v4389_v7 = vmul.f32 %v6548_v0, %v6544_v18 }
0x1fb3   :  { %v6550_v1 = vpop.eup %6549 }
0x1fb4   :  { %v4388_v2 = vmul.f32 %v6550_v1, %v6546_v47 }
0x1fb6   :  { %6315 = vmatprep.mubr.msk.f32.mxu0 %vm99_vm10, %v4388_v2 }
0x1fb7   :  { %6316 = vmatmul.mubr.msk.f32.vlgmr.msra.gmra.mxu0 %vm99_vm10, %v4389_v7  ;;  %v4663_v7 = vmul.f32 %v6679_v5, %v7512_v13 }
0x1fb8   :  { %6330 = vmatpush3.xpose.msk.msra.mxu0 %vm99_vm10, %v7422_v21  ;;  %6337 = vmatprep.mubr.msk.f32.mxu0 %vm99_vm10, %v4556_v9  ;;  %v4662_v9 = vmul.f32 %v6679_v5, %v7506_v37  ;;  %v4748_v37 = vmul.f32 %v6681_v6, %v7490_v52 }
0x1fb9   :  { %6331 = vmatprep.subr.msk.mxu0 %vm99_vm10, %v7426_v23  ;;  %v6552_v45 = vpop.eup %6551 }
0x1fba   :  { %v4274_v30 = vsel %vm99_vm10, %v6552_v45, 0.0 }
0x1fbb   :  { %v6554_v46 = vpop.eup %6553 }
0x1fbc   :  { %6332 = vmatpush3.xpose.msk.msra.mxu0 %vm99_vm10, %v7426_v23  ;;  %v4271_v38 = vsel %vm99_vm10, %v6554_v46, 0.0 }
0x1fbd   :  { %6333 = vmatprep.subr.msk.mxu0 %vm99_vm10, %v7430_v10 }
0x1fc0   :  { %6334 = vmatpush3.xpose.msk.msra.mxu0 %vm99_vm10, %v7430_v10 }
0x1fc1   :  { %6335 = vmatprep.subr.msk.mxu0 %vm99_vm10, %v7436_v49 }
0x1fc4   :  { %6336 = vmatpush3.xpose.msk.msra.mxu0 %vm99_vm10, %v7436_v49 }
0x1fc5   :  { %6362 = vmatprep.subr.mxu0 %v4856_v15 }
0x1fc7   :  { %6338 = vmatmul.mubr.msk.f32.vlgmr.msra.gmra.mxu0 %vm99_vm10, %v4557_v55 }
0x1fc8   :  { %6363 = vmatpush3.msra.mxu0 %v4856_v15  ;;  %v4661_v15 = vmul.f32 %v6679_v5, %v7510_v14  ;;  %v4749_v5 = vmul.f32 %v6681_v6, %v7488_v26 }
0x1fc9   :  { %6364 = vmatprep.subr.mxu0 %v4855_v63 }
0x1fca   :  { %6365 = vmatpush3.msra.mxu0 %v4855_v63 }
0x1fcb   :  { %6366 = vmatprep.subr.mxu0 %v4854_v54 }
0x1fcc   :  { %6367 = vmatpush3.msra.mxu0 %v4854_v54 }
0x1fcd   :  { %6368 = vmatprep.subr.mxu0 %v4853_v20 }
0x1fce   :  { %6369 = vmatpush3.msra.mxu0 %v4853_v20 }
0x2077   :  { %v7587_v35 = vpop.f32.mrf.mxu0 }
0x2079   :  { %v7589_v3 = vpop.f32.mrf.mxu0 }
0x2087   :  { %v6339_v39 = vpop.f32.mrf.mxu0 }
0x2088   :  { %v4636_v33 = vadd.f32 %v7540_v22, %v6339_v39 }
0x2089   :  { %v4630_v8 = vpop.f32.mrf.mxu0 }
0x208a   :  { %v4631_v50 = vadd.f32 %v7546_v34, %v4630_v8  ;;  %v4642_v40 = vsel %vm99_vm10, %v4636_v33, -inf }
0x208b   :  { %4643 = vmax.xlane.f32.xlu1 %v4642_v40 }
0x208c   :  { %v4639_v36 = vsel %vm99_vm10, %v4631_v50, -inf }
0x208d   :  { %4640 = vmax.xlane.f32.xlu0 %v4639_v36 }
0x208f   :  { %4275 = vadd.xlane.f32.xlu1 %v4274_v30 }
0x2091   :  { %4272 = vadd.xlane.f32.xlu0 %v4271_v38 }
0x2114   :  { %v4644_v56 = vpop.xlane.xlu1 %4643 }
0x2115   :  { %v4646_v16 = vsub.f32 %v4636_v33, %v4644_v56 }
0x2116   :  { %v4641_v18 = vpop.xlane.xlu0 %4640 }
0x2117   :  { %v4649_v62 = vmul.f32 1.442695, %v4646_v16  ;;  %v4645_v11 = vsub.f32 %v4631_v50, %v4641_v18  ;;  %v3897_v18 = vld [vmem:[#allocation2 + $0x1f0] sm:$0xff] }
0x2118   :  { %v4276_v51 = vpop.xlane.xlu1 %4275 }
0x2119   :  { %6555 = vpow2.f32 %v4649_v62  ;;  %v4647_v47 = vmul.f32 1.442695, %v4645_v11  ;;  %v3896_v62 = vld [vmem:[#allocation2 + $0x1e8] sm:$0xff]  ;;  %v3895_v11 = vld [vmem:[#allocation2 + $0x1e0] sm:$0xff] }
0x211a   :  { %6557 = vrcp.f32 %v4276_v51  ;;  %v4273_v32 = vpop.xlane.xlu0 %4272 }
0x211b   :  { %6559 = vpow2.f32 %v4647_v47 }
0x211c   :  { %6561 = vrcp.f32 %v4273_v32 }
0x2126   :  { %v6556_v48 = vpop.eup %6555 }
0x2127   :  { %v6558_v57 = vpop.eup %6557  ;;  %v4654_v58 = vsel %vm99_vm10, %v6556_v48, 0.0 }
0x2128   :  { %v6560_v53 = vpop.eup %6559  ;;  %4655 = vadd.xlane.f32.xlu1 %v4654_v58  ;;  %v4280_v2 = vmul.f32 %v6558_v57, %v6552_v45  ;;  %v3898_v45 = vld [vmem:[#allocation2 + $0x1f8] sm:$0xff] }
0x2129   :  { %v6562_v61 = vpop.eup %6561  ;;  %v4651_v0 = vsel %vm99_vm10, %v6560_v53, 0.0  ;;  %6373 = vmatprep.subr.mxu0 %v3898_v45 }
0x212a   :  { %4652 = vadd.xlane.f32.xlu0 %v4651_v0  ;;  %v4279_v1 = vmul.f32 %v6562_v61, %v6554_v46 }
0x212c   :  { %6326 = vmatprep.mubr.msk.f32.mxu1 %vm99_vm10, %v4279_v1 }
0x212d   :  { %6327 = vmatmul.mubr.msk.f32.vlgmr.msra.gmra.mxu1 %vm99_vm10, %v4280_v2 }
0x212e   :  { %6341 = vmatpush3.msra.mxu1 %v7534_v4 }
0x212f   :  { %6342 = vmatprep.subr.mxu1 %v4663_v7 }
0x2130   :  { %6343 = vmatpush3.msra.mxu1 %v4663_v7 }
0x2131   :  { %6344 = vmatprep.subr.mxu1 %v4662_v9 }
0x2132   :  { %6345 = vmatpush3.msra.mxu1 %v4662_v9 }
0x2133   :  { %6346 = vmatprep.subr.mxu1 %v4661_v15 }
0x2134   :  { %6347 = vmatpush3.msra.mxu1 %v4661_v15 }
0x2135   :  { %6351 = vmatprep.subr.msk.mxu1 %vm99_vm10, %v7422_v21 }
0x21b1   :  { %v4656_v55 = vpop.xlane.xlu1 %4655 }
0x21b2   :  { %6563 = vrcp.f32 %v4656_v55 }
0x21b3   :  { %v4653_v13 = vpop.xlane.xlu0 %4652 }
0x21b4   :  { %6565 = vrcp.f32 %v4653_v13 }
0x21bf   :  { %v6564_v4 = vpop.eup %6563 }
0x21c0   :  { %v4660_v20 = vmul.f32 %v6564_v4, %v6556_v48 }
0x21c1   :  { %v6566_v63 = vpop.eup %6565 }
0x21c2   :  { %v4659_v54 = vmul.f32 %v6566_v63, %v6560_v53  ;;  %v7647_v53 = vld [vmem:[%s7752_s6 + $0x18] sm:$0xff] }
0x21c3   :  { %v4943_v61 = vrot.slane %v7647_v53, %v7132_v17 }
0x21c4   :  { %6348 = vmatprep.mubr.msk.f32.mxu1 %vm99_vm10, %v4659_v54 }
0x21c5   :  { %6349 = vmatmul.mubr.msk.f32.vlgmr.msra.gmra.mxu1 %vm99_vm10, %v4660_v20 }
0x21c6   :  { %6352 = vmatpush3.xpose.msk.msra.mxu1 %vm99_vm10, %v7422_v21  ;;  %6359 = vmatprep.mubr.msk.f32.mxu1 %vm99_vm10, %v4748_v37 }
0x21c7   :  { %6353 = vmatprep.subr.msk.mxu1 %vm99_vm10, %v7426_v23 }
0x21ca   :  { %6354 = vmatpush3.xpose.msk.msra.mxu1 %vm99_vm10, %v7426_v23 }
0x21cb   :  { %6355 = vmatprep.subr.msk.mxu1 %vm99_vm10, %v7430_v10 }
0x21ce   :  { %6356 = vmatpush3.xpose.msk.msra.mxu1 %vm99_vm10, %v7430_v10 }
0x21cf   :  { %6357 = vmatprep.subr.msk.mxu1 %vm99_vm10, %v7436_v49 }
0x21d2   :  { %6358 = vmatpush3.xpose.msk.msra.mxu1 %vm99_vm10, %v7436_v49 }
0x21d5   :  { %6360 = vmatmul.mubr.msk.f32.vlgmr.msra.gmra.mxu1 %vm99_vm10, %v4749_v5 }
0x21ed   :  { %v6328_v21 = vpop.f32.mrf.mxu1 }
0x21ee   :  { %v4553_v23 = vadd.f32 %v6328_v21, %v7587_v35 }
0x21ef   :  { %v4547_v52 = vpop.f32.mrf.mxu1 }
0x21f0   :  { %v4548_v51 = vadd.f32 %v4547_v52, %v7589_v3  ;;  %v5485_v52 = vld [vmem:[%s7751_s5 + $0x78] sm:$0xff] }
0x21f1   :  { %6384 = vmatprep.subr.mxu1 %v5485_v52 }
0x21f2   :  { %6385 = vmatpush3.msra.mxu1 %v5485_v52  ;;  %v5241_v52 = vld [vmem:[%s7753_s7] sm:$0xff] }
0x2285   :  { %v6350_v14 = vpop.f32.mrf.mxu1 }
0x2286   :  { %v4747_v24 = vadd.f32 %v6350_v14, %v4553_v23  ;;  %v5484_v23 = vld [vmem:[%s7751_s5 + $0x70] sm:$0xff]  ;;  %v5483_v14 = vld [vmem:[%s7751_s5 + $0x68] sm:$0xff] }
0x2287   :  { %v4737_v28 = vpop.f32.mrf.mxu1  ;;  %6386 = vmatprep.subr.mxu1 %v5484_v23 }
0x2288   :  { %v4746_v32 = vadd.f32 %v4737_v28, %v4548_v51  ;;  %6387 = vmatpush3.msra.mxu1 %v5484_v23  ;;  %v5493_v28 = vld [vmem:[%s7751_s5 + $0xb8] sm:$0xff] }
0x2289   :  { %6388 = vmatprep.subr.mxu1 %v5483_v14 }
0x228a   :  { %6389 = vmatpush3.msra.mxu1 %v5483_v14 }
0x2295   :  { %v6361_v19 = vpop.f32.mrf.mxu1 }
0x2296   :  { %v4828_v10 = vadd.f32 %v7540_v22, %v6361_v19  ;;  %v5492_v19 = vld [vmem:[%s7751_s5 + $0xb0] sm:$0xff] }
0x2297   :  { %v4822_v44 = vpop.f32.mrf.mxu1 }
0x2298   :  { %v4823_v29 = vadd.f32 %v7546_v34, %v4822_v44  ;;  %v4834_v49 = vsel %vm99_vm10, %v4828_v10, -inf  ;;  %v5490_v44 = vld [vmem:[%s7751_s5 + $0xa0] sm:$0xff] }
0x2299   :  { %4835 = vmax.xlane.f32.xlu1 %v4834_v49 }
0x229a   :  { %v4831_v6 = vsel %vm99_vm10, %v4823_v29, -inf }
0x229b   :  { %4832 = vmax.xlane.f32.xlu0 %v4831_v6 }
0x2322   :  { %v4836_v26 = vpop.xlane.xlu1 %4835 }
0x2323   :  { %v4838_v31 = vsub.f32 %v4828_v10, %v4836_v26  ;;  %v5491_v10 = vld [vmem:[%s7751_s5 + $0xa8] sm:$0xff] }
0x2324   :  { %v4833_v39 = vpop.xlane.xlu0 %4832 }
0x2325   :  { %v4841_v33 = vmul.f32 1.442695, %v4838_v31  ;;  %v4837_v35 = vsub.f32 %v4823_v29, %v4833_v39 }
0x2327   :  { %6567 = vpow2.f32 %v4841_v33  ;;  %v4839_v8 = vmul.f32 1.442695, %v4837_v35  ;;  %v6600_v35 = vld [vmem:[%s7752_s6 + $0x10] sm:$0xff] }
0x2329   :  { %6569 = vpow2.f32 %v4839_v8  ;;  %v5056_v8 = vrot.slane %v6600_v35, %v6975_v60  ;;  %v5488_v60 = vld [vmem:[%s7751_s5 + $0x90] sm:$0xff] }
0x2334   :  { %v6568_v50 = vpop.eup %6567 }
0x2335   :  { %v4846_v22 = vsel %vm99_vm10, %v6568_v50, 0.0 }
0x2336   :  { %v6570_v40 = vpop.eup %6569  ;;  %4847 = vadd.xlane.f32.xlu1 %v4846_v22 }
0x2337   :  { %v4843_v34 = vsel %vm99_vm10, %v6570_v40, 0.0 }
0x2338   :  { %4844 = vadd.xlane.f32.xlu0 %v4843_v34 }
0x23bf   :  { %v4848_v36 = vpop.xlane.xlu1 %4847 }
0x23c0   :  { %6571 = vrcp.f32 %v4848_v36 }
0x23c1   :  { %v4845_v46 = vpop.xlane.xlu0 %4844 }
0x23c2   :  { %6573 = vrcp.f32 %v4845_v46 }
0x23cd   :  { %v6572_v30 = vpop.eup %6571 }
0x23ce   :  { %v4852_v16 = vmul.f32 %v6572_v30, %v6568_v50 }
0x23cf   :  { %v6574_v38 = vpop.eup %6573 }
0x23d0   :  { %v4851_v56 = vmul.f32 %v6574_v38, %v6570_v40  ;;  %v5489_v38 = vld [vmem:[%s7751_s5 + $0x98] sm:$0xff] }
0x23d2   :  { %6370 = vmatprep.mubr.msk.f32.mxu0 %vm99_vm10, %v4851_v56  ;;  %v5486_v56 = vld [vmem:[%s7751_s5 + $0x80] sm:$0xff] }
0x23d3   :  { %6371 = vmatmul.mubr.msk.f32.vlgmr.msra.gmra.mxu0 %vm99_vm10, %v4852_v16  ;;  %v5068_v16 = vrot.slane %v7647_v53, %v6723_v42 }
0x23d4   :  { %6374 = vmatpush3.msra.mxu0 %v3898_v45  ;;  %v5062_v45 = vrot.slane %v6600_v35, %v7132_v17  ;;  %v5487_v17 = vld [vmem:[%s7751_s5 + $0x88] sm:$0xff]  ;;  %v5275_v35 = vrot.slane %v5241_v52, %v6687_v25 }
0x23d5   :  { %6375 = vmatprep.subr.mxu0 %v3897_v18 }
0x23d6   :  { %6376 = vmatpush3.msra.mxu0 %v3897_v18 }
0x23d7   :  { %6377 = vmatprep.subr.mxu0 %v3896_v62 }
0x23d8   :  { %6378 = vmatpush3.msra.mxu0 %v3896_v62 }
0x23d9   :  { %6379 = vmatprep.subr.mxu0 %v3895_v11 }
0x23da   :  { %6380 = vmatpush3.msra.mxu0 %v3895_v11 }
0x23db   :  { %6395 = vmatprep.subr.mxu0 %v5493_v28 }
0x2493   :  { %v6372_v47 = vpop.f32.mrf.mxu0 }
0x2494   :  { %v4939_v58 = vadd.f32 %v6372_v47, %v4747_v24  ;;  %v5482_v24 = vld [vmem:[%s7751_s5 + $0x60] sm:$0xff] }
0x2495   :  { %v4929_v48 = vpop.f32.mrf.mxu0  ;;  %6390 = vmatprep.subr.mxu1 %v5482_v24 }
0x2496   :  { %v4938_v57 = vadd.f32 %v4929_v48, %v4746_v32  ;;  %6391 = vmatpush3.msra.mxu1 %v5482_v24  ;;  %v5238_v48 = vrot.slane %v7647_v53, %v6720_v41 }
0x2498   :  { %6381 = vmatprep.mubr.msk.f32.mxu0 %vm99_vm10, %v4938_v57 }
0x2499   :  { %6382 = vmatmul.mubr.msk.f32.vlgmr.msra.gmra.mxu0 %vm99_vm10, %v4939_v58 }
0x249a   :  { %6396 = vmatpush3.msra.mxu0 %v5493_v28  ;;  %v5294_v28 = vrot.slane %v5241_v52, 3 }
0x249b   :  { %6397 = vmatprep.subr.mxu0 %v5492_v19 }
0x249c   :  { %6398 = vmatpush3.msra.mxu0 %v5492_v19 }
0x249d   :  { %6399 = vmatprep.subr.mxu0 %v5491_v10 }
0x249e   :  { %6400 = vmatpush3.msra.mxu0 %v5491_v10 }
0x249f   :  { %6401 = vmatprep.subr.mxu0 %v5490_v44 }
0x24a0   :  { %6402 = vmatpush3.msra.mxu0 %v5490_v44 }
0x24a1   :  { %6403 = vmatprep.subr.mxu0 %v5489_v38 }
0x24a2   :  { %6404 = vmatpush3.msra.mxu0 %v5489_v38 }
0x24a3   :  { %6405 = vmatprep.subr.mxu0 %v5488_v60 }
0x24a4   :  { %6406 = vmatpush3.msra.mxu0 %v5488_v60 }
0x24a5   :  { %6407 = vmatprep.subr.mxu0 %v5487_v17 }
0x24a6   :  { %6408 = vmatpush3.msra.mxu0 %v5487_v17 }
0x24a7   :  { %6409 = vmatprep.subr.mxu0 %v5486_v56 }
0x24a8   :  { %6410 = vmatpush3.msra.mxu0 %v5486_v56 }
0x2559   :  { %v6383_v0 = vpop.f32.mrf.mxu0 }
0x255a   :  { %v5022_v1 = vadd.f32 %v6383_v0, %v4943_v61 }
0x255b   :  { %v5016_v3 = vpop.f32.mrf.mxu0 }
0x255c   :  { %v7652_v2 = vadd.f32 %v5022_v1, %v7395_v59  ;;  %v5017_v7 = vadd.f32 %v5016_v3, %v4943_v61 }
0x255e   :  { %v7655_v9 = vadd.f32 %v5017_v7, %v7398_v43  ;;  %v5030_v15 = vsel %vm99_vm10, %v7652_v2, 0.0 }
0x255f   :  { %5031 = vadd.xlane.f32.xlu1 %v5030_v15 }
0x2560   :  { %v5027_v55 = vsel %vm99_vm10, %v7655_v9, 0.0 }
0x2561   :  { %5028 = vadd.xlane.f32.xlu0 %v5027_v55 }
0x25e8   :  { %v5032_v13 = vpop.xlane.xlu1 %5031 }
0x25e9   :  { %v5034_v4 = vmul.f32 0.03125, %v5032_v13 }
0x25ea   :  { %v5029_v63 = vpop.xlane.xlu0 %5028 }
0x25eb   :  { %v5036_v54 = vsub.f32 %v7652_v2, %v5034_v4  ;;  %v5033_v20 = vmul.f32 0.03125, %v5029_v63 }
0x25ed   :  { %v5035_v59 = vsub.f32 %v7655_v9, %v5033_v20  ;;  %v5038_v37 = vmul.f32 %v5036_v54, %v5036_v54  ;;  %v5244_v20 = vld [vmem:[%s7753_s7 + $0x18] sm:$0xff] }
0x25ef   :  { %v5042_v43 = vsel %vm99_vm10, %v5038_v37, 0.0  ;;  %v5037_v5 = vmul.f32 %v5035_v59, %v5035_v59  ;;  %v5299_v37 = vrot.slane %v5244_v20, 3 }
0x25f0   :  { %5043 = vadd.xlane.f32.xlu1 %v5042_v43 }
0x25f1   :  { %v5039_v21 = vsel %vm99_vm10, %v5037_v5, 0.0  ;;  %v5243_v5 = vld [vmem:[%s7753_s7 + $0x10] sm:$0xff] }
0x25f2   :  { %5040 = vadd.xlane.f32.xlu0 %v5039_v21  ;;  %v5242_v21 = vld [vmem:[%s7753_s7 + $0x8] sm:$0xff]  ;;  %v5297_v14 = vrot.slane %v5243_v5, 3 }
0x25f3   :  { %v5295_v24 = vrot.slane %v5242_v21, 3 }
0x25f4   :  { %v5300_v19 = vsel %vm5293_vm13, %v5297_v14, %v5299_v37 }
0x25f5   :  { %v5298_v10 = vsel %vm5293_vm13, %v5295_v24, %v5297_v14  ;;  %v5296_v44 = vsel %vm5293_vm13, %v5294_v28, %v5295_v24 }
0x2679   :  { %v5044_v29 = vpop.xlane.xlu1 %5043 }
0x267a   :  { %v5046_v49 = vmul.f32 0.03125, %v5044_v29 }
0x267b   :  { %v5041_v6 = vpop.xlane.xlu0 %5040 }
0x267c   :  { %v5048_v26 = vadd.f32 1e-05, %v5046_v49  ;;  %v5045_v31 = vmul.f32 0.03125, %v5041_v6 }
0x267e   :  { %6575 = vrsqrt.f32 %v5048_v26  ;;  %v5047_v39 = vadd.f32 1e-05, %v5045_v31 }
0x2680   :  { %6577 = vrsqrt.f32 %v5047_v39 }
0x268b   :  { %v6576_v33 = vpop.eup %6575 }
0x268c   :  { %v5052_v50 = vmul.f32 %v6576_v33, %v5036_v54 }
0x268d   :  { %v6578_v22 = vpop.eup %6577 }
0x268e   :  { %v5051_v40 = vmul.f32 %v6578_v22, %v5035_v59  ;;  %v5058_v34 = vmul.f32 %v5056_v8, %v5052_v50  ;;  %v5245_v59 = vld [vmem:[%s7753_s7 + $0x20] sm:$0x7] }
0x268f   :  { %v5301_v43 = vrot.slane %v5245_v59, 3 }
0x2690   :  { %v5057_v36 = vmul.f32 %v5056_v8, %v5051_v40  ;;  %v5064_v30 = vadd.f32 %v5062_v45, %v5058_v34  ;;  %v5281_v34 = vrot.slane %v5241_v52, %v6695_v27 }
0x2691   :  { %v5302_v23 = vsel %vm5293_vm13, %v5299_v37, %v5301_v43 }
0x2692   :  { %v5063_v46 = vadd.f32 %v5062_v45, %v5057_v36  ;;  %6414 = vmatprep.subr.mxu1 %v5302_v23 }
0x2694   :  { %6392 = vmatprep.mubr.msk.f32.mxu1 %vm99_vm10, %v5063_v46 }
0x2695   :  { %6393 = vmatmul.mubr.msk.f32.vlgmr.msra.gmra.mxu1 %vm99_vm10, %v5064_v30  ;;  %v5287_v30 = vrot.slane %v5241_v52, %v6899_v12 }
0x2696   :  { %6415 = vmatpush3.msra.mxu1 %v5302_v23 }
0x2697   :  { %6416 = vmatprep.subr.mxu1 %v5300_v19 }
0x2698   :  { %6417 = vmatpush3.msra.mxu1 %v5300_v19 }
0x2699   :  { %6418 = vmatprep.subr.mxu1 %v5298_v10 }
0x269a   :  { %6419 = vmatpush3.msra.mxu1 %v5298_v10 }
0x269b   :  { %6420 = vmatprep.subr.mxu1 %v5296_v44 }
0x269c   :  { %6421 = vmatpush3.msra.mxu1 %v5296_v44 }
0x2755   :  { %v6394_v18 = vpop.f32.mrf.mxu1 }
0x2756   :  { %v5147_v62 = vadd.f32 %v6394_v18, %v5068_v16 }
0x2757   :  { %v5141_v11 = vpop.f32.mrf.mxu1 }
0x2758   :  { %v5142_v51 = vadd.f32 %v5141_v11, %v5068_v16  ;;  %v5151_v32 = vmax.f32 %v5147_v62, 0.0 }
0x275a   :  { %v5150_v47 = vmax.f32 %v5142_v51, 0.0 }
0x275c   :  { %6411 = vmatprep.mubr.msk.f32.mxu0 %vm2573_vm12, %v5150_v47 }
0x275d   :  { %6412 = vmatmul.mubr.msk.f32.vlgmr.msra.gmra.mxu0 %vm2573_vm12, %v5151_v32 }
0x281d   :  { %v6413_v57 = vpop.f32.mrf.mxu0 }
0x281e   :  { %v5234_v58 = vadd.f32 %v6413_v57, %v7652_v2 }
0x281f   :  { %v5224_v61 = vpop.f32.mrf.mxu0 }
0x2820   :  { %v5233_v0 = vadd.f32 %v5224_v61, %v7655_v9  ;;  %v5240_v42 = vadd.f32 %v5238_v48, %v5234_v58 }
0x2822   :  { %v5249_v1 = vsel %vm99_vm10, %v5240_v42, 0.0  ;;  %v5239_v3 = vadd.f32 %v5238_v48, %v5233_v0 }
0x2823   :  { %5250 = vadd.xlane.f32.xlu1 %v5249_v1 }
0x2824   :  { %v5246_v7 = vsel %vm99_vm10, %v5239_v3, 0.0 }
0x2825   :  { %5247 = vadd.xlane.f32.xlu0 %v5246_v7 }
0x28ac   :  { %v5251_v15 = vpop.xlane.xlu1 %5250 }
0x28ad   :  { %v5253_v55 = vmul.f32 0.03125, %v5251_v15 }
0x28ae   :  { %v5248_v13 = vpop.xlane.xlu0 %5247 }
0x28af   :  { %v5255_v4 = vsub.f32 %v5240_v42, %v5253_v55  ;;  %v5252_v63 = vmul.f32 0.03125, %v5248_v13 }
0x28b1   :  { %v5254_v41 = vsub.f32 %v5239_v3, %v5252_v63  ;;  %v5257_v53 = vmul.f32 %v5255_v4, %v5255_v4 }
0x28b3   :  { %v5261_v2 = vsel %vm99_vm10, %v5257_v53, 0.0  ;;  %v5256_v54 = vmul.f32 %v5254_v41, %v5254_v41 }
0x28b4   :  { %5262 = vadd.xlane.f32.xlu1 %v5261_v2 }
0x28b5   :  { %v5258_v9 = vsel %vm99_vm10, %v5256_v54, 0.0 }
0x28b6   :  { %5259 = vadd.xlane.f32.xlu0 %v5258_v9 }
0x293d   :  { %v5263_v29 = vpop.xlane.xlu1 %5262 }
0x293e   :  { %v5265_v49 = vmul.f32 0.03125, %v5263_v29 }
0x293f   :  { %v5260_v6 = vpop.xlane.xlu0 %5259 }
0x2940   :  { %v5267_v26 = vadd.f32 1e-05, %v5265_v49  ;;  %v5264_v31 = vmul.f32 0.03125, %v5260_v6 }
0x2942   :  { %6579 = vrsqrt.f32 %v5267_v26  ;;  %v5266_v39 = vadd.f32 1e-05, %v5264_v31 }
0x2944   :  { %6581 = vrsqrt.f32 %v5266_v39 }
0x294f   :  { %v6580_v33 = vpop.eup %6579 }
0x2950   :  { %v5271_v8 = vmul.f32 %v6580_v33, %v5255_v4 }
0x2951   :  { %v6582_v50 = vpop.eup %6581 }
0x2952   :  { %v5270_v22 = vmul.f32 %v6582_v50, %v5254_v41  ;;  %v5277_v40 = vmul.f32 %v5275_v35, %v5271_v8 }
0x2954   :  { %v5276_v45 = vmul.f32 %v5275_v35, %v5270_v22  ;;  %v5283_v46 = vadd.f32 %v5281_v34, %v5277_v40 }
0x2956   :  { %v5282_v36 = vadd.f32 %v5281_v34, %v5276_v45 }
0x2958   :  { %6422 = vmatprep.mubr.msk.f32.mxu1 %vm99_vm10, %v5282_v36 }
0x2959   :  { %6423 = vmatmul.mubr.msk.f32.vlgmr.msra.gmra.mxu1 %vm99_vm10, %v5283_v46 }
0x2a19   :  { %v6424_v38 = vpop.f32.mrf.mxu1 }
0x2a1a   :  { %v5385_v60 = vadd.f32 %v6424_v38, %v5287_v30 }
0x2a1b   :  { %v5379_v17 = vpop.f32.mrf.mxu1 }
0x2a1c   :  { %5390 = vst.msk [vmem:[%s7754_s8 + $0x8] sm:$0xff] %vm5388_vm14, %v5385_v60  ;;  %v5380_v25 = vadd.f32 %v5379_v17, %v5287_v30 }
0x2a1e   :  { %5389 = vst.msk [vmem:[%s7754_s8] sm:$0xff] %vm5388_vm14, %v5380_v25 }
0x2a1f   :  { %5395 = vsyncpa [#allocation3], 1 }

</bundles_post_ra>
